<compile_context>
chip_gen: v7x
topology: tpu7x:2x2x1
jax: 0.10.0
libtpu: 0.0.40
codegen_flags: <defaults>
</compile_context>

<pallas_src>
import functools

import jax
import jax.numpy as jnp
from jax import lax
from jax.experimental import pallas as pl
from jax.experimental.pallas import tpu as pltpu


def _vq_kernel(x_ref, e_ref, et_ref, e2h_ref,      # inputs
               q_ref, idx_ref, cnt_ref, sse_ref,   # outputs
               *, n_valid, tile_m):
    m = pl.program_id(1)                            # pixel-tile index (reduction axis)

    x = x_ref[0].astype(jnp.float32)                # (C, TM) channels-first tile
    e = e_ref[...].astype(jnp.float32)              # (K, C)
    et = et_ref[...].astype(jnp.float32)            # (C, K)
    e2h = e2h_ref[...]                              # (K, 1) = 0.5 * ||e_k||^2
    k = e.shape[0]

    # argmin_k ||x - e_k||^2  ==  argmin_k (0.5||e_k||^2 - e_k . x)
    scores = jnp.dot(e, x, preferred_element_type=jnp.float32)     # (K, TM)  MXU
    proxy = e2h - scores                                           # (K, TM)

    # first-minimum argmin over codes (matches torch.argmin tie-breaking)
    min_p = jnp.min(proxy, axis=0, keepdims=True)                  # (1, TM)
    row_iota = lax.broadcasted_iota(jnp.int32, proxy.shape, 0)     # (K, TM)
    idx = jnp.min(jnp.where(proxy == min_p, row_iota, k),
                  axis=0, keepdims=True)                           # (1, TM)

    onehot = (row_iota == idx).astype(jnp.float32)                 # (K, TM)

    masked = (n_valid % tile_m) != 0                               # static (trace-time)
    if masked:
        col = m * tile_m + lax.broadcasted_iota(jnp.int32, (1, tile_m), 1)
        valid = (col < n_valid).astype(jnp.float32)                # (1, TM)
        onehot = onehot * valid                                    # drop padded pixels

    # one-hot gather of the quantized embeddings, already channels-first
    q = jnp.dot(et, onehot, preferred_element_type=jnp.float32)    # (C, TM)  MXU

    q_ref[0] = q.astype(q_ref.dtype)
    idx_ref[...] = idx.astype(jnp.int32)[None, None]               # (1, 1, 1, TM)

    diff = q - x
    if masked:
        diff = diff * valid
    block_sse = jnp.sum(diff * diff)
    block_cnt = jnp.sum(onehot, axis=1, keepdims=True)             # (K, 1)

    @pl.when(m == 0)
    def _():
        cnt_ref[...] = jnp.zeros_like(cnt_ref)
        sse_ref[...] = jnp.zeros_like(sse_ref)

    cnt_ref[...] += block_cnt[None]
    sse_ref[...] += block_sse


def _choose_tile_m(m, max_tile):
    for t in (2048, 1024, 512, 256, 128):
        if t <= max_tile and m % t == 0:
            return t
    return min(max_tile, 128)          # fall back to 128-wide tiles + padding/mask


def codebook_forward(z, embeddings, *, max_row_tile=1024):
    """Eval-mode Codebook.forward.

    z: (B, C, T, H, W), C == embedding_dim.
    embeddings: (n_codes, embedding_dim).
    Returns dict(embeddings, encodings, commitment_loss, perplexity).
    """
    b, c, t, h, w = z.shape
    k, d = embeddings.shape
    assert c == d
    m = t * h * w

    tile_m = _choose_tile_m(m, max(128, max_row_tile))
    n_m = -(-m // tile_m)                   # cdiv
    m_pad = n_m * tile_m

    # free reshape (merges trailing dims); pad pixel axis only if needed
    z3 = z.reshape(b, c, m)
    if m_pad != m:
        z3 = jnp.pad(z3, ((0, 0), (0, 0), (0, m_pad - m)))

    emb_f32 = embeddings.astype(jnp.float32)
    et = emb_f32.T                                                   # (C, K)
    e2h = 0.5 * jnp.sum(emb_f32 * emb_f32, axis=1, keepdims=True)    # (K, 1), hoisted

    kernel = functools.partial(_vq_kernel, n_valid=m, tile_m=tile_m)

    grid = (b, n_m)
    out_shape = (
        jax.ShapeDtypeStruct((b, c, m_pad), z.dtype),            # quantized (channels-first)
        jax.ShapeDtypeStruct((b, n_m, 1, tile_m), jnp.int32),    # lane-dense indices
        jax.ShapeDtypeStruct((b, k, 1), jnp.float32),            # per-batch code counts
        jax.ShapeDtypeStruct((b, 1, 1), jnp.float32),            # per-batch SSE partials
    )
    grid_spec = pltpu.PrefetchScalarGridSpec(
        num_scalar_prefetch=0,
        grid=grid,
        in_specs=[
            pl.BlockSpec((1, c, tile_m), lambda bi, mi: (bi, 0, mi)),   # z tile
            pl.BlockSpec((k, d), lambda bi, mi: (0, 0)),                # codebook (resident)
            pl.BlockSpec((d, k), lambda bi, mi: (0, 0)),                # codebook^T (resident)
            pl.BlockSpec((k, 1), lambda bi, mi: (0, 0)),                # 0.5*||e||^2 (resident)
        ],
        out_specs=[
            pl.BlockSpec((1, c, tile_m), lambda bi, mi: (bi, 0, mi)),
            pl.BlockSpec((1, 1, 1, tile_m), lambda bi, mi: (bi, mi, 0, 0)),
            pl.BlockSpec((1, k, 1), lambda bi, mi: (bi, 0, 0)),   # accumulates over mi
            pl.BlockSpec((1, 1, 1), lambda bi, mi: (bi, 0, 0)),   # accumulates over mi
        ],
    )
    q3, idx4, counts, sse = pl.pallas_call(
        kernel,
        out_shape=out_shape,
        grid_spec=grid_spec,
        compiler_params=pltpu.CompilerParams(
            # batch axis parallel (2-TC split on v7x); pixel axis is the reduction
            dimension_semantics=("parallel", "arbitrary"),
            vmem_limit_bytes=32 * 1024 * 1024,   # covers large tiles on v5e's 16 MiB default
        ),
    )(z3, emb_f32, et, e2h)

    encodings = idx4.reshape(b, m_pad)[:, :m].reshape(b, t, h, w)
    emb_out = q3[:, :, :m].reshape(b, c, t, h, w)                 # already (B, C, T, H, W)

    n_rows = b * m
    sse_total = jnp.sum(sse)                                      # per-batch partials -> total
    commitment_loss = 0.25 * sse_total / jnp.float32(n_rows * d)  # == 0.25 * mse over z

    counts_total = jnp.sum(counts[:, :, 0], axis=0)               # (K,)
    avg_probs = counts_total / jnp.float32(n_rows)
    perplexity = jnp.exp(-jnp.sum(avg_probs * jnp.log(avg_probs + 1e-10)))

    # straight-through output equals the quantized embeddings in value
    return dict(embeddings=emb_out, encodings=encodings,
                commitment_loss=commitment_loss, perplexity=perplexity)


def _reference_forward(z, embeddings):
    """Pure-JAX reference for the correctness check (same nearest-code rule)."""
    b, c, t, h, w = z.shape
    flat = jnp.transpose(z, (0, 2, 3, 4, 1)).reshape(-1, c).astype(jnp.float32)
    e = embeddings.astype(jnp.float32)
    proxy = 0.5 * jnp.sum(e * e, axis=1)[None, :] - flat @ e.T
    idx = jnp.argmin(proxy, axis=1)
    q = e[idx]
    counts = jnp.zeros(e.shape[0], jnp.float32).at[idx].add(1.0)
    loss = 0.25 * jnp.mean((q - flat) ** 2)
    avg = counts / flat.shape[0]
    perp = jnp.exp(-jnp.sum(avg * jnp.log(avg + 1e-10)))
    return idx.reshape(b, t, h, w), q, loss, perp


if __name__ == "__main__":
    key = jax.random.PRNGKey(0)
    k_emb, k_z = jax.random.split(key)

    n_codes, embedding_dim = 128, 32
    B, T, H, W = 2, 8, 16, 16            # M = 2048 pixels per batch row

    embeddings = jax.random.normal(k_emb, (n_codes, embedding_dim), jnp.float32)
    z = jax.random.normal(k_z, (B, embedding_dim, T, H, W), jnp.float32)

    out = codebook_forward(z, embeddings)
    out = jax.block_until_ready(out)

    # correctness check against a pure-JAX reference
    ref_idx, ref_q, ref_loss, ref_perp = _reference_forward(z, embeddings)

    match = jnp.mean((out["encodings"] == ref_idx).astype(jnp.float32))
    assert match > 0.999, f"encoding mismatch fraction too high: {1.0 - match}"

    # quantized output must be the codebook rows selected by the emitted indices
    flat_out = jnp.transpose(out["embeddings"], (0, 2, 3, 4, 1)).reshape(-1, embedding_dim)
    gathered = embeddings[out["encodings"].reshape(-1)]
    assert jnp.allclose(flat_out, gathered, atol=1e-5)
    assert jnp.allclose(flat_out, ref_q, atol=1e-4)

    assert jnp.allclose(out["commitment_loss"], ref_loss, atol=1e-5, rtol=1e-4)
    assert jnp.allclose(out["perplexity"], ref_perp, atol=1e-2, rtol=1e-3)

    print("KERNEL_OK")
</pallas_src>

<mosaic_0001>
module attributes {stable_mosaic.version = 11 : i64} {
  func.func @_vq_kernel(%arg0: i32, %arg1: i32, %arg2: memref<1x32x1024xf32, #tpu.memory_space<vmem>>, %arg3: memref<128x32xf32, #tpu.memory_space<vmem>>, %arg4: memref<32x128xf32, #tpu.memory_space<vmem>>, %arg5: memref<128x1xf32, #tpu.memory_space<vmem>>, %arg6: memref<1x32x1024xf32, #tpu.memory_space<vmem>>, %arg7: memref<1x1x1x1024xi32, #tpu.memory_space<vmem>>, %arg8: memref<1x128x1xf32, #tpu.memory_space<vmem>>, %arg9: memref<1x1x1xf32, #tpu.memory_space<vmem>>) attributes {dimension_semantics = [#tpu.dimension_semantics<parallel>, #tpu.dimension_semantics<arbitrary>], iteration_bounds = array<i64: 2, 2>, scalar_prefetch = 0 : i64, scratch_operands = 0 : i64, tpu.core_type = #tpu.core_type<tc>, window_params = [{transform_indices = @transform_0, window_bounds = array<i64: 1, 32, 1024>}, {pipeline_mode = #tpu.pipeline_mode<synchronous>, transform_indices = @transform_1, window_bounds = array<i64: 128, 32>}, {pipeline_mode = #tpu.pipeline_mode<synchronous>, transform_indices = @transform_2, window_bounds = array<i64: 32, 128>}, {pipeline_mode = #tpu.pipeline_mode<synchronous>, transform_indices = @transform_3, window_bounds = array<i64: 128, 1>}, {transform_indices = @transform_4, window_bounds = array<i64: 1, 32, 1024>}, {transform_indices = @transform_5, window_bounds = array<i64: 1, 1, 1, 1024>}, {transform_indices = @transform_6, window_bounds = array<i64: 1, 128, 1>}, {transform_indices = @transform_7, window_bounds = array<i64: 1, 1, 1>}]} {
    %c0 = arith.constant 0 : index
    %c0_0 = arith.constant 0 : index
    %c0_1 = arith.constant 0 : index
    %0 = vector.load %arg2[%c0, %c0_0, %c0_1] : memref<1x32x1024xf32, #tpu.memory_space<vmem>>, vector<1x32x1024xf32>
    %1 = vector.shape_cast %0 : vector<1x32x1024xf32> to vector<32x1024xf32>
    %c0_2 = arith.constant 0 : index
    %c0_3 = arith.constant 0 : index
    %2 = vector.load %arg3[%c0_2, %c0_3] : memref<128x32xf32, #tpu.memory_space<vmem>>, vector<128x32xf32>
    %c0_4 = arith.constant 0 : index
    %c0_5 = arith.constant 0 : index
    %3 = vector.load %arg4[%c0_4, %c0_5] : memref<32x128xf32, #tpu.memory_space<vmem>>, vector<32x128xf32>
    %c0_6 = arith.constant 0 : index
    %c0_7 = arith.constant 0 : index
    %4 = vector.load %arg5[%c0_6, %c0_7] : memref<128x1xf32, #tpu.memory_space<vmem>>, vector<128x1xf32>
    %cst = arith.constant dense<0.000000e+00> : vector<128x1024xf32>
    %5 = tpu.matmul %2, %1, %cst {dimension_numbers = #tpu.dot_dimension_numbers<[1], [0], [0], [1], [0, 0, 1, 1], [], []>} : vector<128x32xf32>, vector<32x1024xf32>, vector<128x1024xf32> -> vector<128x1024xf32>
    %6 = vector.broadcast %4 : vector<128x1xf32> to vector<128x1024xf32>
    %7 = arith.subf %6, %5 : vector<128x1024xf32>
    %cst_8 = arith.constant dense<0x7F800000> : vector<1024xf32>
    %8 = vector.multi_reduction <minimumf>, %7, %cst_8 [0] : vector<128x1024xf32> to vector<1024xf32>
    %9 = vector.shape_cast %8 : vector<1024xf32> to vector<1x1024xf32>
    %10 = tpu.iota {dimensions = array<i32: 0>} : vector<128x1024xi32>
    %11 = vector.broadcast %9 : vector<1x1024xf32> to vector<128x1024xf32>
    %12 = arith.cmpf oeq, %7, %11 : vector<128x1024xf32>
    %c128_i32 = arith.constant 128 : i32
    %13 = vector.broadcast %c128_i32 : i32 to vector<128x1024xi32>
    %14 = arith.select %12, %10, %13 : vector<128x1024xi1>, vector<128x1024xi32>
    %cst_9 = arith.constant dense<2147483647> : vector<1024xi32>
    %15 = vector.multi_reduction <minsi>, %14, %cst_9 [0] : vector<128x1024xi32> to vector<1024xi32>
    %16 = vector.shape_cast %15 : vector<1024xi32> to vector<1x1024xi32>
    %17 = vector.broadcast %16 : vector<1x1024xi32> to vector<128x1024xi32>
    %18 = arith.cmpi eq, %10, %17 : vector<128x1024xi32>
    %19 = arith.extui %18 : vector<128x1024xi1> to vector<128x1024xi32>
    %20 = arith.sitofp %19 : vector<128x1024xi32> to vector<128x1024xf32>
    %cst_10 = arith.constant dense<0.000000e+00> : vector<32x1024xf32>
    %21 = tpu.matmul %3, %20, %cst_10 {dimension_numbers = #tpu.dot_dimension_numbers<[1], [0], [0], [1], [0, 0, 1, 1], [], []>} : vector<32x128xf32>, vector<128x1024xf32>, vector<32x1024xf32> -> vector<32x1024xf32>
    %c0_11 = arith.constant 0 : index
    %c0_12 = arith.constant 0 : index
    %c0_13 = arith.constant 0 : index
    %22 = vector.load %arg6[%c0_11, %c0_12, %c0_13] : memref<1x32x1024xf32, #tpu.memory_space<vmem>>, vector<1x32x1024xf32>
    %23 = vector.shape_cast %22 : vector<1x32x1024xf32> to vector<32x1024xf32>
    %24 = vector.shape_cast %21 : vector<32x1024xf32> to vector<1x32x1024xf32>
    tpu.vector_store %arg6[%c0_11, %c0_12, %c0_13], %24 {strides = array<i32>} : memref<1x32x1024xf32, #tpu.memory_space<vmem>>, vector<1x32x1024xf32>,
    %25 = vector.shape_cast %16 : vector<1x1024xi32> to vector<1x1x1x1024xi32>
    %c0_14 = arith.constant 0 : index
    %c0_15 = arith.constant 0 : index
    %c0_16 = arith.constant 0 : index
    %c0_17 = arith.constant 0 : index
    %26 = vector.load %arg7[%c0_14, %c0_15, %c0_16, %c0_17] : memref<1x1x1x1024xi32, #tpu.memory_space<vmem>>, vector<1x1x1x1024xi32>
    tpu.vector_store %arg7[%c0_14, %c0_15, %c0_16, %c0_17], %25 {strides = array<i32>} : memref<1x1x1x1024xi32, #tpu.memory_space<vmem>>, vector<1x1x1x1024xi32>,
    %27 = arith.subf %21, %1 : vector<32x1024xf32>
    %28 = arith.mulf %27, %27 : vector<32x1024xf32>
    %29 = vector.shape_cast %28 : vector<32x1024xf32> to vector<1x32x1024xf32>
    %cst_18 = arith.constant dense<0.000000e+00> : vector<1xf32>
    %30 = vector.multi_reduction <add>, %29, %cst_18 [1, 2] : vector<1x32x1024xf32> to vector<1xf32>
    %31 = vector.shape_cast %30 : vector<1xf32> to vector<1x1x1xf32>
    %32 = vector.extract %31[0, 0, 0] : f32 from vector<1x1x1xf32>
    %cst_19 = arith.constant dense<0.000000e+00> : vector<128xf32>
    %33 = vector.multi_reduction <add>, %20, %cst_19 [1] : vector<128x1024xf32> to vector<128xf32>
    %34 = vector.shape_cast %33 : vector<128xf32> to vector<128x1xf32>
    %c0_i32 = arith.constant 0 : i32
    %35 = arith.cmpi eq, %arg1, %c0_i32 : i32
    %36 = arith.extui %35 : i1 to i32
    %c0_i32_20 = arith.constant 0 : i32
    %37 = arith.cmpi ne, %36, %c0_i32_20 : i32
    scf.if %37 {
      %cst_33 = arith.constant 0.000000e+00 : f32
      %46 = vector.broadcast %cst_33 : f32 to vector<1x128x1xf32>
      %c0_34 = arith.constant 0 : index
      %c0_35 = arith.constant 0 : index
      %c0_36 = arith.constant 0 : index
      %47 = vector.load %arg8[%c0_34, %c0_35, %c0_36] : memref<1x128x1xf32, #tpu.memory_space<vmem>>, vector<1x128x1xf32>
      tpu.vector_store %arg8[%c0_34, %c0_35, %c0_36], %46 {strides = array<i32>} : memref<1x128x1xf32, #tpu.memory_space<vmem>>, vector<1x128x1xf32>,
      %cst_37 = arith.constant 0.000000e+00 : f32
      %48 = vector.broadcast %cst_37 : f32 to vector<1x1x1xf32>
      %c0_38 = arith.constant 0 : index
      %c0_39 = arith.constant 0 : index
      %c0_40 = arith.constant 0 : index
      %49 = vector.load %arg9[%c0_38, %c0_39, %c0_40] : memref<1x1x1xf32, #tpu.memory_space<vmem>>, vector<1x1x1xf32>
      tpu.vector_store %arg9[%c0_38, %c0_39, %c0_40], %48 {strides = array<i32>} : memref<1x1x1xf32, #tpu.memory_space<vmem>>, vector<1x1x1xf32>,
    } else {
    }
    %c0_21 = arith.constant 0 : index
    %c0_22 = arith.constant 0 : index
    %c0_23 = arith.constant 0 : index
    %38 = vector.load %arg8[%c0_21, %c0_22, %c0_23] : memref<1x128x1xf32, #tpu.memory_space<vmem>>, vector<1x128x1xf32>
    %39 = vector.shape_cast %34 : vector<128x1xf32> to vector<1x128x1xf32>
    %40 = arith.addf %38, %39 : vector<1x128x1xf32>
    %c0_24 = arith.constant 0 : index
    %c0_25 = arith.constant 0 : index
    %c0_26 = arith.constant 0 : index
    %41 = vector.load %arg8[%c0_24, %c0_25, %c0_26] : memref<1x128x1xf32, #tpu.memory_space<vmem>>, vector<1x128x1xf32>
    tpu.vector_store %arg8[%c0_24, %c0_25, %c0_26], %40 {strides = array<i32>} : memref<1x128x1xf32, #tpu.memory_space<vmem>>, vector<1x128x1xf32>,
    %c0_27 = arith.constant 0 : index
    %c0_28 = arith.constant 0 : index
    %c0_29 = arith.constant 0 : index
    %42 = vector.load %arg9[%c0_27, %c0_28, %c0_29] : memref<1x1x1xf32, #tpu.memory_space<vmem>>, vector<1x1x1xf32>
    %43 = vector.broadcast %32 : f32 to vector<1x1x1xf32>
    %44 = arith.addf %42, %43 : vector<1x1x1xf32>
    %c0_30 = arith.constant 0 : index
    %c0_31 = arith.constant 0 : index
    %c0_32 = arith.constant 0 : index
    %45 = vector.load %arg9[%c0_30, %c0_31, %c0_32] : memref<1x1x1xf32, #tpu.memory_space<vmem>>, vector<1x1x1xf32>
    tpu.vector_store %arg9[%c0_30, %c0_31, %c0_32], %44 {strides = array<i32>} : memref<1x1x1xf32, #tpu.memory_space<vmem>>, vector<1x1x1xf32>,
    return
  }
  func.func @transform_0(%arg0: i32, %arg1: i32) -> (i32, i32, i32) {
    %c0_i32 = arith.constant 0 : i32
    %c0_i32_0 = arith.constant 0 : i32
    return %arg0, %c0_i32, %arg1 : i32, i32, i32
  }
  func.func @transform_1(%arg0: i32, %arg1: i32) -> (i32, i32) {
    %c0_i32 = arith.constant 0 : i32
    %c0_i32_0 = arith.constant 0 : i32
    %c0_i32_1 = arith.constant 0 : i32
    return %c0_i32, %c0_i32_0 : i32, i32
  }
  func.func @transform_2(%arg0: i32, %arg1: i32) -> (i32, i32) {
    %c0_i32 = arith.constant 0 : i32
    %c0_i32_0 = arith.constant 0 : i32
    %c0_i32_1 = arith.constant 0 : i32
    return %c0_i32, %c0_i32_0 : i32, i32
  }
  func.func @transform_3(%arg0: i32, %arg1: i32) -> (i32, i32) {
    %c0_i32 = arith.constant 0 : i32
    %c0_i32_0 = arith.constant 0 : i32
    %c0_i32_1 = arith.constant 0 : i32
    return %c0_i32, %c0_i32_0 : i32, i32
  }
  func.func @transform_4(%arg0: i32, %arg1: i32) -> (i32, i32, i32) {
    %c0_i32 = arith.constant 0 : i32
    %c0_i32_0 = arith.constant 0 : i32
    return %arg0, %c0_i32, %arg1 : i32, i32, i32
  }
  func.func @transform_5(%arg0: i32, %arg1: i32) -> (i32, i32, i32, i32) {
    %c0_i32 = arith.constant 0 : i32
    %c0_i32_0 = arith.constant 0 : i32
    %c0_i32_1 = arith.constant 0 : i32
    return %arg0, %arg1, %c0_i32, %c0_i32_0 : i32, i32, i32, i32
  }
  func.func @transform_6(%arg0: i32, %arg1: i32) -> (i32, i32, i32) {
    %c0_i32 = arith.constant 0 : i32
    %c0_i32_0 = arith.constant 0 : i32
    %c0_i32_1 = arith.constant 0 : i32
    return %arg0, %c0_i32, %c0_i32_0 : i32, i32, i32
  }
  func.func @transform_7(%arg0: i32, %arg1: i32) -> (i32, i32, i32) {
    %c0_i32 = arith.constant 0 : i32
    %c0_i32_0 = arith.constant 0 : i32
    %c0_i32_1 = arith.constant 0 : i32
    return %arg0, %c0_i32, %c0_i32_0 : i32, i32, i32
  }
}

</mosaic_0001>

<bundles_post_ra>
// kernel: tpu_custom_call.1
= control target key start
LH: loop header
LB: loop body
LE: loop exit
PB: predicated region body
PF: predicated region fallthrough
CT: control target
= control target key end

     0   :  { %s8326_s0 = inlined_call_operand.hbm [shape: f32[2,32,2048], index: 0, kind: input, shape index: {}]   ;;  %s8327_s1 = inlined_call_operand.vmem [shape: f32[128,32], index: 1, kind: input, shape index: {}]   ;;  %s8328_s2 = inlined_call_operand.vmem [shape: f32[32,128], index: 2, kind: input, shape index: {}]   ;;  %s8329_s3 = inlined_call_operand.vmem [shape: f32[128,1], index: 3, kind: input, shape index: {}]   ;;  %s8330_s4 = inlined_call_operand.hbm [shape: f32[2,32,2048], index: 4, kind: output, shape index: {0}]   ;;  %s8331_s5 = inlined_call_operand.hbm [shape: s32[2,2,1,1024], index: 5, kind: output, shape index: {1}]   ;;  %s8332_s6 = inlined_call_operand.vmem [shape: f32[2,128,1], index: 6, kind: output, shape index: {2}]   ;;  %s8333_s7 = inlined_call_operand.vmem [shape: f32[2,1,1], index: 7, kind: output, shape index: {3}]  }
   0x1   :  { %8568 = sst [smem:[#allocation101_spill]] %s8326_s0 }
   0x2   :  { %8569 = sst [smem:[#allocation102_spill]] %s8327_s1 }
   0x3   :  { %8570 = sst [smem:[#allocation103_spill]] %s8328_s2 }
   0x4   :  { %8571 = sst [smem:[#allocation104_spill]] %s8329_s3 }
   0x5   :  { %8572 = sst [smem:[#allocation105_spill]] %s8331_s5 }
   0x6   :  { %13 = vsyncpa [#allocation3], 0 }
   0x7   :  { %15 = vsyncpa [#allocation3 + $0x1], 0 }
   0x8   :  { %16 = vsyncpa [#allocation4], 0 }
   0x9   :  { %18 = vsyncpa [#allocation4 + $0x1], 0 }
   0xa   :  { %19 = vsyncpa [#allocation7], 0 }
   0xb   :  { %21 = vsyncpa [#allocation7 + $0x1], 0  ;;  %s4291_s24 = smov 0   ;;  %s4293_s25 = smov 0  }
   0xc   :  { %s4295_s26 = smov 0   ;;  %s4297_s27 = smov 0  }
   0xd   :  { %s4299_s28 = smov 0   ;;  %s4301_s29 = smov 0  }
   0xe   :  { %s4303_s30 = smov 0   ;;  %s4305_s8 = smov 0  }
   0xf LB: > { %8573 = sst [smem:[#allocation11_spill]] %s4207_s24  ;;  %s3439_s9 = sadd.s32 4294967295, %s4235_s8   ;;  %s4235_s8 = sphi %s4305_s8, %s27_s8   ;;  %s4231_s30 = sphi %s4303_s30, %s8960_s30   ;;  %s4227_s29 = sphi %s4301_s29, %s8959_s29   ;;  %s4223_s28 = sphi %s4299_s28, %s8958_s28   ;;  %s4219_s27 = sphi %s4297_s27, %s8957_s27   ;;  %s4215_s26 = sphi %s4295_s26, %s8956_s26   ;;  %s4211_s25 = sphi %s4293_s25, %s8955_s25   ;;  %s4207_s24 = sphi %s4291_s24, %s8954_s24  }
  0x10   : > { %s3440_s10 = sadd.s32 4294967294, %s4235_s8   ;;  %s36_s11 = sadd.s32 1, %s4227_s29 }
  0x11   : > { %s39_s12 = sadd.s32 1, %s4231_s30  ;;  %p37_p0 = scmp.ge.s32.totalorder %s36_s11, 2 }
  0x12   : > { %s48_s13 = sadd.s32 1, %s4215_s26  ;;  %p55_p1 = scmp.ne.s32.totalorder %s4215_s26, %s4211_s25 }
  0x13   : > { %p56_p2 = scmp.eq.s32.totalorder %s4235_s8, 0  ;;  %s8962_s11 = smov (%p37_p0, %s36_s11), 0 }
  0x14   : > { %8574 = sst [smem:[#allocation12_spill]] %s8962_s11  ;;  %s8964_s12 = smov (!%p37_p0, %s39_s12), %s4231_s30 }
  0x15   : > { %s44_s14 = ssub.s32 %s4227_s29, %s8962_s11  ;;  %p4344_p3 = por %p56_p2, %p55_p1 }
  0x16   : > { %p41_p4 = scmp.ge.s32.totalorder %s8964_s12, 2  ;;  %p61_p5 = scmp.ne.s32.totalorder %s4211_s25, %s4207_s24 }
  0x17   : > { %p62_p6 = scmp.eq.s32.totalorder %s3439_s9, 0  ;;  %p150_p7 = scmp.eq.s32.totalorder %s3439_s9, 3 }
  0x18   : > { %s8966_s12 = smov (%p41_p4, %s8964_s12), 0  ;;  %p156_p10 = scmp.eq.s32.totalorder %s3440_s10, 3 }
  0x19   : > { %p4352_p8 = por %p62_p6, %p61_p5  ;;  %p4356_p9 = por %p150_p7, %p55_p1 }
  0x1a   : > { %s43_s18 = ssub.s32 %s4231_s30, %s8966_s12  ;;  %p4362_p12 = por %p156_p10, %p61_p5 }
  0x1b   : > { %s8577_s17 = scalar_select %p4356_p9, 1, 0 }
  0x1c   : > { %s45_s19 = sor.u32 %s44_s14, %s43_s18  ;;  %p3964_p13 = scmp.lt.s32.totalorder %s4235_s8, 4 }
  0x1d   : > { %8578 = sst [smem:[#allocation13_spill]] %s8577_s17  ;;  %p46_p11 = scmp.eq.s32.totalorder %s45_s19, 0 }
  0x1e   : > { %s8579_s20 = scalar_select %p4362_p12, 1, 0 }
  0x1f   : > { %s265_s21 = sand.u32 1, %s4215_s26   ;;  %s3444_s9 = sshll.u32 %s4227_s29, 3 }
  0x20   : > { %s4369_s22 = scalar_select %p46_p11, %s4215_s26, %s48_s13  }
  0x21   : > { %s3443_s23 = sshll.u32 %s265_s21, 8  ;;  %s3445_s11 = sshll.u32 %s4231_s30, 6 }
  0x22   : > { %s269_s24 = scalar_lea.vmem [#allocation2], %s3443_s23  ;;  %s275_s17 = sadd.s32 %s3445_s11, %s3444_s9 }
  0x23   : > { %s278_s5 = sshll.u32 %s269_s24, 4  ;;  %s3446_s10 = sshll.u32 %s275_s17, 7  ;;  %s4373_s5 = int_to_ptr.vmem [resolvable:$true] %s278_s5 }
  0x24   : > { %p4377_p0 = pnand %p3964_p13, %p4344_p3  ;;  %s8581_s0 = sld [smem:[#allocation101_spill]] }
  0x25   : > { %s4387_s24 = scalar_lea.sflag [#allocation3], %s265_s21 }
  0x26   : > { %p4077_p3 = pneg %p4377_p0 }
  0x2a   : > { %s4384_s13 = scalar_lea.hbm %s8581_s0, %s3446_s10  ;;  %s4080_s23 = scalar_lea.hbm %s8581_s0, 16384 }
  0x2b   : > { %s4075_s11 = scalar_lea.hbm %s4384_s13, 4096  ;;  %p4081_p6 = scmp.lt.u32.totalorder %s4384_s13, %s8581_s0 }
  0x2c   : > { %p4076_p2 = scmp.ne.s32.totalorder %s4384_s13, %s4075_s11  ;;  %p4082_p7 = scmp.lt.u32.totalorder %s4080_s23, %s4075_s11 }
  0x2d   : > { %p4084_p11 = scmp.lt.u32.totalorder %s4075_s11, %s4384_s13 }
  0x2e   : > { %p4078_p4 = pnand %p4077_p3, %p4076_p2  ;;  %p4083_p10 = por %p4082_p7, %p4081_p6 }
  0x30   : > { %p4079_p5 = pneg %p4078_p4  ;;  %p4085_p13 = por %p4084_p11, %p4083_p10 }
  0x32   : > { %p4086_p1 = pnand %p4085_p13, %p4079_p5 }
  0x34   : > { %4089 = shalt.err (!%p4086_p1)
}
  0x35   : > { %s4090_s21 = scalar_lea.vmem %s4373_s5, 4096  ;;  %s4237_s18 = smov [#allocation2]  }
  0x36   : > { %p4091_p2 = scmp.ne.s32.totalorder %s4373_s5, %s4090_s21  ;;  %s4095_s19 = sshll.u32 %s4237_s18, 4  ;;  %s4096_s19 = int_to_ptr.vmem [resolvable:$false] %s4095_s19 }
  0x37   : > { %s4097_s15 = scalar_lea.vmem %s4096_s19, 8192  ;;  %p4098_p9 = scmp.lt.s32.totalorder %s4373_s5, %s4096_s19 }
  0x38   : > { %p4093_p4 = pnand %p4091_p2, %p4077_p3  ;;  %p4099_p6 = scmp.lt.s32.totalorder %s4097_s15, %s4090_s21 }
  0x3a   : > { %p4094_p12 = pneg %p4093_p4  ;;  %p4100_p7 = por %p4099_p6, %p4098_p9 }
  0x3c   : > { %p4101_p10 = pnand %p4100_p7, %p4094_p12 }
  0x3e   : > { %4104 = shalt.err (!%p4101_p10)
}
  0x3f   : > { %s4238_s11 = smov 2048   ;;  %s4239_s17 = smov 1024  }
  0x40   : > { %s4240_s23 = smov 64   ;;  %p286_p1 = scmp.lt.s32.totalorder %s4235_s8, 5 }
  0x41   : > { %3956 = dma.hbm_to_vmem [thread:$0]  (!%p4377_p0), %s4384_s13, 4096, %s4373_s5, %s4387_s24, %s4238_s11, %s4239_s17, %s4240_s23  }
  0x42   : > { %p8582_p3 = scmp.ge.s32.totalorder %s4235_s8, 1 }
  0x44   : > { %p287_p5 = pnand %p8582_p3, %p286_p1 }
  0x46   : > { %290 = sbr.rel (%p287_p5) target bundleno = 1175 (0x497), region = 36 }
  0x4d   : > { %s4419_s9 = sand.u32 1, %s4211_s25  }
  0x4e   : > { %s3448_s10 = sshll.u32 %s4419_s9, 8  ;;  %s293_s21 = scalar_lea.sflag [#allocation3], %s4419_s9 }
  0x4f   : > { %s4425_s18 = scalar_lea.vmem [#allocation2], %s3448_s10 }
  0x50   : > { %4194 = dma.done.wait (%p4352_p8), %s293_s21, 4096  }
  0x51   : > { %4196 = vsyncadd (%p4352_p8), %s293_s21, 4294963200  ;;  %p342_p9 = scmp.lt.s32.totalorder %s4223_s28, 1  ;;  %v8340_v0 = vmov 0.0   ;;  %v4242_v1 = vmov 0   ;;  %v351_v2 = vld [vmem:[%s4425_s18 + $0x8] sm:$0xff]  ;;  %v353_v4 = vld [vmem:[%s4425_s18 + $0x18] sm:$0xff] }
  0x52   : > { %531 = vmatprep.mubr.f32.mxu0 %v8340_v0  ;;  %692 = vmatprep.mubr.f32.mxu1 %v8340_v0  ;;  %v359_v3 = vld [vmem:[%s4425_s18 + $0x48] sm:$0xff]  ;;  %v361_v6 = vld [vmem:[%s4425_s18 + $0x58] sm:$0xff]  ;;  %v350_v7 = vld [vmem:[%s4425_s18] sm:$0xff]  ;;  %s8583_s1 = sld [smem:[#allocation102_spill]]  ;;  %vm418_vm0 = vcmask 261120   ;;  %s8584_s3 = sld [smem:[#allocation104_spill]] }
  0x53   : > { %s343_s5 = scalar_select %p342_p9, %s4223_s28, 1  ;;  %4041 = vset.pattern.permute.xlu0 %v4242_v1  ;;  %4042 = vset.pattern.permute.xlu1 %v4242_v1  ;;  %v3785_v5 = vpack.c.bf16 %v359_v3, %v351_v2  ;;  %v358_v8 = vld [vmem:[%s4425_s18 + $0x40] sm:$0xff]  ;;  %v3793_v9 = vpack.c.bf16 %v361_v6, %v353_v4  ;;  %v352_v11 = vld [vmem:[%s4425_s18 + $0x10] sm:$0xff]  ;;  %v367_v13 = vld [vmem:[%s4425_s18 + $0x88] sm:$0xff] }
  0x54   : > { %v3787_v10 = vpack.c.bf16 %v358_v8, %v350_v7  ;;  %v360_v12 = vld [vmem:[%s4425_s18 + $0x50] sm:$0xff]  ;;  %v375_v15 = vld [vmem:[%s4425_s18 + $0xc8] sm:$0xff]  ;;  %v369_v16 = vld [vmem:[%s4425_s18 + $0x98] sm:$0xff]  ;;  %s3450_s23 = sshll.u32 %s4419_s9, 3  ;;  %s8926_s2 = sld [smem:[#allocation103_spill]] }
  0x55   : > { %s3784_s16 = sshll.u32 %s343_s5, 7  ;;  %s4438_s24 = scalar_lea.vmem %s8333_s7, %s343_s5  ;;  %3786 = vmatprep.subr.bf16.mxu0 %v3785_v5  ;;  %v3795_v14 = vpack.c.bf16 %v360_v12, %v352_v11  ;;  %v377_v17 = vld [vmem:[%s4425_s18 + $0xd8] sm:$0xff]  ;;  %3794 = vmatprep.subr.bf16.mxu1 %v3793_v9  ;;  %v3789_v18 = vpack.c.bf16 %v375_v15, %v367_v13  ;;  %v366_v20 = vld [vmem:[%s4425_s18 + $0x80] sm:$0xff]  ;;  %v368_v22 = vld [vmem:[%s4425_s18 + $0x90] sm:$0xff] }
  0x56   : > { %s4443_s11 = scalar_lea.vmem %s8332_s6, %s3784_s16  ;;  %3788 = vmatpush1.bf16.msra.mxu0 %v3787_v10  ;;  %v3797_v19 = vpack.c.bf16 %v377_v17, %v369_v16  ;;  %v374_v21 = vld [vmem:[%s4425_s18 + $0xc0] sm:$0xff]  ;;  %v376_v24 = vld [vmem:[%s4425_s18 + $0xd0] sm:$0xff]  ;;  %v355_v25 = vld [vmem:[%s4425_s18 + $0x28] sm:$0xff]  ;;  %s7237_s16 = scalar_lea.vmem [#allocation6], %s3450_s23 }
  0x57   : > { %3796 = vmatpush1.bf16.msra.mxu1 %v3795_v14  ;;  %v3791_v23 = vpack.c.bf16 %v374_v21, %v366_v20  ;;  %3790 = vmatprep.subr.bf16.mxu0 %v3789_v18  ;;  %v3799_v26 = vpack.c.bf16 %v376_v24, %v368_v22  ;;  %v363_v27 = vld [vmem:[%s4425_s18 + $0x68] sm:$0xff]  ;;  %v354_v28 = vld [vmem:[%s4425_s18 + $0x20] sm:$0xff]  ;;  %v357_v31 = vld [vmem:[%s4425_s18 + $0x38] sm:$0xff]  ;;  %s7992_s21 = scalar_lea.vmem [#allocation5], %s3448_s10  ;;  %p3773_p8 = scmp.ne.s32.totalorder %s4219_s27, 0 }
  0x58   : > { %3798 = vmatprep.subr.bf16.mxu1 %v3797_v19  ;;  %v362_v29 = vld [vmem:[%s4425_s18 + $0x60] sm:$0xff]  ;;  %v3801_v30 = vpack.c.bf16 %v363_v27, %v355_v25  ;;  %v365_v32 = vld [vmem:[%s4425_s18 + $0x78] sm:$0xff]  ;;  %v356_v36 = vld [vmem:[%s4425_s18 + $0x30] sm:$0xff] }
  0x59   : > { %v4470_v33 = vld [vmem:[%s8583_s1] sm:$0xff]  ;;  %v3803_v34 = vpack.c.bf16 %v362_v29, %v354_v28  ;;  %v3809_v35 = vpack.c.bf16 %v365_v32, %v357_v31  ;;  %v364_v37 = vld [vmem:[%s4425_s18 + $0x70] sm:$0xff]  ;;  %v371_v39 = vld [vmem:[%s4425_s18 + $0xa8] sm:$0xff] }
  0x5a   : > { %3792 = vmatpush1.bf16.msra.mxu0 %v3791_v23  ;;  %v3811_v38 = vpack.c.bf16 %v364_v37, %v356_v36  ;;  %v379_v40 = vld [vmem:[%s4425_s18 + $0xe8] sm:$0xff]  ;;  %v370_v41 = vld [vmem:[%s4425_s18 + $0xa0] sm:$0xff]  ;;  %v373_v45 = vld [vmem:[%s4425_s18 + $0xb8] sm:$0xff] }
  0x5b   : > { %3800 = vmatpush1.bf16.msra.mxu1 %v3799_v26  ;;  %3802 = vmatprep.subr.bf16.mxu0 %v3801_v30  ;;  %v4484_v42 = vld [vmem:[%s8583_s1 + $0x8] sm:$0xff]  ;;  %v3805_v43 = vpack.c.bf16 %v379_v40, %v371_v39  ;;  %v378_v44 = vld [vmem:[%s4425_s18 + $0xe0] sm:$0xff]  ;;  %v381_v47 = vld [vmem:[%s4425_s18 + $0xf8] sm:$0xff] }
  0x5c   : > { %3810 = vmatprep.subr.bf16.mxu1 %v3809_v35  ;;  %v3807_v46 = vpack.c.bf16 %v378_v44, %v370_v41  ;;  %v372_v48 = vld [vmem:[%s4425_s18 + $0xb0] sm:$0xff]  ;;  %v3813_v50 = vpack.c.bf16 %v381_v47, %v373_v45  ;;  %v402_v53 = vld [vmem:[%s8584_s3] sm:$0xff]  ;;  %v403_v55 = vld [vmem:[%s8584_s3 + $0x8] sm:$0xff] }
  0x5d   : > { %3453 = vmatmul.mubr.msk.f32.vlgmr.msra.gmra.mrb[0].mxu0 %vm418_vm0, %v4470_v33  ;;  %v380_v49 = vld [vmem:[%s4425_s18 + $0xf0] sm:$0xff]  ;;  %1113 = vperm.xlu0 %4041, %v402_v53   ;;  %v4521_v56 = vld [vmem:[%s8583_s1 + $0x18] sm:$0xff]  ;;  %v406_v58 = vld [vmem:[%s8584_s3 + $0x20] sm:$0xff] }
  0x5e   : > { %3469 = vmatmul.mubr.msk.f32.vlgmr.msra.gmra.mrb[0].mxu1 %vm418_vm0, %v4470_v33  ;;  %3804 = vmatpush1.bf16.msra.mxu0 %v3803_v34  ;;  %v3815_v51 = vpack.c.bf16 %v380_v49, %v372_v48  ;;  %v4501_v52 = vld [vmem:[%s8583_s1 + $0x10] sm:$0xff]  ;;  %v405_v57 = vld [vmem:[%s8584_s3 + $0x18] sm:$0xff]  ;;  %v4538_v59 = vld [vmem:[%s8583_s1 + $0x20] sm:$0xff] }
  0x5f   : > { %537 = vmatprep.mubr.f32.mxu0 %v8340_v0  ;;  %698 = vmatprep.mubr.f32.mxu1 %v8340_v0  ;;  %v404_v54 = vld [vmem:[%s8584_s3 + $0x10] sm:$0xff]  ;;  %v407_v60 = vld [vmem:[%s8584_s3 + $0x28] sm:$0xff]  ;;  %v409_v63 = vld [vmem:[%s8584_s3 + $0x38] sm:$0xff] }
  0x60   : > { %3812 = vmatpush1.bf16.msra.mxu1 %v3811_v38  ;;  %3806 = vmatprep.subr.bf16.mxu0 %v3805_v43  ;;  %v408_v61 = vld [vmem:[%s8584_s3 + $0x30] sm:$0xff]  ;;  %v4555_v62 = vld [vmem:[%s8583_s1 + $0x28] sm:$0xff]  ;;  %v410_v1 = vld [vmem:[%s8584_s3 + $0x40] sm:$0xff] }
  0x61   : > { %3454 = vmatmul.mubr.msk.f32.gmra.mrb[2].mxu0 %vm418_vm0, %v4484_v42  ;;  %3814 = vmatprep.subr.bf16.mxu1 %v3813_v50  ;;  %v4572_v2 = vld [vmem:[%s8583_s1 + $0x30] sm:$0xff]  ;;  %v411_v3 = vld [vmem:[%s8584_s3 + $0x48] sm:$0xff]  ;;  %v4589_v5 = vld [vmem:[%s8583_s1 + $0x38] sm:$0xff] }
  0x62   : > { %3470 = vmatmul.mubr.msk.f32.gmra.mrb[2].mxu1 %vm418_vm0, %v4484_v42  ;;  %543 = vmatprep.mubr.f32.mxu0 %v8340_v0  ;;  %v412_v4 = vld [vmem:[%s8584_s3 + $0x50] sm:$0xff]  ;;  %v413_v6 = vld [vmem:[%s8584_s3 + $0x58] sm:$0xff]  ;;  %v414_v7 = vld [vmem:[%s8584_s3 + $0x60] sm:$0xff] }
  0x63   : > { %704 = vmatprep.mubr.f32.mxu1 %v8340_v0  ;;  %3808 = vmatpush1.bf16.msra.mxu0 %v3807_v46  ;;  %v4606_v8 = vld [vmem:[%s8583_s1 + $0x40] sm:$0xff]  ;;  %v415_v9 = vld [vmem:[%s8584_s3 + $0x68] sm:$0xff]  ;;  %v416_v10 = vld [vmem:[%s8584_s3 + $0x70] sm:$0xff] }
  0x64   : > { %3816 = vmatpush1.bf16.msra.mxu1 %v3815_v51  ;;  %1123 = vperm.xlu1 %4042, %v404_v54   ;;  %v4623_v11 = vld [vmem:[%s8583_s1 + $0x48] sm:$0xff]  ;;  %v417_v12 = vld [vmem:[%s8584_s3 + $0x78] sm:$0xff]  ;;  %v4637_v13 = vld [vmem:[%s8583_s1 + $0x50] sm:$0xff] }
  0x65   : > { %3455 = vmatmul.mubr.msk.f32.gmra.mrb[4].mxu0 %vm418_vm0, %v4501_v52  ;;  %1118 = vperm.xlu0 %4041, %v403_v55   ;;  %v4648_v14 = vld [vmem:[%s8583_s1 + $0x58] sm:$0xff]  ;;  %v4659_v15 = vld [vmem:[%s8583_s1 + $0x60] sm:$0xff]  ;;  %v4670_v16 = vld [vmem:[%s8583_s1 + $0x68] sm:$0xff] }
  0x66   : > { %3471 = vmatmul.mubr.msk.f32.gmra.mrb[4].mxu1 %vm418_vm0, %v4501_v52  ;;  %549 = vmatprep.mubr.f32.mxu0 %v8340_v0  ;;  %v4681_v17 = vld [vmem:[%s8583_s1 + $0x70] sm:$0xff]  ;;  %v4692_v18 = vld [vmem:[%s8583_s1 + $0x78] sm:$0xff] }
  0x67   : > { %710 = vmatprep.mubr.f32.mxu1 %v8340_v0 }
  0x68   : > { %1128 = vperm.xlu1 %4042, %v405_v57  }
  0x69   : > { %3456 = vmatmul.mubr.msk.f32.gmra.mrb[6].mxu0 %vm418_vm0, %v4521_v56  ;;  %1133 = vperm.xlu0 %4041, %v406_v58  }
  0x6a   : > { %3472 = vmatmul.mubr.msk.f32.gmra.mrb[6].mxu1 %vm418_vm0, %v4521_v56  ;;  %555 = vmatprep.mubr.f32.mxu0 %v8340_v0 }
  0x6b   : > { %716 = vmatprep.mubr.f32.mxu1 %v8340_v0 }
  0x6c   : > { %1138 = vperm.xlu1 %4042, %v407_v60  }
  0x6d   : > { %3457 = vmatmul.mubr.msk.f32.gmra.mrb[8].mxu0 %vm418_vm0, %v4538_v59  ;;  %1143 = vperm.xlu0 %4041, %v408_v61  }
  0x6e   : > { %3473 = vmatmul.mubr.msk.f32.gmra.mrb[8].mxu1 %vm418_vm0, %v4538_v59  ;;  %561 = vmatprep.mubr.f32.mxu0 %v8340_v0 }
  0x6f   : > { %722 = vmatprep.mubr.f32.mxu1 %v8340_v0 }
  0x70   : > { %1148 = vperm.xlu1 %4042, %v409_v63  }
  0x71   : > { %3458 = vmatmul.mubr.msk.f32.gmra.mrb[10].mxu0 %vm418_vm0, %v4555_v62  ;;  %1153 = vperm.xlu0 %4041, %v410_v1  }
  0x72   : > { %3474 = vmatmul.mubr.msk.f32.gmra.mrb[10].mxu1 %vm418_vm0, %v4555_v62  ;;  %567 = vmatprep.mubr.f32.mxu0 %v8340_v0 }
  0x73   : > { %728 = vmatprep.mubr.f32.mxu1 %v8340_v0 }
  0x74   : > { %1158 = vperm.xlu1 %4042, %v411_v3  }
  0x75   : > { %3459 = vmatmul.mubr.msk.f32.gmra.mrb[12].mxu0 %vm418_vm0, %v4572_v2  ;;  %1163 = vperm.xlu0 %4041, %v412_v4  }
  0x76   : > { %3475 = vmatmul.mubr.msk.f32.gmra.mrb[12].mxu1 %vm418_vm0, %v4572_v2  ;;  %573 = vmatprep.mubr.f32.mxu0 %v8340_v0 }
  0x77   : > { %734 = vmatprep.mubr.f32.mxu1 %v8340_v0 }
  0x78   : > { %1168 = vperm.xlu1 %4042, %v413_v6  }
  0x79   : > { %3460 = vmatmul.mubr.msk.f32.gmra.mrb[14].mxu0 %vm418_vm0, %v4589_v5  ;;  %1173 = vperm.xlu0 %4041, %v414_v7  }
  0x7a   : > { %3476 = vmatmul.mubr.msk.f32.gmra.mrb[14].mxu1 %vm418_vm0, %v4589_v5  ;;  %579 = vmatprep.mubr.f32.mxu0 %v8340_v0 }
  0x7b   : > { %740 = vmatprep.mubr.f32.mxu1 %v8340_v0 }
  0x7c   : > { %1178 = vperm.xlu1 %4042, %v415_v9  }
  0x7d   : > { %3461 = vmatmul.mubr.msk.f32.gmra.mrb[16].mxu0 %vm418_vm0, %v4606_v8  ;;  %1183 = vperm.xlu0 %4041, %v416_v10  }
  0x7e   : > { %3477 = vmatmul.mubr.msk.f32.gmra.mrb[16].mxu1 %vm418_vm0, %v4606_v8  ;;  %585 = vmatprep.mubr.f32.mxu0 %v8340_v0 }
  0x7f   : > { %746 = vmatprep.mubr.f32.mxu1 %v8340_v0 }
  0x80   : > { %1188 = vperm.xlu1 %4042, %v417_v12  }
  0x81   : > { %3462 = vmatmul.mubr.msk.f32.gmra.mrb[18].mxu0 %vm418_vm0, %v4623_v11 }
  0x82   : > { %3478 = vmatmul.mubr.msk.f32.gmra.mrb[18].mxu1 %vm418_vm0, %v4623_v11  ;;  %591 = vmatprep.mubr.f32.mxu0 %v8340_v0 }
  0x83   : > { %752 = vmatprep.mubr.f32.mxu1 %v8340_v0 }
  0x85   : > { %3463 = vmatmul.mubr.msk.f32.gmra.mrb[20].mxu0 %vm418_vm0, %v4637_v13 }
  0x86   : > { %3479 = vmatmul.mubr.msk.f32.gmra.mrb[20].mxu1 %vm418_vm0, %v4637_v13  ;;  %597 = vmatprep.mubr.f32.mxu0 %v8340_v0 }
  0x87   : > { %758 = vmatprep.mubr.f32.mxu1 %v8340_v0 }
  0x89   : > { %3464 = vmatmul.mubr.msk.f32.gmra.mrb[22].mxu0 %vm418_vm0, %v4648_v14 }
  0x8a   : > { %3480 = vmatmul.mubr.msk.f32.gmra.mrb[22].mxu1 %vm418_vm0, %v4648_v14  ;;  %603 = vmatprep.mubr.f32.mxu0 %v8340_v0 }
  0x8b   : > { %764 = vmatprep.mubr.f32.mxu1 %v8340_v0 }
  0x8d   : > { %3465 = vmatmul.mubr.msk.f32.gmra.mrb[24].mxu0 %vm418_vm0, %v4659_v15 }
  0x8e   : > { %3481 = vmatmul.mubr.msk.f32.gmra.mrb[24].mxu1 %vm418_vm0, %v4659_v15  ;;  %609 = vmatprep.mubr.f32.mxu0 %v8340_v0 }
  0x8f   : > { %770 = vmatprep.mubr.f32.mxu1 %v8340_v0 }
  0x91   : > { %3466 = vmatmul.mubr.msk.f32.gmra.mrb[26].mxu0 %vm418_vm0, %v4670_v16 }
  0x92   : > { %3482 = vmatmul.mubr.msk.f32.gmra.mrb[26].mxu1 %vm418_vm0, %v4670_v16  ;;  %615 = vmatprep.mubr.f32.mxu0 %v8340_v0 }
  0x93   : > { %776 = vmatprep.mubr.f32.mxu1 %v8340_v0 }
  0x95   : > { %3467 = vmatmul.mubr.msk.f32.gmra.mrb[28].mxu0 %vm418_vm0, %v4681_v17 }
  0x96   : > { %3483 = vmatmul.mubr.msk.f32.gmra.mrb[28].mxu1 %vm418_vm0, %v4681_v17  ;;  %621 = vmatprep.mubr.f32.mxu0 %v8340_v0 }
  0x97   : > { %782 = vmatprep.mubr.f32.mxu1 %v8340_v0 }
  0x99   : > { %3468 = vmatmul.mubr.msk.f32.gmra.mrb[30].mxu0 %vm418_vm0, %v4692_v18 }
  0x9a   : > { %3484 = vmatmul.mubr.msk.f32.gmra.mrb[30].mxu1 %vm418_vm0, %v4692_v18  ;;  %853 = vmatprep.mubr.f32.mxu0 %v8340_v0 }
  0x9b   : > { %1014 = vmatprep.mubr.f32.mxu1 %v8340_v0 }
  0x9d   : > { %3485 = vmatmul.mubr.msk.f32.vlgmr.msra.gmra.mrb[32].mxu0 %vm418_vm0, %v4470_v33 }
  0x9e   : > { %3501 = vmatmul.mubr.msk.f32.vlgmr.msra.gmra.mrb[32].mxu1 %vm418_vm0, %v4470_v33  ;;  %859 = vmatprep.mubr.f32.mxu0 %v8340_v0 }
  0x9f   : > { %1020 = vmatprep.mubr.f32.mxu1 %v8340_v0 }
  0xa1   : > { %3486 = vmatmul.mubr.msk.f32.gmra.mrb[34].mxu0 %vm418_vm0, %v4484_v42 }
  0xa2   : > { %3502 = vmatmul.mubr.msk.f32.gmra.mrb[34].mxu1 %vm418_vm0, %v4484_v42  ;;  %865 = vmatprep.mubr.f32.mxu0 %v8340_v0 }
  0xa3   : > { %1026 = vmatprep.mubr.f32.mxu1 %v8340_v0 }
  0xa5   : > { %3487 = vmatmul.mubr.msk.f32.gmra.mrb[36].mxu0 %vm418_vm0, %v4501_v52 }
  0xa6   : > { %3503 = vmatmul.mubr.msk.f32.gmra.mrb[36].mxu1 %vm418_vm0, %v4501_v52  ;;  %871 = vmatprep.mubr.f32.mxu0 %v8340_v0 }
  0xa7   : > { %1032 = vmatprep.mubr.f32.mxu1 %v8340_v0 }
  0xa9   : > { %3488 = vmatmul.mubr.msk.f32.gmra.mrb[38].mxu0 %vm418_vm0, %v4521_v56 }
  0xaa   : > { %3504 = vmatmul.mubr.msk.f32.gmra.mrb[38].mxu1 %vm418_vm0, %v4521_v56  ;;  %877 = vmatprep.mubr.f32.mxu0 %v8340_v0 }
  0xab   : > { %1038 = vmatprep.mubr.f32.mxu1 %v8340_v0 }
  0xad   : > { %3489 = vmatmul.mubr.msk.f32.gmra.mrb[40].mxu0 %vm418_vm0, %v4538_v59 }
  0xae   : > { %3505 = vmatmul.mubr.msk.f32.gmra.mrb[40].mxu1 %vm418_vm0, %v4538_v59  ;;  %883 = vmatprep.mubr.f32.mxu0 %v8340_v0 }
  0xaf   : > { %1044 = vmatprep.mubr.f32.mxu1 %v8340_v0 }
  0xb1   : > { %3490 = vmatmul.mubr.msk.f32.gmra.mrb[42].mxu0 %vm418_vm0, %v4555_v62 }
  0xb2   : > { %3506 = vmatmul.mubr.msk.f32.gmra.mrb[42].mxu1 %vm418_vm0, %v4555_v62  ;;  %889 = vmatprep.mubr.f32.mxu0 %v8340_v0 }
  0xb3   : > { %1050 = vmatprep.mubr.f32.mxu1 %v8340_v0 }
  0xb5   : > { %3491 = vmatmul.mubr.msk.f32.gmra.mrb[44].mxu0 %vm418_vm0, %v4572_v2 }
  0xb6   : > { %3507 = vmatmul.mubr.msk.f32.gmra.mrb[44].mxu1 %vm418_vm0, %v4572_v2  ;;  %895 = vmatprep.mubr.f32.mxu0 %v8340_v0 }
  0xb7   : > { %1056 = vmatprep.mubr.f32.mxu1 %v8340_v0 }
  0xb9   : > { %3492 = vmatmul.mubr.msk.f32.gmra.mrb[46].mxu0 %vm418_vm0, %v4589_v5 }
  0xba   : > { %3508 = vmatmul.mubr.msk.f32.gmra.mrb[46].mxu1 %vm418_vm0, %v4589_v5  ;;  %901 = vmatprep.mubr.f32.mxu0 %v8340_v0 }
  0xbb   : > { %1062 = vmatprep.mubr.f32.mxu1 %v8340_v0 }
  0xbd   : > { %3493 = vmatmul.mubr.msk.f32.gmra.mrb[48].mxu0 %vm418_vm0, %v4606_v8 }
  0xbe   : > { %3509 = vmatmul.mubr.msk.f32.gmra.mrb[48].mxu1 %vm418_vm0, %v4606_v8  ;;  %907 = vmatprep.mubr.f32.mxu0 %v8340_v0 }
  0xbf   : > { %1068 = vmatprep.mubr.f32.mxu1 %v8340_v0 }
  0xc1   : > { %3494 = vmatmul.mubr.msk.f32.gmra.mrb[50].mxu0 %vm418_vm0, %v4623_v11 }
  0xc2   : > { %3510 = vmatmul.mubr.msk.f32.gmra.mrb[50].mxu1 %vm418_vm0, %v4623_v11  ;;  %913 = vmatprep.mubr.f32.mxu0 %v8340_v0 }
  0xc3   : > { %1074 = vmatprep.mubr.f32.mxu1 %v8340_v0 }
  0xc5   : > { %3495 = vmatmul.mubr.msk.f32.gmra.mrb[52].mxu0 %vm418_vm0, %v4637_v13 }
  0xc6   : > { %3511 = vmatmul.mubr.msk.f32.gmra.mrb[52].mxu1 %vm418_vm0, %v4637_v13  ;;  %919 = vmatprep.mubr.f32.mxu0 %v8340_v0 }
  0xc7   : > { %1080 = vmatprep.mubr.f32.mxu1 %v8340_v0 }
  0xc9   : > { %3496 = vmatmul.mubr.msk.f32.gmra.mrb[54].mxu0 %vm418_vm0, %v4648_v14 }
  0xca   : > { %3512 = vmatmul.mubr.msk.f32.gmra.mrb[54].mxu1 %vm418_vm0, %v4648_v14  ;;  %925 = vmatprep.mubr.f32.mxu0 %v8340_v0 }
  0xcb   : > { %1086 = vmatprep.mubr.f32.mxu1 %v8340_v0 }
  0xcd   : > { %3497 = vmatmul.mubr.msk.f32.gmra.mrb[56].mxu0 %vm418_vm0, %v4659_v15 }
  0xce   : > { %3513 = vmatmul.mubr.msk.f32.gmra.mrb[56].mxu1 %vm418_vm0, %v4659_v15  ;;  %931 = vmatprep.mubr.f32.mxu0 %v8340_v0 }
  0xcf   : > { %1092 = vmatprep.mubr.f32.mxu1 %v8340_v0 }
  0xd1   : > { %3498 = vmatmul.mubr.msk.f32.gmra.mrb[58].mxu0 %vm418_vm0, %v4670_v16 }
  0xd2   : > { %3514 = vmatmul.mubr.msk.f32.gmra.mrb[58].mxu1 %vm418_vm0, %v4670_v16  ;;  %937 = vmatprep.mubr.f32.mxu0 %v8340_v0 }
  0xd3   : > { %1098 = vmatprep.mubr.f32.mxu1 %v8340_v0 }
  0xd5   : > { %3499 = vmatmul.mubr.msk.f32.gmra.mrb[60].mxu0 %vm418_vm0, %v4681_v17 }
  0xd6   : > { %3515 = vmatmul.mubr.msk.f32.gmra.mrb[60].mxu1 %vm418_vm0, %v4681_v17  ;;  %943 = vmatprep.mubr.f32.mxu0 %v8340_v0 }
  0xd7   : > { %1104 = vmatprep.mubr.f32.mxu1 %v8340_v0 }
  0xd9   : > { %3500 = vmatmul.mubr.msk.f32.gmra.mrb[62].mxu0 %vm418_vm0, %v4692_v18 }
  0xda   : > { %3516 = vmatmul.mubr.msk.f32.gmra.mrb[62].mxu1 %vm418_vm0, %v4692_v18  ;;  %2520 = vmatprep.mubr.f32.mxu0 %v8340_v0 }
  0xdb   : > { %2609 = vmatprep.mubr.f32.mxu1 %v8340_v0 }
  0xdc   : > { %v4797_v19 = vpop.permute.xlu0 %1113 }
  0xe3   : > { %v4804_v27 = vpop.permute.xlu1 %1123 }
  0xe4   : > { %v4799_v24 = vpop.permute.xlu0 %1118 }
  0xe7   : > { %v4844_v49 = vpop.permute.xlu1 %1128 }
  0xe8   : > { %8590 = vst [vmem:[#allocation19_spill] sm:$0xff] %v4844_v49  ;;  %v4856_v59 = vpop.permute.xlu0 %1133 }
  0xe9   : > { %8592 = vst [vmem:[#allocation21_spill] sm:$0xff] %v4856_v59 }
  0xeb   : > { %v4874_v9 = vpop.permute.xlu1 %1138 }
  0xec   : > { %8595 = vst [vmem:[#allocation24_spill] sm:$0xff] %v4874_v9 }
 0x130   : > { %v533_v20 = vpop.f32.mrb[0].mxu0 }
 0x131   : > { %v535_v21 = vpop.f32.mrb[1].mxu0  ;;  %v694_v22 = vpop.f32.mrb[0].mxu1  ;;  %v4807_v28 = vsub.f32 %v4797_v19, %v533_v20 }
 0x132   : > { %v696_v23 = vpop.f32.mrb[1].mxu1  ;;  %v4802_v25 = vsub.f32 %v4797_v19, %v694_v22  ;;  %v4816_v33 = vsub.f32 %v4797_v19, %v535_v21 }
 0x133   : > { %v4810_v29 = vsub.f32 %v4797_v19, %v696_v23  ;;  %v4892_v23 = vpop.permute.xlu0 %1143 }
 0x134   : > { %v539_v26 = vpop.f32.mrb[2].mxu0  ;;  %8586 = vst [vmem:[#allocation15_spill] sm:$0xff] %v4816_v33  ;;  %8599 = vst [vmem:[#allocation28_spill] sm:$0xff] %v4892_v23 }
 0x135   : > { %8585 = vst [vmem:[#allocation14_spill] sm:$0xff] %v4810_v29  ;;  %v4813_v30 = vsub.f32 %v4799_v24, %v539_v26  ;;  %v700_v31 = vpop.f32.mrb[2].mxu1  ;;  %v541_v32 = vpop.f32.mrb[3].mxu0 }
 0x136   : > { %v4819_v34 = vsub.f32 %v4799_v24, %v700_v31  ;;  %v4822_v35 = vsub.f32 %v4799_v24, %v541_v32  ;;  %v702_v36 = vpop.f32.mrb[3].mxu1 }
 0x137   : > { %v1319_v37 = vmin.f32 %v4807_v28, %v4813_v30  ;;  %v4827_v38 = vsub.f32 %v4799_v24, %v702_v36 }
 0x138   : > { %8587 = vst [vmem:[#allocation16_spill] sm:$0xff] %v4822_v35  ;;  %v1361_v39 = vmin.f32 %v4802_v25, %v4819_v34  ;;  %v1340_v40 = vmin.f32 %v4816_v33, %v4822_v35  ;;  %v545_v41 = vpop.f32.mrb[4].mxu0 }
 0x139   : > { %8588 = vst [vmem:[#allocation17_spill] sm:$0xff] %v4827_v38  ;;  %v1382_v42 = vmin.f32 %v4810_v29, %v4827_v38  ;;  %v4836_v43 = vsub.f32 %v4804_v27, %v545_v41  ;;  %v706_v44 = vpop.f32.mrb[4].mxu1  ;;  %v547_v45 = vpop.f32.mrb[5].mxu0 }
 0x13a   : > { %v4839_v46 = vsub.f32 %v4804_v27, %v706_v44  ;;  %v4842_v47 = vsub.f32 %v4804_v27, %v547_v45  ;;  %v708_v48 = vpop.f32.mrb[5].mxu1 }
 0x13b   : > { %v1320_v50 = vmin.f32 %v1319_v37, %v4836_v43  ;;  %v4848_v51 = vsub.f32 %v4804_v27, %v708_v48 }
 0x13c   : > { %8589 = vst [vmem:[#allocation18_spill] sm:$0xff] %v4842_v47  ;;  %v1362_v52 = vmin.f32 %v1361_v39, %v4839_v46  ;;  %v1341_v53 = vmin.f32 %v1340_v40, %v4842_v47  ;;  %v551_v54 = vpop.f32.mrb[6].mxu0 }
 0x13d   : > { %8591 = vst [vmem:[#allocation20_spill] sm:$0xff] %v4848_v51  ;;  %v1383_v55 = vmin.f32 %v1382_v42, %v4848_v51  ;;  %v4854_v56 = vsub.f32 %v4844_v49, %v551_v54  ;;  %v712_v57 = vpop.f32.mrb[6].mxu1  ;;  %v553_v58 = vpop.f32.mrb[7].mxu0 }
 0x13e   : > { %v4859_v60 = vsub.f32 %v4844_v49, %v712_v57  ;;  %v4862_v61 = vsub.f32 %v4844_v49, %v553_v58  ;;  %v714_v62 = vpop.f32.mrb[7].mxu1 }
 0x13f   : > { %v1321_v63 = vmin.f32 %v1320_v50, %v4854_v56  ;;  %v4866_v1 = vsub.f32 %v4844_v49, %v714_v62  ;;  %v4910_v50 = vpop.permute.xlu1 %1148 }
 0x140   : > { %8593 = vst [vmem:[#allocation22_spill] sm:$0xff] %v4862_v61  ;;  %v1363_v2 = vmin.f32 %v1362_v52, %v4859_v60  ;;  %v1342_v3 = vmin.f32 %v1341_v53, %v4862_v61  ;;  %v557_v4 = vpop.f32.mrb[8].mxu0  ;;  %8603 = vst [vmem:[#allocation32_spill] sm:$0xff] %v4910_v50 }
 0x141   : > { %8594 = vst [vmem:[#allocation23_spill] sm:$0xff] %v4866_v1  ;;  %v1384_v5 = vmin.f32 %v1383_v55, %v4866_v1  ;;  %v4872_v6 = vsub.f32 %v4856_v59, %v557_v4  ;;  %v718_v7 = vpop.f32.mrb[8].mxu1  ;;  %v559_v8 = vpop.f32.mrb[9].mxu0 }
 0x142   : > { %v4877_v10 = vsub.f32 %v4856_v59, %v718_v7  ;;  %v4880_v11 = vsub.f32 %v4856_v59, %v559_v8  ;;  %v720_v12 = vpop.f32.mrb[9].mxu1  ;;  %v4928_v7 = vpop.permute.xlu0 %1153 }
 0x143   : > { %v1322_v13 = vmin.f32 %v1321_v63, %v4872_v6  ;;  %v4884_v14 = vsub.f32 %v4856_v59, %v720_v12  ;;  %8607 = vst [vmem:[#allocation36_spill] sm:$0xff] %v4928_v7 }
 0x144   : > { %8596 = vst [vmem:[#allocation25_spill] sm:$0xff] %v4877_v10  ;;  %8597 = vst [vmem:[#allocation26_spill] sm:$0xff] %v4880_v11  ;;  %v1364_v15 = vmin.f32 %v1363_v2, %v4877_v10  ;;  %v1343_v16 = vmin.f32 %v1342_v3, %v4880_v11  ;;  %v563_v17 = vpop.f32.mrb[10].mxu0 }
 0x145   : > { %8598 = vst [vmem:[#allocation27_spill] sm:$0xff] %v4884_v14  ;;  %v1385_v18 = vmin.f32 %v1384_v5, %v4884_v14  ;;  %v4890_v20 = vsub.f32 %v4874_v9, %v563_v17  ;;  %v724_v21 = vpop.f32.mrb[10].mxu1  ;;  %v565_v22 = vpop.f32.mrb[11].mxu0 }
 0x146   : > { %v4895_v26 = vsub.f32 %v4874_v9, %v724_v21  ;;  %v4898_v31 = vsub.f32 %v4874_v9, %v565_v22  ;;  %v726_v32 = vpop.f32.mrb[11].mxu1 }
 0x147   : > { %v1323_v36 = vmin.f32 %v1322_v13, %v4890_v20  ;;  %v4902_v37 = vsub.f32 %v4874_v9, %v726_v32 }
 0x148   : > { %8600 = vst [vmem:[#allocation29_spill] sm:$0xff] %v4895_v26  ;;  %8601 = vst [vmem:[#allocation30_spill] sm:$0xff] %v4898_v31  ;;  %v1365_v39 = vmin.f32 %v1364_v15, %v4895_v26  ;;  %v1344_v40 = vmin.f32 %v1343_v16, %v4898_v31  ;;  %v569_v41 = vpop.f32.mrb[12].mxu0 }
 0x149   : > { %8602 = vst [vmem:[#allocation31_spill] sm:$0xff] %v4902_v37  ;;  %v1386_v42 = vmin.f32 %v1385_v18, %v4902_v37  ;;  %v4908_v44 = vsub.f32 %v4892_v23, %v569_v41  ;;  %v730_v45 = vpop.f32.mrb[12].mxu1  ;;  %v571_v48 = vpop.f32.mrb[13].mxu0 }
 0x14a   : > { %v4913_v52 = vsub.f32 %v4892_v23, %v730_v45  ;;  %v4916_v53 = vsub.f32 %v4892_v23, %v571_v48  ;;  %v732_v54 = vpop.f32.mrb[13].mxu1 }
 0x14b   : > { %v1324_v55 = vmin.f32 %v1323_v36, %v4908_v44  ;;  %v4920_v57 = vsub.f32 %v4892_v23, %v732_v54 }
 0x14c   : > { %8604 = vst [vmem:[#allocation33_spill] sm:$0xff] %v4913_v52  ;;  %8605 = vst [vmem:[#allocation34_spill] sm:$0xff] %v4916_v53  ;;  %v1366_v58 = vmin.f32 %v1365_v39, %v4913_v52  ;;  %v1345_v62 = vmin.f32 %v1344_v40, %v4916_v53  ;;  %v575_v63 = vpop.f32.mrb[14].mxu0  ;;  %v4946_v40 = vpop.permute.xlu1 %1158 }
 0x14d   : > { %8606 = vst [vmem:[#allocation35_spill] sm:$0xff] %v4920_v57  ;;  %v1387_v2 = vmin.f32 %v1386_v42, %v4920_v57  ;;  %v4926_v3 = vsub.f32 %v4910_v50, %v575_v63  ;;  %v736_v4 = vpop.f32.mrb[14].mxu1  ;;  %v577_v5 = vpop.f32.mrb[15].mxu0  ;;  %8611 = vst [vmem:[#allocation40_spill] sm:$0xff] %v4946_v40 }
 0x14e   : > { %v4931_v8 = vsub.f32 %v4910_v50, %v736_v4  ;;  %v4934_v12 = vsub.f32 %v4910_v50, %v577_v5  ;;  %v738_v13 = vpop.f32.mrb[15].mxu1 }
 0x14f   : > { %v1325_v15 = vmin.f32 %v1324_v55, %v4926_v3  ;;  %v4938_v16 = vsub.f32 %v4910_v50, %v738_v13  ;;  %v4964_v13 = vpop.permute.xlu0 %1163 }
 0x150   : > { %8608 = vst [vmem:[#allocation37_spill] sm:$0xff] %v4931_v8  ;;  %8609 = vst [vmem:[#allocation38_spill] sm:$0xff] %v4934_v12  ;;  %v1367_v17 = vmin.f32 %v1366_v58, %v4931_v8  ;;  %v1346_v18 = vmin.f32 %v1345_v62, %v4934_v12  ;;  %v581_v21 = vpop.f32.mrb[16].mxu0 }
 0x151   : > { %8610 = vst [vmem:[#allocation39_spill] sm:$0xff] %v4938_v16  ;;  %v1388_v22 = vmin.f32 %v1387_v2, %v4938_v16  ;;  %v4944_v32 = vsub.f32 %v4928_v7, %v581_v21  ;;  %v742_v36 = vpop.f32.mrb[16].mxu1  ;;  %v583_v39 = vpop.f32.mrb[17].mxu0  ;;  %8615 = vst [vmem:[#allocation44_spill] sm:$0xff] %v4964_v13 }
 0x152   : > { %v4949_v41 = vsub.f32 %v4928_v7, %v742_v36  ;;  %v4952_v42 = vsub.f32 %v4928_v7, %v583_v39  ;;  %v744_v45 = vpop.f32.mrb[17].mxu1 }
 0x153   : > { %v1326_v48 = vmin.f32 %v1325_v15, %v4944_v32  ;;  %v4956_v54 = vsub.f32 %v4928_v7, %v744_v45 }
 0x154   : > { %8612 = vst [vmem:[#allocation41_spill] sm:$0xff] %v4949_v41  ;;  %8613 = vst [vmem:[#allocation42_spill] sm:$0xff] %v4952_v42  ;;  %v1368_v55 = vmin.f32 %v1367_v17, %v4949_v41  ;;  %v1347_v58 = vmin.f32 %v1346_v18, %v4952_v42  ;;  %v587_v62 = vpop.f32.mrb[18].mxu0 }
 0x155   : > { %8614 = vst [vmem:[#allocation43_spill] sm:$0xff] %v4956_v54  ;;  %v1389_v63 = vmin.f32 %v1388_v22, %v4956_v54  ;;  %v4962_v2 = vsub.f32 %v4946_v40, %v587_v62  ;;  %v748_v4 = vpop.f32.mrb[18].mxu1  ;;  %v589_v5 = vpop.f32.mrb[19].mxu0 }
 0x156   : > { %v4967_v21 = vsub.f32 %v4946_v40, %v748_v4  ;;  %v4970_v15 = vsub.f32 %v4946_v40, %v589_v5  ;;  %v750_v36 = vpop.f32.mrb[19].mxu1  ;;  %v4982_v5 = vpop.permute.xlu1 %1168 }
 0x157   : > { %v1327_v17 = vmin.f32 %v1326_v48, %v4962_v2  ;;  %v4974_v18 = vsub.f32 %v4946_v40, %v750_v36  ;;  %8619 = vst [vmem:[#allocation48_spill] sm:$0xff] %v4982_v5 }
 0x158   : > { %8616 = vst [vmem:[#allocation45_spill] sm:$0xff] %v4967_v21  ;;  %8617 = vst [vmem:[#allocation46_spill] sm:$0xff] %v4970_v15  ;;  %v1369_v22 = vmin.f32 %v1368_v55, %v4967_v21  ;;  %v1348_v39 = vmin.f32 %v1347_v58, %v4970_v15  ;;  %v593_v45 = vpop.f32.mrb[20].mxu0 }
 0x159   : > { %8618 = vst [vmem:[#allocation47_spill] sm:$0xff] %v4974_v18  ;;  %v1390_v62 = vmin.f32 %v1389_v63, %v4974_v18  ;;  %v4980_v0 = vsub.f32 %v4964_v13, %v593_v45  ;;  %v754_v4 = vpop.f32.mrb[20].mxu1  ;;  %v595_v7 = vpop.f32.mrb[21].mxu0 }
 0x15a   : > { %v4985_v50 = vsub.f32 %v4964_v13, %v754_v4  ;;  %v4988_v48 = vsub.f32 %v4964_v13, %v595_v7  ;;  %v756_v36 = vpop.f32.mrb[21].mxu1  ;;  %v5000_v7 = vpop.permute.xlu0 %1173 }
 0x15b   : > { %v1328_v55 = vmin.f32 %v1327_v17, %v4980_v0  ;;  %v4992_v58 = vsub.f32 %v4964_v13, %v756_v36  ;;  %8623 = vst [vmem:[#allocation52_spill] sm:$0xff] %v5000_v7 }
 0x15c   : > { %8620 = vst [vmem:[#allocation49_spill] sm:$0xff] %v4985_v50  ;;  %8621 = vst [vmem:[#allocation50_spill] sm:$0xff] %v4988_v48  ;;  %v1370_v63 = vmin.f32 %v1369_v22, %v4985_v50  ;;  %v1349_v45 = vmin.f32 %v1348_v39, %v4988_v48  ;;  %v599_v40 = vpop.f32.mrb[22].mxu0 }
 0x15d   : > { %8622 = vst [vmem:[#allocation51_spill] sm:$0xff] %v4992_v58  ;;  %v1391_v23 = vmin.f32 %v1390_v62, %v4992_v58  ;;  %v4998_v9 = vsub.f32 %v4982_v5, %v599_v40  ;;  %v760_v4 = vpop.f32.mrb[22].mxu1  ;;  %v601_v59 = vpop.f32.mrb[23].mxu0 }
 0x15e   : > { %v5003_v49 = vsub.f32 %v4982_v5, %v760_v4  ;;  %v5006_v17 = vsub.f32 %v4982_v5, %v601_v59  ;;  %v762_v36 = vpop.f32.mrb[23].mxu1  ;;  %v5018_v59 = vpop.permute.xlu1 %1178 }
 0x15f   : > { %v1329_v22 = vmin.f32 %v1328_v55, %v4998_v9  ;;  %v5010_v39 = vsub.f32 %v4982_v5, %v762_v36  ;;  %8627 = vst [vmem:[#allocation56_spill] sm:$0xff] %v5018_v59  ;;  %v5036_v14 = vpop.permute.xlu0 %1183 }
 0x160   : > { %8624 = vst [vmem:[#allocation53_spill] sm:$0xff] %v5003_v49  ;;  %8625 = vst [vmem:[#allocation54_spill] sm:$0xff] %v5006_v17  ;;  %v1371_v62 = vmin.f32 %v1370_v63, %v5003_v49  ;;  %v1350_v40 = vmin.f32 %v1349_v45, %v5006_v17  ;;  %v605_v13 = vpop.f32.mrb[24].mxu0  ;;  %v1487_v63 = vlaneseq }
 0x161   : > { %8626 = vst [vmem:[#allocation55_spill] sm:$0xff] %v5010_v39  ;;  %v1392_v58 = vmin.f32 %v1391_v23, %v5010_v39  ;;  %v5016_v18 = vsub.f32 %v5000_v7, %v605_v13  ;;  %v766_v4 = vpop.f32.mrb[24].mxu1  ;;  %v607_v54 = vpop.f32.mrb[25].mxu0  ;;  %8631 = vst [vmem:[#allocation60_spill] sm:$0xff] %v5036_v14 }
 0x162   : > { %v5021_v16 = vsub.f32 %v5000_v7, %v766_v4  ;;  %v5024_v55 = vsub.f32 %v5000_v7, %v607_v54  ;;  %v768_v36 = vpop.f32.mrb[25].mxu1  ;;  %v5056_v29 = vpop.permute.xlu1 %1188 }
 0x163   : > { %v1330_v45 = vmin.f32 %v1329_v22, %v5016_v18  ;;  %v5028_v5 = vsub.f32 %v5000_v7, %v768_v36  ;;  %8635 = vst [vmem:[#allocation64_spill] sm:$0xff] %v5056_v29 }
 0x164   : > { %8628 = vst [vmem:[#allocation57_spill] sm:$0xff] %v5021_v16  ;;  %8629 = vst [vmem:[#allocation58_spill] sm:$0xff] %v5024_v55  ;;  %v1372_v23 = vmin.f32 %v1371_v62, %v5021_v16  ;;  %v1351_v13 = vmin.f32 %v1350_v40, %v5024_v55  ;;  %v611_v39 = vpop.f32.mrb[26].mxu0  ;;  %v5044_v62 = vshrl.u32 %v1487_v63, 7 }
 0x165   : > { %8630 = vst [vmem:[#allocation59_spill] sm:$0xff] %v5028_v5  ;;  %v1393_v57 = vmin.f32 %v1392_v58, %v5028_v5  ;;  %v5034_v4 = vsub.f32 %v5018_v59, %v611_v39  ;;  %v772_v37 = vpop.f32.mrb[26].mxu1  ;;  %v613_v54 = vpop.f32.mrb[27].mxu0 }
 0x166   : > { %v5039_v1 = vsub.f32 %v5018_v59, %v772_v37  ;;  %v5042_v22 = vsub.f32 %v5018_v59, %v613_v54  ;;  %v774_v36 = vpop.f32.mrb[27].mxu1  ;;  %v5080_v17 = vadd.s32 32, %v5044_v62  ;;  %v5093_v48 = vadd.s32 56, %v5044_v62 }
 0x167   : > { %v1331_v40 = vmin.f32 %v1330_v45, %v5034_v4  ;;  %v5048_v58 = vsub.f32 %v5018_v59, %v774_v36  ;;  %v5106_v12 = vadd.s32 72, %v5044_v62  ;;  %v5109_v53 = vadd.s32 80, %v5044_v62 }
 0x168   : > { %8632 = vst [vmem:[#allocation61_spill] sm:$0xff] %v5039_v1  ;;  %8633 = vst [vmem:[#allocation62_spill] sm:$0xff] %v5042_v22  ;;  %v1373_v39 = vmin.f32 %v1372_v23, %v5039_v1  ;;  %v1352_v7 = vmin.f32 %v1351_v13, %v5042_v22  ;;  %v617_v5 = vpop.f32.mrb[28].mxu0  ;;  %v5065_v23 = vadd.s32 8, %v5044_v62  ;;  %v4243_v13 = vmov 1966171168  }
 0x169   : > { %8634 = vst [vmem:[#allocation63_spill] sm:$0xff] %v5048_v58  ;;  %v1394_v51 = vmin.f32 %v1393_v57, %v5048_v58  ;;  %v5054_v37 = vsub.f32 %v5036_v14, %v617_v5  ;;  %v778_v54 = vpop.f32.mrb[28].mxu1  ;;  %v619_v38 = vpop.f32.mrb[29].mxu0  ;;  %v2849_v59 = vunpack.c.l.s4 %v4243_v13  ;;  %v5072_v58 = vadd.s32 16, %v5044_v62 }
 0x16a   : > { %v5059_v63 = vsub.f32 %v5036_v14, %v778_v54  ;;  %v5062_v45 = vsub.f32 %v5036_v14, %v619_v38  ;;  %v780_v36 = vpop.f32.mrb[29].mxu1  ;;  %v5075_v54 = vadd.s32 24, %v5044_v62  ;;  %v5083_v13 = vadd.s32 40, %v5044_v62 }
 0x16b   : > { %v1332_v57 = vmin.f32 %v1331_v40, %v5054_v37  ;;  %v5069_v5 = vsub.f32 %v5036_v14, %v780_v36  ;;  %v5090_v14 = vadd.s32 48, %v5044_v62  ;;  %v5115_v11 = vadd.s32 88, %v5044_v62 }
 0x16c   : > { %8636 = vst [vmem:[#allocation65_spill] sm:$0xff] %v5059_v63  ;;  %8637 = vst [vmem:[#allocation66_spill] sm:$0xff] %v5062_v45  ;;  %v1374_v38 = vmin.f32 %v1373_v39, %v5059_v63  ;;  %v1353_v22 = vmin.f32 %v1352_v7, %v5062_v45  ;;  %v623_v55 = vpop.f32.mrb[30].mxu0  ;;  %v5096_v45 = vadd.s32 64, %v5044_v62  ;;  %v5123_v47 = vadd.s32 104, %v5044_v62 }
 0x16d   : > { %8638 = vst [vmem:[#allocation67_spill] sm:$0xff] %v5069_v5  ;;  %v1395_v40 = vmin.f32 %v1394_v51, %v5069_v5  ;;  %v5087_v36 = vsub.f32 %v5056_v29, %v623_v55  ;;  %v784_v39 = vpop.f32.mrb[30].mxu1  ;;  %v625_v7 = vpop.f32.mrb[31].mxu0  ;;  %v2850_v51 = vunpack.c.0.s8 %v2849_v59  ;;  %8642 = vst [vmem:[#allocation71_spill] sm:$0xff] %v5115_v11  ;;  %v5126_v35 = vadd.s32 112, %v5044_v62 }
 0x16e   : > { %v5099_v15 = vsub.f32 %v5056_v29, %v784_v39  ;;  %v5102_v42 = vsub.f32 %v5056_v29, %v625_v7  ;;  %v786_v55 = vpop.f32.mrb[31].mxu1  ;;  %v5118_v39 = vadd.s32 96, %v5044_v62  ;;  %8644 = vst [vmem:[#allocation73_spill] sm:$0xff] %v5123_v47  ;;  %v5130_v63 = vadd.s32 120, %v5044_v62 }
 0x16f   : > { %v1333_v5 = vmin.f32 %v1332_v57, %v5087_v36  ;;  %v5112_v31 = vsub.f32 %v5056_v29, %v786_v55  ;;  %8645 = vst [vmem:[#allocation74_spill] sm:$0xff] %v5126_v35 }
 0x170   : > { %8639 = vst [vmem:[#allocation68_spill] sm:$0xff] %v5099_v15  ;;  %8640 = vst [vmem:[#allocation69_spill] sm:$0xff] %v5102_v42  ;;  %v1375_v59 = vmin.f32 %v1374_v38, %v5099_v15  ;;  %v1354_v7 = vmin.f32 %v1353_v22, %v5102_v42  ;;  %v855_v57 = vpop.f32.mrb[32].mxu0  ;;  %v5133_v38 = vsub.s32 %v2850_v51, %v5044_v62 }
 0x171   : > { %8641 = vst [vmem:[#allocation70_spill] sm:$0xff] %v5112_v31  ;;  %8643 = vst [vmem:[#allocation72_spill] sm:$0xff] %v5118_v39  ;;  %v1334_v61 = vrot.slane %v1333_v5, 4  ;;  %v1396_v55 = vmin.f32 %v1395_v40, %v5112_v31  ;;  %v1016_v29 = vpop.f32.mrb[32].mxu1  ;;  %v857_v33 = vpop.f32.mrb[33].mxu0  ;;  %v5136_v49 = vsub.f32 %v4797_v19, %v855_v57 }
 0x172   : > { %8646 = vst [vmem:[#allocation75_spill] sm:$0xff] %v5130_v63  ;;  %v1376_v1 = vrot.slane %v1375_v59, 4  ;;  %v1355_v16 = vrot.slane %v1354_v7, 4  ;;  %8647 = vst [vmem:[#allocation76_spill] sm:$0xff] %v5133_v38  ;;  %v1018_v22 = vpop.f32.mrb[33].mxu1  ;;  %v5139_v40 = vsub.f32 %v4797_v19, %v1016_v29  ;;  %v5142_v31 = vsub.f32 %v4797_v19, %v857_v33 }
 0x173   : > { %v1335_v42 = vmin.f32 %v1333_v5, %v1334_v61  ;;  %v1397_v15 = vrot.slane %v1396_v55, 4  ;;  %8648 = vst [vmem:[#allocation77_spill] sm:$0xff] %v5136_v49  ;;  %v5145_v51 = vsub.f32 %v4797_v19, %v1018_v22 }
 0x174   : > { %v1377_v50 = vmin.f32 %v1375_v59, %v1376_v1  ;;  %v1356_v21 = vmin.f32 %v1354_v7, %v1355_v16  ;;  %8649 = vst [vmem:[#allocation78_spill] sm:$0xff] %v5139_v40  ;;  %8650 = vst [vmem:[#allocation79_spill] sm:$0xff] %v5142_v31  ;;  %v861_v41 = vpop.f32.mrb[34].mxu0 }
 0x175   : > { %v1336_v8 = vrot.slane %v1335_v42, 2  ;;  %v1398_v52 = vmin.f32 %v1396_v55, %v1397_v15  ;;  %8651 = vst [vmem:[#allocation80_spill] sm:$0xff] %v5145_v51  ;;  %v5148_v61 = vsub.f32 %v4799_v24, %v861_v41  ;;  %v1022_v5 = vpop.f32.mrb[34].mxu1  ;;  %v863_v57 = vpop.f32.mrb[35].mxu0 }
 0x176   : > { %v1378_v38 = vrot.slane %v1377_v50, 2  ;;  %v1357_v1 = vrot.slane %v1356_v21, 2  ;;  %v5151_v16 = vsub.f32 %v4799_v24, %v1022_v5  ;;  %v5154_v29 = vsub.f32 %v4799_v24, %v863_v57  ;;  %v1024_v33 = vpop.f32.mrb[35].mxu1 }
 0x177   : > { %8652 = vst [vmem:[#allocation81_spill] sm:$0xff] %v5148_v61  ;;  %v1337_v59 = vmin.f32 %v1335_v42, %v1336_v8  ;;  %v1399_v7 = vrot.slane %v1398_v52, 2  ;;  %v1403_v19 = vmin.f32 %v5136_v49, %v5148_v61  ;;  %v5159_v15 = vsub.f32 %v4799_v24, %v1024_v33  ;;  %v8678_v61 = vld [vmem:[#allocation45_spill] sm:$0xff] }
 0x178   : > { %8653 = vst [vmem:[#allocation82_spill] sm:$0xff] %v5151_v16  ;;  %8654 = vst [vmem:[#allocation83_spill] sm:$0xff] %v5154_v29  ;;  %v1379_v41 = vmin.f32 %v1377_v50, %v1378_v38  ;;  %v1358_v55 = vmin.f32 %v1356_v21, %v1357_v1  ;;  %v1445_v22 = vmin.f32 %v5139_v40, %v5151_v16  ;;  %v867_v26 = vpop.f32.mrb[36].mxu0  ;;  %v8679_v49 = vld [vmem:[#allocation49_spill] sm:$0xff] }
 0x179   : > { %8655 = vst [vmem:[#allocation84_spill] sm:$0xff] %v5159_v15  ;;  %v1424_v5 = vmin.f32 %v5142_v31, %v5154_v29  ;;  %v1338_v57 = vrot.slane %v1337_v59, 1  ;;  %v5165_v10 = vmin.f32 %v1398_v52, %v1399_v7  ;;  %v5170_v42 = vsub.f32 %v4804_v27, %v867_v26  ;;  %v1028_v24 = vpop.f32.mrb[36].mxu1  ;;  %v869_v33 = vpop.f32.mrb[37].mxu0 }
 0x17a   : > { %v1380_v50 = vrot.slane %v1379_v41, 1  ;;  %v1359_v21 = vrot.slane %v1358_v55, 1  ;;  %v5173_v38 = vsub.f32 %v4804_v27, %v1028_v24  ;;  %v5176_v1 = vsub.f32 %v4804_v27, %v869_v33  ;;  %v1030_v29 = vpop.f32.mrb[37].mxu1 }
 0x17b   : > { %8656 = vst [vmem:[#allocation85_spill] sm:$0xff] %v5170_v42  ;;  %v1339_v31 = vmin.f32 %v1337_v59, %v1338_v57  ;;  %v5180_v7 = vmin.f32 %v1403_v19, %v5170_v42  ;;  %v5183_v26 = vsub.f32 %v4804_v27, %v1030_v29  ;;  %v8676_v42 = vld [vmem:[#allocation37_spill] sm:$0xff] }
 0x17c   : > { %8657 = vst [vmem:[#allocation86_spill] sm:$0xff] %v5173_v38  ;;  %8658 = vst [vmem:[#allocation87_spill] sm:$0xff] %v5176_v1  ;;  %v5185_v8 = vmin.f32 %v1379_v41, %v1380_v50  ;;  %v5187_v16 = vmin.f32 %v1358_v55, %v1359_v21  ;;  %v5190_v24 = vmin.f32 %v1445_v22, %v5173_v38  ;;  %v5195_v40 = vpop.f32.mrb[38].mxu0  ;;  %v8675_v38 = vld [vmem:[#allocation33_spill] sm:$0xff] }
 0x17d   : > { %8659 = vst [vmem:[#allocation88_spill] sm:$0xff] %v5180_v7  ;;  %8660 = vst [vmem:[#allocation89_spill] sm:$0xff] %v5183_v26  ;;  %v5193_v33 = vmin.f32 %v1424_v5, %v5176_v1  ;;  %vm1504_vm1 = vcmp.eq.f32.partialorder %v4807_v28, %v1339_v31  ;;  %vm1512_vm2 = vcmp.eq.f32.partialorder %v4813_v30, %v1339_v31  ;;  %v5201_v27 = vpop.f32.mrb[38].mxu1  ;;  %v5203_v29 = vpop.f32.mrb[39].mxu0 }
 0x17e   : > { %8661 = vst [vmem:[#allocation90_spill] sm:$0xff] %v5190_v24  ;;  %vm1520_vm3 = vcmp.eq.f32.partialorder %v4836_v43, %v1339_v31  ;;  %vm1528_vm4 = vcmp.eq.f32.partialorder %v4854_v56, %v1339_v31  ;;  %8663 = vst [vmem:[#allocation92_spill] sm:$0xff] %v5203_v29  ;;  %vm1536_vm5 = vcmp.eq.f32.partialorder %v4872_v6, %v1339_v31  ;;  %v5209_v59 = vpop.f32.mrb[39].mxu1  ;;  %v1632_v41 = vsel %vm1504_vm1, %v5044_v62, 128  ;;  %v8716_v29 = vld [vmem:[#allocation66_spill] sm:$0xff] }
 0x17f   : > { %8662 = vst [vmem:[#allocation91_spill] sm:$0xff] %v5193_v33  ;;  %vm1544_vm6 = vcmp.eq.f32.partialorder %v4890_v20, %v1339_v31  ;;  %vm1552_vm7 = vcmp.eq.f32.partialorder %v4908_v44, %v1339_v31  ;;  %vm1560_vm8 = vcmp.eq.f32.partialorder %v4926_v3, %v1339_v31  ;;  %8664 = vst [vmem:[#allocation93_spill] sm:$0xff] %v5209_v59  ;;  %v1640_v55 = vsel %vm1512_vm2, %v5065_v23, 128  ;;  %v8711_v33 = vld [vmem:[#allocation54_spill] sm:$0xff] }
 0x180   : > { %vm1568_vm9 = vcmp.eq.f32.partialorder %v4944_v32, %v1339_v31  ;;  %vm1576_vm10 = vcmp.eq.f32.partialorder %v4962_v2, %v1339_v31  ;;  %vm1584_vm11 = vcmp.eq.f32.partialorder %v4980_v0, %v1339_v31  ;;  %vm1592_vm12 = vcmp.eq.f32.partialorder %v4998_v9, %v1339_v31  ;;  %v5219_v19 = vpop.f32.mrb[40].mxu0 }
 0x181   : > { %vm1600_vm13 = vcmp.eq.f32.partialorder %v5016_v18, %v1339_v31  ;;  %vm1608_vm14 = vcmp.eq.f32.partialorder %v5034_v4, %v1339_v31  ;;  %vm1616_vm15 = vcmp.eq.f32.partialorder %v5054_v37, %v1339_v31  ;;  %vm1624_vm0 = vcmp.eq.f32.partialorder %v5087_v36, %v1339_v31  ;;  %8665 = vst [vmem:[#allocation94_spill] sm:$0xff] %v5219_v19  ;;  %v5233_v57 = vpop.f32.mrb[40].mxu1  ;;  %v5235_v50 = vpop.f32.mrb[41].mxu0  ;;  %v8672_v31 = vld [vmem:[#allocation25_spill] sm:$0xff] }
 0x182   : > { %v1648_v22 = vsel %vm1520_vm3, %v5072_v58, 128  ;;  %v1656_v5 = vsel %vm1528_vm4, %v5075_v54, 128  ;;  %8666 = vst [vmem:[#allocation95_spill] sm:$0xff] %v5233_v57  ;;  %8667 = vst [vmem:[#allocation96_spill] sm:$0xff] %v5235_v50  ;;  %v1664_v28 = vsel %vm1536_vm5, %v5080_v17, 128  ;;  %v1672_v30 = vsel %vm1544_vm6, %v5083_v13, 128 }
 0x183   : > { %v5246_v43 = vsel %vm1552_vm7, %v5090_v14, 128  ;;  %v5251_v56 = vsel %vm1560_vm8, %v5093_v48, 128  ;;  %v5253_v21 = vpop.f32.mrb[41].mxu1  ;;  %v5258_v6 = vsel %vm1568_vm9, %v5096_v45, 128  ;;  %v5263_v20 = vsel %vm1576_vm10, %v5106_v12, 128  ;;  %v8673_v36 = vld [vmem:[#allocation29_spill] sm:$0xff] }
 0x184   : > { %8668 = vst [vmem:[#allocation97_spill] sm:$0xff] %v5253_v21  ;;  %v5268_v44 = vsel %vm1584_vm11, %v5109_v53, 128  ;;  %v5273_v3 = vsel %vm1592_vm12, %v5115_v11, 128  ;;  %v5278_v32 = vsel %vm1600_vm13, %v5118_v39, 128  ;;  %v5283_v2 = vsel %vm1608_vm14, %v5123_v47, 128  ;;  %v5295_v52 = vpop.f32.mrb[42].mxu0 }
 0x185   : > { %v5288_v0 = vsel %vm1616_vm15, %v5126_v35, 128  ;;  %v5293_v9 = vsel %vm1624_vm0, %v5130_v63, 128  ;;  %8669 = vst [vmem:[#allocation98_spill] sm:$0xff] %v5295_v52  ;;  %vm1760_vm1 = vcmp.lt.s32.totalorder %v1632_v41, %v1640_v55  ;;  %vm1506_vm2 = vcmp.eq.f32.partialorder %v4802_v25, %v5185_v8  ;;  %v5303_v18 = vpop.f32.mrb[42].mxu1  ;;  %v5305_v4 = vpop.f32.mrb[43].mxu0  ;;  %v8683_v52 = vld [vmem:[#allocation61_spill] sm:$0xff] }
 0x186   : > { %vm1514_vm3 = vcmp.eq.f32.partialorder %v4819_v34, %v5185_v8  ;;  %vm1522_vm4 = vcmp.eq.f32.partialorder %v4839_v46, %v5185_v8  ;;  %8670 = vst [vmem:[#allocation99_spill] sm:$0xff] %v5303_v18  ;;  %8671 = vst [vmem:[#allocation100_spill] sm:$0xff] %v5305_v4  ;;  %v1761_v37 = vsel %vm1760_vm1, %v1632_v41, %v1640_v55  ;;  %v5313_v1 = vpop.f32.mrb[43].mxu1  ;;  %v8677_v41 = vld [vmem:[#allocation41_spill] sm:$0xff]  ;;  %v8687_v57 = vld [vmem:[#allocation68_spill] sm:$0xff] }
 0x187   : > { %vm1530_vm5 = vcmp.eq.f32.partialorder %v4859_v60, %v5185_v8  ;;  %vm1538_vm6 = vcmp.eq.f32.partialorder %v8672_v31, %v5185_v8  ;;  %vm1546_vm7 = vcmp.eq.f32.partialorder %v8673_v36, %v5185_v8  ;;  %8674 = vst [vmem:[#allocation25_spill] sm:$0xff] %v5313_v1  ;;  %vm1762_vm8 = vcmp.lt.s32.totalorder %v1761_v37, %v1648_v22  ;;  %v8680_v4 = vld [vmem:[#allocation53_spill] sm:$0xff] }
 0x188   : > { %vm1554_vm9 = vcmp.eq.f32.partialorder %v8675_v38, %v5185_v8  ;;  %vm1562_vm10 = vcmp.eq.f32.partialorder %v8676_v42, %v5185_v8  ;;  %vm1570_vm11 = vcmp.eq.f32.partialorder %v8677_v41, %v5185_v8  ;;  %v1763_v55 = vsel %vm1762_vm8, %v1761_v37, %v1648_v22  ;;  %v5327_v1 = vpop.f32.mrb[44].mxu0  ;;  %v8682_v18 = vld [vmem:[#allocation57_spill] sm:$0xff] }
 0x189   : > { %vm1578_vm12 = vcmp.eq.f32.partialorder %v8678_v61, %v5185_v8  ;;  %vm1586_vm13 = vcmp.eq.f32.partialorder %v8679_v49, %v5185_v8  ;;  %8681 = vst [vmem:[#allocation29_spill] sm:$0xff] %v5327_v1  ;;  %vm1764_vm15 = vcmp.lt.s32.totalorder %v1763_v55, %v1656_v5  ;;  %vm1602_vm0 = vcmp.eq.f32.partialorder %v8682_v18, %v5185_v8  ;;  %v8684_v22 = vld [vmem:[#allocation65_spill] sm:$0xff]  ;;  %v5335_v37 = vpop.f32.mrb[44].mxu1  ;;  %v5337_v21 = vpop.f32.mrb[45].mxu0 }
 0x18a   : > { %vm1610_vm1 = vcmp.eq.f32.partialorder %v8683_v52, %v5185_v8  ;;  %8685 = vst [vmem:[#allocation33_spill] sm:$0xff] %v5335_v37  ;;  %8686 = vst [vmem:[#allocation37_spill] sm:$0xff] %v5337_v21  ;;  %v1765_v50 = vsel %vm1764_vm15, %v1763_v55, %v1656_v5  ;;  %vm1626_vm14 = vcmp.eq.f32.partialorder %v8687_v57, %v5185_v8  ;;  %v1634_v1 = vsel %vm1506_vm2, %v5044_v62, 128  ;;  %v5349_v59 = vpop.f32.mrb[45].mxu1  ;;  %v8705_v37 = vld [vmem:[#allocation34_spill] sm:$0xff] }
 0x18b   : > { %v1642_v19 = vsel %vm1514_vm3, %v5065_v23, 128  ;;  %8688 = vst [vmem:[#allocation41_spill] sm:$0xff] %v5349_v59  ;;  %vm1766_vm8 = vcmp.lt.s32.totalorder %v1765_v50, %v1664_v28  ;;  %v1650_v5 = vsel %vm1522_vm4, %v5072_v58, 128  ;;  %v1658_v55 = vsel %vm1530_vm5, %v5075_v54, 128 }
 0x18c   : > { %v1666_v25 = vsel %vm1538_vm6, %v5080_v17, 128  ;;  %v1767_v34 = vsel %vm1766_vm8, %v1765_v50, %v1664_v28  ;;  %v1674_v59 = vsel %vm1546_vm7, %v5083_v13, 128  ;;  %v5371_v46 = vsel %vm1554_vm9, %v5090_v14, 128  ;;  %v5379_v31 = vpop.f32.mrb[46].mxu0 }
 0x18d   : > { %v5377_v60 = vsel %vm1562_vm10, %v5093_v48, 128  ;;  %8689 = vst [vmem:[#allocation45_spill] sm:$0xff] %v5379_v31  ;;  %vm1768_vm2 = vcmp.lt.s32.totalorder %v1767_v34, %v1672_v30  ;;  %v5385_v50 = vsel %vm1570_vm11, %v5096_v45, 128  ;;  %v5391_v38 = vsel %vm1578_vm12, %v5106_v12, 128  ;;  %v5399_v28 = vpop.f32.mrb[46].mxu1  ;;  %v5401_v36 = vpop.f32.mrb[47].mxu0 }
 0x18e   : > { %v5397_v42 = vsel %vm1586_vm13, %v5109_v53, 128  ;;  %8690 = vst [vmem:[#allocation49_spill] sm:$0xff] %v5399_v28  ;;  %8691 = vst [vmem:[#allocation53_spill] sm:$0xff] %v5401_v36  ;;  %v1769_v31 = vsel %vm1768_vm2, %v1767_v34, %v1672_v30  ;;  %vm8692_vm3 = vcmp.eq.f32.partialorder %v8680_v4, %v5185_v8  ;;  %v5413_v61 = vsel %vm1602_vm0, %v5118_v39, 128  ;;  %v5421_v36 = vpop.f32.mrb[47].mxu1  ;;  %v8695_v34 = vld [vmem:[#allocation15_spill] sm:$0xff] }
 0x18f   : > { %v5407_v41 = vsel %vm8692_vm3, %v5115_v11, 128  ;;  %v5419_v49 = vsel %vm1610_vm1, %v5123_v47, 128  ;;  %8693 = vst [vmem:[#allocation57_spill] sm:$0xff] %v5421_v36  ;;  %vm1770_vm4 = vcmp.lt.s32.totalorder %v1769_v31, %v5246_v43  ;;  %vm8694_vm5 = vcmp.eq.f32.partialorder %v8684_v22, %v5185_v8  ;;  %v8696_v36 = vld [vmem:[#allocation16_spill] sm:$0xff]  ;;  %v8698_v22 = vld [vmem:[#allocation18_spill] sm:$0xff] }
 0x190   : > { %v5428_v30 = vsel %vm8694_vm5, %v5126_v35, 128  ;;  %v5434_v18 = vsel %vm1626_vm14, %v5130_v63, 128  ;;  %vm1838_vm6 = vcmp.lt.s32.totalorder %v1634_v1, %v1642_v19  ;;  %v1771_v52 = vsel %vm1770_vm4, %v1769_v31, %v5246_v43  ;;  %v5441_v28 = vpop.f32.mrb[48].mxu0  ;;  %v8699_v8 = vld [vmem:[#allocation22_spill] sm:$0xff] }
 0x191   : > { %v1839_v4 = vsel %vm1838_vm6, %v1634_v1, %v1642_v19  ;;  %vm1505_vm7 = vcmp.eq.f32.partialorder %v8695_v34, %v5187_v16  ;;  %vm1513_vm9 = vcmp.eq.f32.partialorder %v8696_v36, %v5187_v16  ;;  %8697 = vst [vmem:[#allocation61_spill] sm:$0xff] %v5441_v28  ;;  %vm1772_vm10 = vcmp.lt.s32.totalorder %v1771_v52, %v5251_v56  ;;  %v5448_v57 = vpop.f32.mrb[48].mxu1  ;;  %v5450_v1 = vpop.f32.mrb[49].mxu0  ;;  %v8702_v31 = vld [vmem:[#allocation26_spill] sm:$0xff] }
 0x192   : > { %vm1840_vm11 = vcmp.lt.s32.totalorder %v1839_v4, %v1650_v5  ;;  %vm1521_vm12 = vcmp.eq.f32.partialorder %v8698_v22, %v5187_v16  ;;  %vm1529_vm13 = vcmp.eq.f32.partialorder %v8699_v8, %v5187_v16  ;;  %8700 = vst [vmem:[#allocation65_spill] sm:$0xff] %v5448_v57  ;;  %8701 = vst [vmem:[#allocation68_spill] sm:$0xff] %v5450_v1  ;;  %v8703_v28 = vld [vmem:[#allocation30_spill] sm:$0xff]  ;;  %v5457_v21 = vpop.f32.mrb[49].mxu1 }
 0x193   : > { %v1773_v19 = vsel %vm1772_vm10, %v1771_v52, %v5251_v56  ;;  %v1841_v43 = vsel %vm1840_vm11, %v1839_v4, %v1650_v5  ;;  %vm1537_vm14 = vcmp.eq.f32.partialorder %v8702_v31, %v5187_v16  ;;  %vm1545_vm15 = vcmp.eq.f32.partialorder %v8703_v28, %v5187_v16  ;;  %8704 = vst [vmem:[#allocation15_spill] sm:$0xff] %v5457_v21  ;;  %v8706_v57 = vld [vmem:[#allocation38_spill] sm:$0xff] }
 0x194   : > { %vm1774_vm0 = vcmp.lt.s32.totalorder %v1773_v19, %v5258_v6  ;;  %vm1842_vm1 = vcmp.lt.s32.totalorder %v1841_v43, %v1658_v55  ;;  %vm1553_vm8 = vcmp.eq.f32.partialorder %v8705_v37, %v5187_v16  ;;  %vm1561_vm2 = vcmp.eq.f32.partialorder %v8706_v57, %v5187_v16  ;;  %v8707_v52 = vld [vmem:[#allocation42_spill] sm:$0xff]  ;;  %v5469_v1 = vpop.f32.mrb[50].mxu0 }
 0x195   : > { %v1775_v56 = vsel %vm1774_vm0, %v1773_v19, %v5258_v6  ;;  %v1843_v5 = vsel %vm1842_vm1, %v1841_v43, %v1658_v55  ;;  %v8708_v4 = vld [vmem:[#allocation46_spill] sm:$0xff]  ;;  %8709 = vst [vmem:[#allocation16_spill] sm:$0xff] %v5469_v1  ;;  %v5476_v24 = vpop.f32.mrb[50].mxu1  ;;  %v5478_v6 = vpop.f32.mrb[51].mxu0  ;;  %vm1617_vm11 = vcmp.eq.f32.partialorder %v8716_v29, %v5187_v16  ;;  %v5529_v22 = vsel %vm1545_vm15, %v5083_v13, 128 }
 0x196   : > { %vm1776_vm5 = vcmp.lt.s32.totalorder %v1775_v56, %v5263_v20  ;;  %vm1844_vm6 = vcmp.lt.s32.totalorder %v1843_v5, %v1666_v25  ;;  %v8710_v21 = vld [vmem:[#allocation50_spill] sm:$0xff]  ;;  %8712 = vst [vmem:[#allocation18_spill] sm:$0xff] %v5476_v24  ;;  %v5485_v7 = vpop.f32.mrb[51].mxu1  ;;  %v8717_v24 = vld [vmem:[#allocation69_spill] sm:$0xff] }
 0x197   : > { %v1777_v55 = vsel %vm1776_vm5, %v1775_v56, %v5263_v20  ;;  %v1845_v19 = vsel %vm1844_vm6, %v1843_v5, %v1666_v25  ;;  %v8713_v43 = vld [vmem:[#allocation58_spill] sm:$0xff]  ;;  %8715 = vst [vmem:[#allocation22_spill] sm:$0xff] %v5485_v7  ;;  %vm1625_vm3 = vcmp.eq.f32.partialorder %v8717_v24, %v5187_v16  ;;  %v1633_v56 = vsel %vm1505_vm7, %v5044_v62, 128 }
 0x198   : > { %vm1601_vm0 = vcmp.eq.f32.partialorder %v8713_v43, %v5187_v16  ;;  %v8714_v1 = vld [vmem:[#allocation62_spill] sm:$0xff]  ;;  %vm1778_vm10 = vcmp.lt.s32.totalorder %v1777_v55, %v5268_v44  ;;  %vm1846_vm4 = vcmp.lt.s32.totalorder %v1845_v19, %v1674_v59  ;;  %v1641_v5 = vsel %vm1513_vm9, %v5065_v23, 128  ;;  %v5501_v7 = vpop.f32.mrb[52].mxu0 }
 0x199   : > { %vm1609_vm1 = vcmp.eq.f32.partialorder %v8714_v1, %v5187_v16  ;;  %v1779_v20 = vsel %vm1778_vm10, %v1777_v55, %v5268_v44  ;;  %v1847_v25 = vsel %vm1846_vm4, %v1845_v19, %v1674_v59  ;;  %8718 = vst [vmem:[#allocation26_spill] sm:$0xff] %v5501_v7  ;;  %v1649_v59 = vsel %vm1521_vm12, %v5072_v58, 128  ;;  %v5513_v34 = vpop.f32.mrb[52].mxu1  ;;  %v5515_v36 = vpop.f32.mrb[53].mxu0 }
 0x19a   : > { %vm1780_vm5 = vcmp.lt.s32.totalorder %v1779_v20, %v5273_v3  ;;  %vm1848_vm6 = vcmp.lt.s32.totalorder %v1847_v25, %v5371_v46  ;;  %v1657_v44 = vsel %vm1529_vm13, %v5075_v54, 128  ;;  %v5523_v7 = vsel %vm1537_vm14, %v5080_v17, 128  ;;  %v5531_v8 = vpop.f32.mrb[53].mxu1 }
 0x19b   : > { %v1781_v55 = vsel %vm1780_vm5, %v1779_v20, %v5273_v3  ;;  %v1849_v19 = vsel %vm1848_vm6, %v1847_v25, %v5371_v46  ;;  %v5539_v3 = vsel %vm1553_vm8, %v5090_v14, 128  ;;  %v5545_v46 = vsel %vm1561_vm2, %v5093_v48, 128 }
 0x19c   : > { %vm1782_vm7 = vcmp.lt.s32.totalorder %v1781_v55, %v5278_v32  ;;  %vm1850_vm9 = vcmp.lt.s32.totalorder %v1849_v19, %v5377_v60  ;;  %vm8719_vm12 = vcmp.eq.f32.partialorder %v8707_v52, %v5187_v16  ;;  %vm8720_vm13 = vcmp.eq.f32.partialorder %v8708_v4, %v5187_v16  ;;  %v5561_v25 = vpop.f32.mrb[54].mxu0 }
 0x19d   : > { %v1783_v28 = vsel %vm1782_vm7, %v1781_v55, %v5278_v32  ;;  %v1851_v31 = vsel %vm1850_vm9, %v1849_v19, %v5377_v60  ;;  %v5553_v20 = vsel %vm8719_vm12, %v5096_v45, 128  ;;  %v5559_v37 = vsel %vm8720_vm13, %v5106_v12, 128  ;;  %v5577_v57 = vpop.f32.mrb[54].mxu1  ;;  %v5579_v52 = vpop.f32.mrb[55].mxu0 }
 0x19e   : > { %vm1784_vm14 = vcmp.lt.s32.totalorder %v1783_v28, %v5283_v2  ;;  %vm1852_vm15 = vcmp.lt.s32.totalorder %v1851_v31, %v5385_v50  ;;  %vm8721_vm8 = vcmp.eq.f32.partialorder %v8710_v21, %v5187_v16  ;;  %vm8722_vm2 = vcmp.eq.f32.partialorder %v8711_v33, %v5187_v16  ;;  %v5595_v19 = vpop.f32.mrb[55].mxu1 }
 0x19f   : > { %v5569_v32 = vsel %vm8721_vm8, %v5109_v53, 128  ;;  %v5575_v60 = vsel %vm8722_vm2, %v5115_v11, 128  ;;  %v1785_v4 = vsel %vm1784_vm14, %v1783_v28, %v5283_v2  ;;  %v1853_v55 = vsel %vm1852_vm15, %v1851_v31, %v5385_v50  ;;  %8723 = vst [vmem:[#allocation30_spill] sm:$0xff] %v5595_v19 }
 0x1a0   : > { %v5587_v21 = vsel %vm1601_vm0, %v5118_v39, 128  ;;  %v5593_v33 = vsel %vm1609_vm1, %v5123_v47, 128  ;;  %vm1786_vm4 = vcmp.lt.s32.totalorder %v1785_v4, %v5288_v0  ;;  %vm1854_vm10 = vcmp.lt.s32.totalorder %v1853_v55, %v5391_v38  ;;  %v5618_v19 = vpop.f32.mrb[56].mxu0 }
 0x1a1   : > { %v5603_v2 = vsel %vm1617_vm11, %v5126_v35, 128  ;;  %v5609_v50 = vsel %vm1625_vm3, %v5130_v63, 128  ;;  %v1787_v1 = vsel %vm1786_vm4, %v1785_v4, %v5288_v0  ;;  %v1855_v43 = vsel %vm1854_vm10, %v1853_v55, %v5391_v38  ;;  %v5628_v0 = vpop.f32.mrb[56].mxu1  ;;  %v5630_v38 = vpop.f32.mrb[57].mxu0  ;;  %v8727_v55 = vld [vmem:[#allocation14_spill] sm:$0xff] }
 0x1a2   : > { %vm1799_vm0 = vcmp.lt.s32.totalorder %v1633_v56, %v1641_v5  ;;  %v8724_v28 = vrot.slane %v5165_v10, 1  ;;  %vm1788_vm11 = vcmp.lt.s32.totalorder %v1787_v1, %v5293_v9  ;;  %vm1856_vm1 = vcmp.lt.s32.totalorder %v1855_v43, %v5397_v42  ;;  %8726 = vst [vmem:[#allocation34_spill] sm:$0xff] %v5630_v38 }
 0x1a3   : > { %v1800_v29 = vsel %vm1799_vm0, %v1633_v56, %v1641_v5  ;;  %v8725_v16 = vmin.f32 %v5145_v51, %v5159_v15  ;;  %v1857_v4 = vsel %vm1856_vm1, %v1855_v43, %v5397_v42  ;;  %v8731_v42 = vld [vmem:[#allocation23_spill] sm:$0xff] }
 0x1a4   : > { %v5616_v31 = vmin.f32 %v5165_v10, %v8724_v28  ;;  %v1789_v10 = vsel %vm1788_vm11, %v1787_v1, %v5293_v9  ;;  %vm1801_vm3 = vcmp.lt.s32.totalorder %v1800_v29, %v1649_v59  ;;  %v5636_v28 = vpop.f32.mrb[57].mxu1  ;;  %vm1858_vm6 = vcmp.lt.s32.totalorder %v1857_v4, %v5407_v41  ;;  %v8730_v9 = vld [vmem:[#allocation20_spill] sm:$0xff]  ;;  %v5646_v1 = vpop.f32.mrb[58].mxu0  ;;  %v8736_v51 = vld [vmem:[#allocation31_spill] sm:$0xff] }
 0x1a5   : > { %v5626_v24 = vmin.f32 %v8725_v16, %v5183_v26  ;;  %8728 = vst [vmem:[#allocation38_spill] sm:$0xff] %v5636_v28  ;;  %v1790_v56 = vrot.slane %v1789_v10, 4  ;;  %v1802_v5 = vsel %vm1801_vm3, %v1800_v29, %v1649_v59  ;;  %v8729_v16 = vld [vmem:[#allocation17_spill] sm:$0xff]  ;;  %v1859_v26 = vsel %vm1858_vm6, %v1857_v4, %v5407_v41  ;;  %8732 = vst [vmem:[#allocation42_spill] sm:$0xff] %v5646_v1  ;;  %v8733_v59 = vld [vmem:[#allocation27_spill] sm:$0xff]  ;;  %v5651_v29 = vpop.f32.mrb[58].mxu1 }
 0x1a6   : > { %vm1507_vm5 = vcmp.eq.f32.partialorder %v8727_v55, %v5616_v31  ;;  %vm1515_vm7 = vcmp.eq.f32.partialorder %v8729_v16, %v5616_v31  ;;  %vm1803_vm9 = vcmp.lt.s32.totalorder %v1802_v5, %v1657_v44  ;;  %vm1523_vm12 = vcmp.eq.f32.partialorder %v8730_v9, %v5616_v31  ;;  %8734 = vst [vmem:[#allocation46_spill] sm:$0xff] %v5651_v29  ;;  %v5653_v15 = vpop.f32.mrb[59].mxu0  ;;  %v5659_v1 = vpop.f32.mrb[59].mxu1  ;;  %v8745_v29 = vld [vmem:[#allocation51_spill] sm:$0xff] }
 0x1a7   : > { %vm1531_vm13 = vcmp.eq.f32.partialorder %v8731_v42, %v5616_v31  ;;  %vm1791_vm14 = vcmp.lt.s32.totalorder %v1789_v10, %v1790_v56  ;;  %vm1860_vm15 = vcmp.lt.s32.totalorder %v1859_v26, %v5413_v61  ;;  %v1804_v43 = vsel %vm1803_vm9, %v1802_v5, %v1657_v44  ;;  %8735 = vst [vmem:[#allocation50_spill] sm:$0xff] %v5653_v15  ;;  %v8738_v5 = vld [vmem:[#allocation35_spill] sm:$0xff] }
 0x1a8   : > { %vm1539_vm8 = vcmp.eq.f32.partialorder %v8733_v59, %v5616_v31  ;;  %v1792_v41 = vsel %vm1791_vm14, %v1789_v10, %v1790_v56  ;;  %v1861_v4 = vsel %vm1860_vm15, %v1859_v26, %v5413_v61  ;;  %vm1805_vm2 = vcmp.lt.s32.totalorder %v1804_v43, %v5523_v7  ;;  %8737 = vst [vmem:[#allocation54_spill] sm:$0xff] %v5659_v1  ;;  %v8739_v26 = vld [vmem:[#allocation39_spill] sm:$0xff]  ;;  %v5671_v10 = vpop.f32.mrb[60].mxu0 }
 0x1a9   : > { %vm1547_vm4 = vcmp.eq.f32.partialorder %v8736_v51, %v5616_v31  ;;  %v1793_v28 = vrot.slane %v1792_v41, 2  ;;  %vm1862_vm10 = vcmp.lt.s32.totalorder %v1861_v4, %v5419_v49  ;;  %v1806_v44 = vsel %vm1805_vm2, %v1804_v43, %v5523_v7  ;;  %v8740_v61 = vld [vmem:[#allocation43_spill] sm:$0xff]  ;;  %8741 = vst [vmem:[#allocation58_spill] sm:$0xff] %v5671_v10  ;;  %v5677_v43 = vpop.f32.mrb[60].mxu1 }
 0x1aa   : > { %vm1555_vm0 = vcmp.eq.f32.partialorder %v8738_v5, %v5616_v31  ;;  %v1863_v15 = vsel %vm1862_vm10, %v1861_v4, %v5419_v49  ;;  %vm1807_vm11 = vcmp.lt.s32.totalorder %v1806_v44, %v5529_v22  ;;  %vm1563_vm1 = vcmp.eq.f32.partialorder %v8739_v26, %v5616_v31  ;;  %v8742_v56 = vld [vmem:[#allocation47_spill] sm:$0xff]  ;;  %8743 = vst [vmem:[#allocation62_spill] sm:$0xff] %v5677_v43  ;;  %v5679_v49 = vpop.f32.mrb[61].mxu0  ;;  %v5685_v10 = vpop.f32.mrb[61].mxu1  ;;  %v8754_v43 = vld [vmem:[#allocation70_spill] sm:$0xff] }
 0x1ab   : > { %vm1571_vm3 = vcmp.eq.f32.partialorder %v8740_v61, %v5616_v31  ;;  %vm1794_vm6 = vcmp.lt.s32.totalorder %v1792_v41, %v1793_v28  ;;  %vm1864_vm9 = vcmp.lt.s32.totalorder %v1863_v15, %v5428_v30  ;;  %v1808_v7 = vsel %vm1807_vm11, %v1806_v44, %v5529_v22  ;;  %8744 = vst [vmem:[#allocation66_spill] sm:$0xff] %v5679_v49  ;;  %v8747_v44 = vld [vmem:[#allocation55_spill] sm:$0xff] }
 0x1ac   : > { %v1795_v4 = vsel %vm1794_vm6, %v1792_v41, %v1793_v28  ;;  %v1865_v1 = vsel %vm1864_vm9, %v1863_v15, %v5428_v30  ;;  %vm1809_vm15 = vcmp.lt.s32.totalorder %v1808_v7, %v5539_v3  ;;  %8746 = vst [vmem:[#allocation69_spill] sm:$0xff] %v5685_v10  ;;  %vm1595_vm11 = vcmp.eq.f32.partialorder %v8747_v44, %v5616_v31  ;;  %v8748_v15 = vld [vmem:[#allocation59_spill] sm:$0xff]  ;;  %v5697_v28 = vpop.f32.mrb[62].mxu0 }
 0x1ad   : > { %v1796_v38 = vrot.slane %v1795_v4, 1  ;;  %vm1866_vm10 = vcmp.lt.s32.totalorder %v1865_v1, %v5434_v18  ;;  %v1810_v22 = vsel %vm1809_vm15, %v1808_v7, %v5539_v3  ;;  %vm1603_vm9 = vcmp.eq.f32.partialorder %v8748_v15, %v5616_v31  ;;  %v8749_v30 = vld [vmem:[#allocation63_spill] sm:$0xff]  ;;  %8750 = vst [vmem:[#allocation14_spill] sm:$0xff] %v5697_v28  ;;  %v5702_v7 = vpop.f32.mrb[62].mxu1 }
 0x1ae   : > { %v1867_v49 = vsel %vm1866_vm10, %v1865_v1, %v5434_v18  ;;  %vm1811_vm6 = vcmp.lt.s32.totalorder %v1810_v22, %v5545_v46  ;;  %v8751_v3 = vld [vmem:[#allocation67_spill] sm:$0xff]  ;;  %v5704_v18 = vpop.f32.mrb[63].mxu0  ;;  %vm1627_vm2 = vcmp.eq.f32.partialorder %v8754_v43, %v5616_v31  ;;  %v1635_v28 = vsel %vm1507_vm5, %v5044_v62, 128 }
 0x1af   : > { %vm1797_vm14 = vcmp.lt.s32.totalorder %v1795_v4, %v1796_v38  ;;  %v1868_v41 = vrot.slane %v1867_v49, 4  ;;  %v1812_v10 = vsel %vm1811_vm6, %v1810_v22, %v5545_v46  ;;  %vm1619_vm15 = vcmp.eq.f32.partialorder %v8751_v3, %v5616_v31  ;;  %8752 = vst [vmem:[#allocation17_spill] sm:$0xff] %v5704_v18  ;;  %v5715_v46 = vpop.f32.mrb[63].mxu1 }
 0x1b0   : > { %v5706_v1 = vsel %vm1797_vm14, %v1795_v4, %v1796_v38  ;;  %vm1813_vm10 = vcmp.lt.s32.totalorder %v1812_v10, %v5553_v20  ;;  %v1643_v38 = vsel %vm1515_vm7, %v5065_v23, 128  ;;  %v1651_v4 = vsel %vm1523_vm12, %v5072_v58, 128 }
 0x1b1   : > { %8753 = vst [vmem:[#allocation20_spill] sm:$0xff] %v5706_v1  ;;  %vm1869_vm6 = vcmp.lt.s32.totalorder %v1867_v49, %v1868_v41  ;;  %v1814_v22 = vsel %vm1813_vm10, %v1812_v10, %v5553_v20  ;;  %v1659_v55 = vsel %vm1531_vm13, %v5075_v54, 128  ;;  %v1667_v20 = vsel %vm1539_vm8, %v5080_v17, 128 }
 0x1b2   : > { %v1870_v18 = vsel %vm1869_vm6, %v1867_v49, %v1868_v41  ;;  %vm1815_vm14 = vcmp.lt.s32.totalorder %v1814_v22, %v5559_v37  ;;  %v1675_v9 = vsel %vm1547_vm4, %v5083_v13, 128  ;;  %v5744_v49 = vsel %vm1555_vm0, %v5090_v14, 128 }
 0x1b3   : > { %v1871_v16 = vrot.slane %v1870_v18, 2  ;;  %v1816_v10 = vsel %vm1815_vm14, %v1814_v22, %v5559_v37  ;;  %v5751_v42 = vsel %vm1563_vm1, %v5093_v48, 128  ;;  %v5757_v51 = vsel %vm1571_vm3, %v5096_v45, 128 }
 0x1b4   : > { %vm1817_vm5 = vcmp.lt.s32.totalorder %v1816_v10, %v5569_v32  ;;  %vm8755_vm7 = vcmp.eq.f32.partialorder %v8742_v56, %v5616_v31  ;;  %vm8756_vm13 = vcmp.eq.f32.partialorder %v8745_v29, %v5616_v31  ;;  %v5776_v26 = vsel %vm1595_vm11, %v5115_v11, 128 }
 0x1b5   : > { %v5763_v37 = vsel %vm8755_vm7, %v5106_v12, 128  ;;  %vm1872_vm12 = vcmp.lt.s32.totalorder %v1870_v18, %v1871_v16  ;;  %v1818_v59 = vsel %vm1817_vm5, %v1816_v10, %v5569_v32  ;;  %v5770_v5 = vsel %vm8756_vm13, %v5109_v53, 128 }
 0x1b6   : > { %v1873_v61 = vsel %vm1872_vm12, %v1870_v18, %v1871_v16  ;;  %vm1819_vm8 = vcmp.lt.s32.totalorder %v1818_v59, %v5575_v60  ;;  %v5783_v32 = vsel %vm1603_vm9, %v5118_v39, 128  ;;  %vm8757_vm4 = vcmp.eq.f32.partialorder %v8749_v30, %v5616_v31  ;;  %v8758_v30 = vld [vmem:[#allocation19_spill] sm:$0xff]  ;;  %v8759_v16 = vld [vmem:[#allocation92_spill] sm:$0xff] }
 0x1b7   : > { %v5789_v29 = vsel %vm8757_vm4, %v5123_v47, 128  ;;  %v1874_v56 = vrot.slane %v1873_v61, 1  ;;  %v1820_v44 = vsel %vm1819_vm8, %v1818_v59, %v5575_v60  ;;  %v5796_v41 = vsel %vm1619_vm15, %v5126_v35, 128 }
 0x1b8   : > { %v5802_v15 = vsel %vm1627_vm2, %v5130_v63, 128  ;;  %vm1821_vm0 = vcmp.lt.s32.totalorder %v1820_v44, %v5587_v21  ;;  %vm1877_vm1 = vcmp.lt.s32.totalorder %v1635_v28, %v1643_v38  ;;  %v5807_v18 = vsub.f32 %v8758_v30, %v5195_v40  ;;  %v8761_v40 = vld [vmem:[#allocation88_spill] sm:$0xff]  ;;  %v8762_v63 = vld [vmem:[#allocation90_spill] sm:$0xff] }
 0x1b9   : > { %v5811_v60 = vsub.f32 %v8758_v30, %v5201_v27  ;;  %vm1875_vm3 = vcmp.lt.s32.totalorder %v1873_v61, %v1874_v56  ;;  %v1822_v3 = vsel %vm1821_vm0, %v1820_v44, %v5587_v21  ;;  %v1878_v22 = vsel %vm1877_vm1, %v1635_v28, %v1643_v38  ;;  %v8763_v21 = vld [vmem:[#allocation91_spill] sm:$0xff]  ;;  %v8764_v38 = vld [vmem:[#allocation93_spill] sm:$0xff] }
 0x1ba   : > { %v5816_v31 = vsub.f32 %v8758_v30, %v8759_v16  ;;  %v5818_v43 = vsel %vm1875_vm3, %v1873_v61, %v1874_v56  ;;  %vm1823_vm2 = vcmp.lt.s32.totalorder %v1822_v3, %v5593_v33  ;;  %vm1879_vm11 = vcmp.lt.s32.totalorder %v1878_v22, %v1651_v4  ;;  %v8766_v56 = vld [vmem:[#allocation94_spill] sm:$0xff]  ;;  %v8767_v44 = vld [vmem:[#allocation21_spill] sm:$0xff] }
 0x1bb   : > { %v1405_v10 = vmin.f32 %v8761_v40, %v5807_v18  ;;  %v1824_v59 = vsel %vm1823_vm2, %v1822_v3, %v5593_v33  ;;  %v1880_v27 = vsel %vm1879_vm11, %v1878_v22, %v1651_v4  ;;  %v1447_v35 = vmin.f32 %v8762_v63, %v5811_v60  ;;  %v8768_v3 = vld [vmem:[#allocation95_spill] sm:$0xff]  ;;  %v8769_v22 = vld [vmem:[#allocation96_spill] sm:$0xff] }
 0x1bc   : > { %8760 = vst [vmem:[#allocation23_spill] sm:$0xff] %v5816_v31  ;;  %v1426_v28 = vmin.f32 %v8763_v21, %v5816_v31  ;;  %vm1825_vm9 = vcmp.lt.s32.totalorder %v1824_v59, %v5603_v2  ;;  %vm1881_vm15 = vcmp.lt.s32.totalorder %v1880_v27, %v1659_v55  ;;  %v5831_v61 = vsub.f32 %v8758_v30, %v8764_v38  ;;  %v8774_v31 = vld [vmem:[#allocation24_spill] sm:$0xff] }
 0x1bd   : > { %v5835_v16 = vsub.f32 %v8767_v44, %v8766_v56  ;;  %v1826_v33 = vsel %vm1825_vm9, %v1824_v59, %v5603_v2  ;;  %v1882_v4 = vsel %vm1881_vm15, %v1880_v27, %v1659_v55  ;;  %v5840_v63 = vsub.f32 %v8767_v44, %v8768_v3  ;;  %v8771_v56 = vld [vmem:[#allocation97_spill] sm:$0xff] }
 0x1be   : > { %8765 = vst [vmem:[#allocation27_spill] sm:$0xff] %v5831_v61  ;;  %v5844_v40 = vsub.f32 %v8767_v44, %v8769_v22  ;;  %vm1827_vm10 = vcmp.lt.s32.totalorder %v1826_v33, %v5609_v50  ;;  %vm1883_vm6 = vcmp.lt.s32.totalorder %v1882_v4, %v1667_v20  ;;  %v1468_v30 = vmin.f32 %v5626_v24, %v5831_v61  ;;  %v8773_v22 = vld [vmem:[#allocation98_spill] sm:$0xff]  ;;  %v8775_v61 = vld [vmem:[#allocation99_spill] sm:$0xff] }
 0x1bf   : > { %v1406_v21 = vmin.f32 %v1405_v10, %v5835_v16  ;;  %v1828_v38 = vsel %vm1827_vm10, %v1826_v33, %v5609_v50  ;;  %v1884_v2 = vsel %vm1883_vm6, %v1882_v4, %v1667_v20  ;;  %v1448_v55 = vmin.f32 %v1447_v35, %v5840_v63  ;;  %v8776_v50 = vld [vmem:[#allocation100_spill] sm:$0xff]  ;;  %v8778_v20 = vld [vmem:[#allocation25_spill] sm:$0xff] }
 0x1c0   : > { %8770 = vst [vmem:[#allocation31_spill] sm:$0xff] %v5844_v40  ;;  %v1427_v59 = vmin.f32 %v1426_v28, %v5844_v40  ;;  %v1829_v27 = vrot.slane %v1828_v38, 4  ;;  %vm1885_vm14 = vcmp.lt.s32.totalorder %v1884_v2, %v1675_v9  ;;  %v5855_v3 = vsub.f32 %v8767_v44, %v8771_v56  ;;  %v8838_v40 = vld [vmem:[#allocation64_spill] sm:$0xff] }
 0x1c1   : > { %v5859_v47 = vsub.f32 %v8774_v31, %v8773_v22  ;;  %v1886_v24 = vsel %vm1885_vm14, %v1884_v2, %v1675_v9  ;;  %v5863_v10 = vsub.f32 %v8774_v31, %v8775_v61  ;;  %v5867_v35 = vsub.f32 %v8774_v31, %v8776_v50  ;;  %v8780_v22 = vld [vmem:[#allocation29_spill] sm:$0xff]  ;;  %v8781_v50 = vld [vmem:[#allocation28_spill] sm:$0xff] }
 0x1c2   : > { %8772 = vst [vmem:[#allocation35_spill] sm:$0xff] %v5855_v3  ;;  %v5871_v28 = vsub.f32 %v8774_v31, %v8778_v20  ;;  %vm1830_vm5 = vcmp.lt.s32.totalorder %v1828_v38, %v1829_v27  ;;  %vm1887_vm7 = vcmp.lt.s32.totalorder %v1886_v24, %v5744_v49  ;;  %v1469_v44 = vmin.f32 %v1468_v30, %v5855_v3  ;;  %v8782_v3 = vld [vmem:[#allocation33_spill] sm:$0xff] }
 0x1c3   : > { %8777 = vst [vmem:[#allocation39_spill] sm:$0xff] %v5867_v35  ;;  %v1407_v33 = vmin.f32 %v1406_v21, %v5859_v47  ;;  %v1831_v9 = vsel %vm1830_vm5, %v1828_v38, %v1829_v27  ;;  %v1888_v4 = vsel %vm1887_vm7, %v1886_v24, %v5744_v49  ;;  %v1449_v61 = vmin.f32 %v1448_v55, %v5863_v10  ;;  %v8783_v49 = vld [vmem:[#allocation37_spill] sm:$0xff] }
 0x1c4   : > { %8779 = vst [vmem:[#allocation43_spill] sm:$0xff] %v5871_v28  ;;  %v1428_v2 = vmin.f32 %v1427_v59, %v5867_v35  ;;  %v1832_v56 = vrot.slane %v1831_v9, 2  ;;  %vm1889_vm12 = vcmp.lt.s32.totalorder %v1888_v4, %v5751_v42  ;;  %v1470_v31 = vmin.f32 %v1469_v44, %v5871_v28  ;;  %v8785_v55 = vld [vmem:[#allocation41_spill] sm:$0xff]  ;;  %v8788_v44 = vld [vmem:[#allocation32_spill] sm:$0xff] }
 0x1c5   : > { %v5883_v20 = vsub.f32 %v8781_v50, %v8780_v22  ;;  %v1890_v30 = vsel %vm1889_vm12, %v1888_v4, %v5751_v42  ;;  %v5888_v21 = vsub.f32 %v8781_v50, %v8782_v3  ;;  %v5892_v38 = vsub.f32 %v8781_v50, %v8783_v49  ;;  %v8787_v24 = vld [vmem:[#allocation45_spill] sm:$0xff] }
 0x1c6   : > { %v5896_v59 = vsub.f32 %v8781_v50, %v8785_v55  ;;  %vm1833_vm13 = vcmp.lt.s32.totalorder %v1831_v9, %v1832_v56  ;;  %vm1891_vm8 = vcmp.lt.s32.totalorder %v1890_v30, %v5757_v51  ;;  %v5902_v42 = vsub.f32 %v8788_v44, %v8787_v24  ;;  %v8789_v35 = vld [vmem:[#allocation49_spill] sm:$0xff] }
 0x1c7   : > { %8784 = vst [vmem:[#allocation47_spill] sm:$0xff] %v5892_v38  ;;  %v1408_v27 = vmin.f32 %v1407_v33, %v5883_v20  ;;  %v1834_v4 = vsel %vm1833_vm13, %v1831_v9, %v1832_v56  ;;  %v1892_v3 = vsel %vm1891_vm8, %v1890_v30, %v5757_v51  ;;  %v1450_v22 = vmin.f32 %v1449_v61, %v5888_v21  ;;  %v8790_v9 = vld [vmem:[#allocation53_spill] sm:$0xff] }
 0x1c8   : > { %8786 = vst [vmem:[#allocation51_spill] sm:$0xff] %v5896_v59  ;;  %v1429_v49 = vmin.f32 %v1428_v2, %v5892_v38  ;;  %v1835_v28 = vrot.slane %v1834_v4, 1  ;;  %vm1893_vm4 = vcmp.lt.s32.totalorder %v1892_v3, %v5763_v37  ;;  %v1471_v50 = vmin.f32 %v1470_v31, %v5896_v59  ;;  %v8792_v61 = vld [vmem:[#allocation57_spill] sm:$0xff]  ;;  %v8795_v31 = vld [vmem:[#allocation36_spill] sm:$0xff]  ;;  %v8807_v38 = vld [vmem:[#allocation22_spill] sm:$0xff] }
 0x1c9   : > { %v1409_v55 = vmin.f32 %v1408_v27, %v5902_v42  ;;  %v1894_v33 = vsel %vm1893_vm4, %v1892_v3, %v5763_v37  ;;  %v5913_v24 = vsub.f32 %v8788_v44, %v8789_v35  ;;  %v5917_v51 = vsub.f32 %v8788_v44, %v8790_v9  ;;  %v8794_v56 = vld [vmem:[#allocation61_spill] sm:$0xff] }
 0x1ca   : > { %v5921_v2 = vsub.f32 %v8788_v44, %v8792_v61  ;;  %vm1836_vm0 = vcmp.lt.s32.totalorder %v1834_v4, %v1835_v28  ;;  %vm1895_vm1 = vcmp.lt.s32.totalorder %v1894_v33, %v5770_v5  ;;  %v5926_v30 = vsub.f32 %v8795_v31, %v8794_v56  ;;  %v8796_v37 = vld [vmem:[#allocation65_spill] sm:$0xff] }
 0x1cb   : > { %8791 = vst [vmem:[#allocation55_spill] sm:$0xff] %v5917_v51  ;;  %v5930_v27 = vsub.f32 %v8795_v31, %v8796_v37  ;;  %v5932_v35 = vsel %vm1836_vm0, %v1834_v4, %v1835_v28  ;;  %v1896_v3 = vsel %vm1895_vm1, %v1894_v33, %v5770_v5  ;;  %v1451_v9 = vmin.f32 %v1450_v22, %v5913_v24  ;;  %v8798_v4 = vld [vmem:[#allocation68_spill] sm:$0xff]  ;;  %v8800_v22 = vld [vmem:[#allocation15_spill] sm:$0xff] }
 0x1cc   : > { %8793 = vst [vmem:[#allocation59_spill] sm:$0xff] %v5921_v2  ;;  %8797 = vst [vmem:[#allocation63_spill] sm:$0xff] %v5932_v35  ;;  %v1430_v44 = vmin.f32 %v1429_v49, %v5917_v51  ;;  %v2844_v61 = vcombine.low %v5706_v1, %v5932_v35  ;;  %vm1897_vm3 = vcmp.lt.s32.totalorder %v1896_v3, %v5776_v26  ;;  %v8802_v33 = vld [vmem:[#allocation76_spill] sm:$0xff] }
 0x1cd   : > { %v1472_v56 = vmin.f32 %v1471_v50, %v5921_v2  ;;  %v1410_v59 = vmin.f32 %v1409_v55, %v5926_v30  ;;  %v1898_v37 = vsel %vm1897_vm3, %v1896_v3, %v5776_v26  ;;  %v1452_v28 = vmin.f32 %v1451_v9, %v5930_v27  ;;  %v8803_v50 = vld [vmem:[#allocation16_spill] sm:$0xff]  ;;  %v8805_v26 = vld [vmem:[#allocation18_spill] sm:$0xff] }
 0x1ce   : > { %v5946_v5 = vsub.f32 %v8795_v31, %v8798_v4  ;;  %v5950_v49 = vsub.f32 %v8795_v31, %v8800_v22  ;;  %v5953_v51 = vrot.slane %v2844_v61, %v8802_v33  ;;  %vm1899_vm2 = vcmp.lt.s32.totalorder %v1898_v37, %v5783_v32  ;;  %v8804_v2 = vld [vmem:[#allocation40_spill] sm:$0xff] }
 0x1cf   : > { %v5958_v55 = vsub.f32 %v8804_v2, %v8803_v50  ;;  %v5962_v3 = vsub.f32 %v8804_v2, %v8805_v26  ;;  %v1900_v9 = vsel %vm1899_vm2, %v1898_v37, %v5783_v32  ;;  %v5969_v61 = vsub.f32 %v8804_v2, %v5478_v6  ;;  %v8809_v37 = vld [vmem:[#allocation26_spill] sm:$0xff] }
 0x1d0   : > { %8799 = vst [vmem:[#allocation67_spill] sm:$0xff] %v5946_v5  ;;  %8801 = vst [vmem:[#allocation70_spill] sm:$0xff] %v5950_v49  ;;  %v1431_v4 = vmin.f32 %v1430_v44, %v5946_v5  ;;  %v1473_v31 = vmin.f32 %v1472_v56, %v5950_v49  ;;  %vm1901_vm11 = vcmp.lt.s32.totalorder %v1900_v9, %v5789_v29  ;;  %v8810_v56 = vld [vmem:[#allocation44_spill] sm:$0xff] }
 0x1d1   : > { %8806 = vst [vmem:[#allocation19_spill] sm:$0xff] %v5969_v61  ;;  %v1411_v22 = vmin.f32 %v1410_v59, %v5958_v55  ;;  %v1453_v50 = vmin.f32 %v1452_v28, %v5962_v3  ;;  %v5976_v26 = vsub.f32 %v8804_v2, %v8807_v38  ;;  %v1902_v32 = vsel %vm1901_vm11, %v1900_v9, %v5789_v29 }
 0x1d2   : > { %v1432_v44 = vmin.f32 %v1431_v4, %v5969_v61  ;;  %v5982_v49 = vsub.f32 %v8810_v56, %v8809_v37  ;;  %v5986_v6 = vsub.f32 %v8810_v56, %v5513_v34  ;;  %vm1903_vm9 = vcmp.lt.s32.totalorder %v1902_v32, %v5796_v41  ;;  %v8813_v34 = vld [vmem:[#allocation48_spill] sm:$0xff] }
 0x1d3   : > { %8808 = vst [vmem:[#allocation92_spill] sm:$0xff] %v5976_v26  ;;  %v1474_v59 = vmin.f32 %v1473_v31, %v5976_v26  ;;  %v5992_v38 = vsub.f32 %v8810_v56, %v5515_v36  ;;  %v5996_v29 = vsub.f32 %v8810_v56, %v5531_v8  ;;  %v1904_v2 = vsel %vm1903_vm9, %v1902_v32, %v5796_v41  ;;  %v8817_v56 = vld [vmem:[#allocation52_spill] sm:$0xff] }
 0x1d4   : > { %v1412_v28 = vmin.f32 %v1411_v22, %v5982_v49  ;;  %v1454_v9 = vmin.f32 %v1453_v50, %v5986_v6  ;;  %v6003_v4 = vsub.f32 %v8813_v34, %v5561_v25  ;;  %vm1905_vm15 = vcmp.lt.s32.totalorder %v1904_v2, %v5802_v15  ;;  %v8815_v25 = vld [vmem:[#allocation30_spill] sm:$0xff] }
 0x1d5   : > { %8811 = vst [vmem:[#allocation88_spill] sm:$0xff] %v5992_v38  ;;  %8812 = vst [vmem:[#allocation90_spill] sm:$0xff] %v5996_v29  ;;  %v1433_v31 = vmin.f32 %v1432_v44, %v5992_v38  ;;  %v1475_v36 = vmin.f32 %v1474_v59, %v5996_v29  ;;  %v6010_v8 = vsub.f32 %v8813_v34, %v5577_v57  ;;  %v8822_v29 = vld [vmem:[#allocation42_spill] sm:$0xff] }
 0x1d6   : > { %v1906_v41 = vsel %vm1905_vm15, %v1904_v2, %v5802_v15  ;;  %v1413_v22 = vmin.f32 %v1412_v28, %v6003_v4  ;;  %v6016_v50 = vsub.f32 %v8813_v34, %v5579_v52  ;;  %v6020_v32 = vsub.f32 %v8813_v34, %v8815_v25  ;;  %v8818_v2 = vld [vmem:[#allocation34_spill] sm:$0xff] }
 0x1d7   : > { %v1907_v37 = vrot.slane %v1906_v41, 4  ;;  %v1455_v44 = vmin.f32 %v1454_v9, %v6010_v8  ;;  %v6025_v59 = vsub.f32 %v8817_v56, %v5618_v19  ;;  %v6029_v57 = vsub.f32 %v8817_v56, %v5628_v0  ;;  %v8820_v34 = vld [vmem:[#allocation38_spill] sm:$0xff]  ;;  %v8823_v0 = vld [vmem:[#allocation56_spill] sm:$0xff] }
 0x1d8   : > { %8814 = vst [vmem:[#allocation91_spill] sm:$0xff] %v6016_v50  ;;  %8816 = vst [vmem:[#allocation93_spill] sm:$0xff] %v6020_v32  ;;  %v1434_v15 = vmin.f32 %v1433_v31, %v6016_v50  ;;  %v1476_v52 = vmin.f32 %v1475_v36, %v6020_v32  ;;  %v6035_v28 = vsub.f32 %v8817_v56, %v8818_v2  ;;  %v8824_v2 = vld [vmem:[#allocation46_spill] sm:$0xff] }
 0x1d9   : > { %v6039_v25 = vsub.f32 %v8817_v56, %v8820_v34  ;;  %vm1908_vm10 = vcmp.lt.s32.totalorder %v1906_v41, %v1907_v37  ;;  %v1414_v19 = vmin.f32 %v1413_v22, %v6025_v59  ;;  %v1456_v9 = vmin.f32 %v1455_v44, %v6029_v57  ;;  %v8825_v38 = vld [vmem:[#allocation50_spill] sm:$0xff] }
 0x1da   : > { %8819 = vst [vmem:[#allocation94_spill] sm:$0xff] %v6035_v28  ;;  %v6045_v26 = vsub.f32 %v8823_v0, %v8822_v29  ;;  %v1909_v31 = vsel %vm1908_vm10, %v1906_v41, %v1907_v37  ;;  %v1435_v36 = vmin.f32 %v1434_v15, %v6035_v28  ;;  %v6051_v50 = vsub.f32 %v8823_v0, %v8824_v2  ;;  %v8827_v44 = vld [vmem:[#allocation54_spill] sm:$0xff]  ;;  %v8830_v15 = vld [vmem:[#allocation60_spill] sm:$0xff] }
 0x1db   : > { %8821 = vst [vmem:[#allocation21_spill] sm:$0xff] %v6039_v25  ;;  %v1477_v32 = vmin.f32 %v1476_v52, %v6039_v25  ;;  %v1910_v56 = vrot.slane %v1909_v31, 2  ;;  %v6056_v22 = vsub.f32 %v8823_v0, %v8825_v38  ;;  %v6060_v29 = vsub.f32 %v8823_v0, %v8827_v44  ;;  %v8829_v37 = vld [vmem:[#allocation58_spill] sm:$0xff]  ;;  %v8835_v44 = vld [vmem:[#allocation69_spill] sm:$0xff] }
 0x1dc   : > { %v1415_v34 = vmin.f32 %v1414_v19, %v6045_v26  ;;  %v1457_v41 = vmin.f32 %v1456_v9, %v6051_v50  ;;  %v6065_v52 = vsub.f32 %v8830_v15, %v8829_v37  ;;  %v8831_v25 = vld [vmem:[#allocation62_spill] sm:$0xff]  ;;  %v6079_v9 = vsub.f32 %v8830_v15, %v8835_v44 }
 0x1dd   : > { %8826 = vst [vmem:[#allocation95_spill] sm:$0xff] %v6056_v22  ;;  %8828 = vst [vmem:[#allocation96_spill] sm:$0xff] %v6060_v29  ;;  %v6069_v2 = vsub.f32 %v8830_v15, %v8831_v25  ;;  %v8833_v28 = vld [vmem:[#allocation66_spill] sm:$0xff]  ;;  %vm1911_vm6 = vcmp.lt.s32.totalorder %v1909_v31, %v1910_v56  ;;  %v1436_v38 = vmin.f32 %v1435_v36, %v6056_v22  ;;  %v8841_v22 = vld [vmem:[#allocation17_spill] sm:$0xff] }
 0x1de   : > { %v6073_v19 = vsub.f32 %v8830_v15, %v8833_v28  ;;  %v1478_v0 = vmin.f32 %v1477_v32, %v6060_v29  ;;  %8836 = vst [vmem:[#allocation24_spill] sm:$0xff] %v6079_v9  ;;  %v1912_v61 = vsel %vm1911_vm6, %v1909_v31, %v1910_v56  ;;  %v1416_v37 = vmin.f32 %v1415_v34, %v6065_v52  ;;  %v8837_v25 = vld [vmem:[#allocation14_spill] sm:$0xff] }
 0x1df   : > { %8832 = vst [vmem:[#allocation97_spill] sm:$0xff] %v6069_v2  ;;  %v1458_v5 = vmin.f32 %v1457_v41, %v6069_v2  ;;  %v6085_v39 = vsub.f32 %v8838_v40, %v8837_v25  ;;  %v1913_v28 = vrot.slane %v1912_v61, 1  ;;  %v6091_v32 = vsub.f32 %v8838_v40, %v5702_v7 }
 0x1e0   : > { %8834 = vst [vmem:[#allocation98_spill] sm:$0xff] %v6073_v19  ;;  %v1437_v11 = vmin.f32 %v1436_v38, %v6073_v19  ;;  %v1479_v36 = vmin.f32 %v1478_v0, %v6079_v9  ;;  %vm2072_vm14 = vcmp.eq.s32.totalorder %v5044_v62, %v5706_v1  ;;  %vm2073_vm5 = vcmp.eq.s32.totalorder %v5044_v62, %v5932_v35 }
 0x1e1   : > { %8839 = vst [vmem:[#allocation99_spill] sm:$0xff] %v6091_v32  ;;  %v1417_v15 = vmin.f32 %v1416_v37, %v6085_v39  ;;  %vm2080_vm7 = vcmp.eq.s32.totalorder %v5065_v23, %v5706_v1  ;;  %vm1914_vm12 = vcmp.lt.s32.totalorder %v1912_v61, %v1913_v28  ;;  %v1459_v31 = vmin.f32 %v1458_v5, %v6091_v32 }
 0x1e2   : > { %vm2081_vm13 = vcmp.eq.s32.totalorder %v5065_v23, %v5932_v35  ;;  %v8840_v56 = vmov 0.0   ;;  %v6107_v34 = vsel %vm1914_vm12, %v1912_v61, %v1913_v28  ;;  %v8543_v25 = vmov 1.0|1.0   ;;  %vm3819_vm4 = vmpackc.low %vm2080_vm7, %vm2072_vm14 }
 0x1e3   : > { %v3517_v7 = vsel %vm2072_vm14, 1.0, %v8840_v56  ;;  %v1418_v41 = vrot.slane %v1417_v15, 4  ;;  %v3518_v38 = vsel %vm2073_vm5, 1.0, %v8840_v56  ;;  %v3525_v0 = vsel %vm2080_vm7, 1.0, %v8840_v56  ;;  %vm3817_vm8 = vmpackc.low %vm2081_vm13, %vm2073_vm5 }
 0x1e4   : > { %v2845_v5 = vcombine.low %v5818_v43, %v6107_v34  ;;  %v1460_v44 = vrot.slane %v1459_v31, 4  ;;  %v3526_v37 = vsel %vm2081_vm13, 1.0, %v8840_v56  ;;  %3818 = vmatprep.subr.msk.bf16.mxu0 %vm3817_vm8, %v8543_v25  ;;  %v2998_v61 = vadd.f32 %v3518_v38, %v3517_v7 }
 0x1e5   : > { %v1419_v28 = vmin.f32 %v1417_v15, %v1418_v41  ;;  %v3007_v9 = vadd.f32 %v3526_v37, %v3525_v0  ;;  %vm2074_vm0 = vcmp.eq.s32.totalorder %v5044_v62, %v5818_v43  ;;  %vm2075_vm1 = vcmp.eq.s32.totalorder %v5044_v62, %v6107_v34  ;;  %3820 = vmatpush1.bf16.msk.msra.mxu0 %vm3819_vm4, %v8543_v25 }
 0x1e6   : > { %v2861_v29 = vrot.slane %v2845_v5, %v8802_v33  ;;  %v1461_v7 = vmin.f32 %v1459_v31, %v1460_v44  ;;  %vm2082_vm3 = vcmp.eq.s32.totalorder %v5065_v23, %v5818_v43  ;;  %vm2083_vm2 = vcmp.eq.s32.totalorder %v5065_v23, %v6107_v34 }
 0x1e7   : > { %v1420_v38 = vrot.slane %v1419_v28, 2  ;;  %v3519_v15 = vsel %vm2074_vm0, 1.0, %v8840_v56  ;;  %v3520_v41 = vsel %vm2075_vm1, 1.0, %v8840_v56  ;;  %vm3849_vm11 = vmpackc.low %vm2083_vm2, %vm2075_vm1  ;;  %v3527_v5 = vsel %vm2082_vm3, 1.0, %v8840_v56 }
 0x1e8   : > { %v2876_v31 = vcombine.low %v5953_v51, %v2861_v29  ;;  %v1462_v0 = vrot.slane %v1461_v7, 2  ;;  %3850 = vmatprep.subr.msk.bf16.mxu1 %vm3849_vm11, %v8543_v25  ;;  %v2999_v44 = vadd.f32 %v3519_v15, %v2998_v61  ;;  %vm3851_vm9 = vmpackc.low %vm2082_vm3, %vm2074_vm0  ;;  %v3008_v19 = vadd.f32 %v3527_v5, %v3007_v9  ;;  %v8847_v15 = vld [vmem:[#allocation81_spill] sm:$0xff] }
 0x1e9   : > { %v1421_v37 = vmin.f32 %v1419_v28, %v1420_v38  ;;  %v6150_v32 = vsub.f32 %v8838_v40, %v8841_v22  ;;  %v6154_v2 = vsub.f32 %v8838_v40, %v5715_v46  ;;  %3852 = vmatpush1.bf16.msk.msra.mxu1 %vm3851_vm9, %v8543_v25  ;;  %v3528_v29 = vsel %vm2083_vm2, 1.0, %v8840_v56  ;;  %v8846_v38 = vld [vmem:[#allocation77_spill] sm:$0xff] }
 0x1ea   : > { %v1463_v51 = vmin.f32 %v1461_v7, %v1462_v0  ;;  %v6161_v61 = vadd.f32 %v3520_v41, %v2999_v44  ;;  %vm2088_vm15 = vcmp.eq.s32.totalorder %v5072_v58, %v5706_v1  ;;  %v6165_v22 = vadd.f32 %v3528_v29, %v3008_v19  ;;  %v8848_v41 = vld [vmem:[#allocation85_spill] sm:$0xff] }
 0x1eb   : > { %8842 = vst [vmem:[#allocation100_spill] sm:$0xff] %v6154_v2  ;;  %v1422_v9 = vrot.slane %v1421_v37, 1  ;;  %v6168_v28 = vmin.f32 %v1437_v11, %v6150_v32  ;;  %v6171_v46 = vmin.f32 %v1479_v36, %v6154_v2  ;;  %vm2089_vm10 = vcmp.eq.s32.totalorder %v5072_v58, %v5932_v35 }
 0x1ec   : > { %8843 = vst [vmem:[#allocation25_spill] sm:$0xff] %v6161_v61  ;;  %8844 = vst [vmem:[#allocation29_spill] sm:$0xff] %v6165_v22  ;;  %vm2096_vm6 = vcmp.eq.s32.totalorder %v5075_v54, %v5706_v1  ;;  %vm2097_vm14 = vcmp.eq.s32.totalorder %v5075_v54, %v5932_v35  ;;  %v6188_v11 = vrot.slane %v2876_v31, %v8802_v33  ;;  %v1464_v19 = vrot.slane %v1463_v51, 1  ;;  %v8859_v22 = vld [vmem:[#allocation99_spill] sm:$0xff]  ;;  %v8860_v61 = vld [vmem:[#allocation73_spill] sm:$0xff] }
 0x1ed   : > { %v6179_v40 = vmin.f32 %v1421_v37, %v1422_v9  ;;  %vm3821_vm5 = vmpackc.low %vm2097_vm14, %vm2089_vm10  ;;  %v6238_v0 = vsel %vm2088_vm15, 1.0, %v8840_v56  ;;  %v6244_v5 = vsel %vm2089_vm10, 1.0, %v8840_v56  ;;  %v6250_v44 = vsel %vm2096_vm6, 1.0, %v8840_v56  ;;  %v8861_v33 = vld [vmem:[#allocation74_spill] sm:$0xff]  ;;  %v8862_v35 = vld [vmem:[#allocation75_spill] sm:$0xff] }
 0x1ee   : > { %8845 = vst [vmem:[#allocation28_spill] sm:$0xff] %v6188_v11  ;;  %3822 = vmatprep.subr.msk.bf16.mxu0 %vm3821_vm5, %v8543_v25  ;;  %vm3823_vm7 = vmpackc.low %vm2096_vm6, %vm2088_vm15  ;;  %v6232_v31 = vmin.f32 %v1463_v51, %v1464_v19  ;;  %v3542_v9 = vsel %vm2097_vm14, 1.0, %v8840_v56 }
 0x1ef   : > { %vm1508_vm12 = vcmp.eq.f32.partialorder %v8846_v38, %v6179_v40  ;;  %vm1516_vm13 = vcmp.eq.f32.partialorder %v8847_v15, %v6179_v40  ;;  %vm1524_vm8 = vcmp.eq.f32.partialorder %v8848_v41, %v6179_v40  ;;  %vm1532_vm4 = vcmp.eq.f32.partialorder %v5807_v18, %v6179_v40  ;;  %3824 = vmatpush1.bf16.msk.msra.mxu0 %vm3823_vm7, %v8543_v25  ;;  %v8855_v25 = vld [vmem:[#allocation86_spill] sm:$0xff] }
 0x1f0   : > { %vm1540_vm0 = vcmp.eq.f32.partialorder %v5835_v16, %v6179_v40  ;;  %vm1580_vm9 = vcmp.eq.f32.partialorder %v5958_v55, %v6179_v40  ;;  %vm1588_vm5 = vcmp.eq.f32.partialorder %v5982_v49, %v6179_v40  ;;  %vm1596_vm7 = vcmp.eq.f32.partialorder %v6003_v4, %v6179_v40  ;;  %v8856_v55 = vld [vmem:[#allocation97_spill] sm:$0xff] }
 0x1f1   : > { %vm1604_vm1 = vcmp.eq.f32.partialorder %v6025_v59, %v6179_v40  ;;  %vm1612_vm3 = vcmp.eq.f32.partialorder %v6045_v26, %v6179_v40  ;;  %vm1620_vm2 = vcmp.eq.f32.partialorder %v6065_v52, %v6179_v40  ;;  %vm1628_vm11 = vcmp.eq.f32.partialorder %v6085_v39, %v6179_v40 }
 0x1f2   : > { %v1636_v37 = vsel %vm1508_vm12, %v5044_v62, 128  ;;  %v1644_v51 = vsel %vm1516_vm13, %v5065_v23, 128  ;;  %v1652_v29 = vsel %vm1524_vm8, %v5072_v58, 128  ;;  %v1660_v19 = vsel %vm1532_vm4, %v5075_v54, 128 }
 0x1f3   : > { %v1668_v38 = vsel %vm1540_vm0, %v5080_v17, 128  ;;  %vm8849_vm15 = vcmp.eq.f32.partialorder %v5859_v47, %v6179_v40  ;;  %vm8850_vm10 = vcmp.eq.f32.partialorder %v5883_v20, %v6179_v40  ;;  %vm8851_vm6 = vcmp.eq.f32.partialorder %v5902_v42, %v6179_v40  ;;  %v8853_v42 = vld [vmem:[#allocation78_spill] sm:$0xff] }
 0x1f4   : > { %v1676_v15 = vsel %vm8849_vm15, %v5083_v13, 128  ;;  %v1684_v41 = vsel %vm8850_vm10, %v5090_v14, 128  ;;  %v1692_v18 = vsel %vm8851_vm6, %v5093_v48, 128  ;;  %vm8852_vm14 = vcmp.eq.f32.partialorder %v5926_v30, %v6179_v40  ;;  %v8854_v30 = vld [vmem:[#allocation82_spill] sm:$0xff] }
 0x1f5   : > { %v6292_v16 = vsel %vm8852_vm14, %v5096_v45, 128  ;;  %v6298_v47 = vsel %vm1580_vm9, %v5106_v12, 128  ;;  %v6304_v20 = vsel %vm1588_vm5, %v5109_v53, 128  ;;  %vm1916_vm12 = vcmp.lt.s32.totalorder %v1636_v37, %v1644_v51 }
 0x1f6   : > { %vm1510_vm13 = vcmp.eq.f32.partialorder %v8853_v42, %v6232_v31  ;;  %vm1518_vm8 = vcmp.eq.f32.partialorder %v8854_v30, %v6232_v31  ;;  %vm1526_vm4 = vcmp.eq.f32.partialorder %v8855_v25, %v6232_v31  ;;  %v1917_v7 = vsel %vm1916_vm12, %v1636_v37, %v1644_v51  ;;  %v8858_v51 = vld [vmem:[#allocation72_spill] sm:$0xff] }
 0x1f7   : > { %vm1918_vm15 = vcmp.lt.s32.totalorder %v1917_v7, %v1652_v29  ;;  %vm1582_vm12 = vcmp.eq.f32.partialorder %v5962_v3, %v6232_v31  ;;  %vm1590_vm9 = vcmp.eq.f32.partialorder %v5986_v6, %v6232_v31  ;;  %vm1598_vm5 = vcmp.eq.f32.partialorder %v6010_v8, %v6232_v31 }
 0x1f8   : > { %v1919_v49 = vsel %vm1918_vm15, %v1917_v7, %v1652_v29  ;;  %vm1606_vm10 = vcmp.eq.f32.partialorder %v6029_v57, %v6232_v31  ;;  %vm1614_vm6 = vcmp.eq.f32.partialorder %v6051_v50, %v6232_v31  ;;  %vm1622_vm14 = vcmp.eq.f32.partialorder %v8856_v55, %v6232_v31  ;;  %v8857_v7 = vld [vmem:[#allocation71_spill] sm:$0xff] }
 0x1f9   : > { %vm1920_vm0 = vcmp.lt.s32.totalorder %v1919_v49, %v1660_v19  ;;  %v6340_v37 = vsel %vm1596_vm7, %v8857_v7, 128  ;;  %v6346_v29 = vsel %vm1604_vm1, %v8858_v51, 128  ;;  %vm1630_vm15 = vcmp.eq.f32.partialorder %v8859_v22, %v6232_v31  ;;  %v8875_v22 = vld [vmem:[#allocation23_spill] sm:$0xff] }
 0x1fa   : > { %v1921_v36 = vsel %vm1920_vm0, %v1919_v49, %v1660_v19  ;;  %v6354_v11 = vsel %vm1612_vm3, %v8860_v61, 128  ;;  %v6360_v4 = vsel %vm1620_vm2, %v8861_v33, 128  ;;  %v6366_v59 = vsel %vm1628_vm11, %v8862_v35, 128 }
 0x1fb   : > { %vm1922_vm1 = vcmp.lt.s32.totalorder %v1921_v36, %v1668_v38  ;;  %v1638_v26 = vsel %vm1510_vm13, %v5044_v62, 128  ;;  %v1646_v52 = vsel %vm1518_vm8, %v5065_v23, 128  ;;  %v1654_v49 = vsel %vm1526_vm4, %v5072_v58, 128 }
 0x1fc   : > { %v1923_v19 = vsel %vm1922_vm1, %v1921_v36, %v1668_v38  ;;  %vm8863_vm2 = vcmp.eq.f32.partialorder %v5811_v60, %v6232_v31  ;;  %vm8864_vm11 = vcmp.eq.f32.partialorder %v5840_v63, %v6232_v31  ;;  %vm8865_vm7 = vcmp.eq.f32.partialorder %v5863_v10, %v6232_v31 }
 0x1fd   : > { %vm1924_vm3 = vcmp.lt.s32.totalorder %v1923_v19, %v1676_v15  ;;  %v1662_v39 = vsel %vm8863_vm2, %v5075_v54, 128  ;;  %v1670_v40 = vsel %vm8864_vm11, %v5080_v17, 128  ;;  %v1678_v36 = vsel %vm8865_vm7, %v5083_v13, 128 }
 0x1fe   : > { %v1925_v38 = vsel %vm1924_vm3, %v1923_v19, %v1676_v15  ;;  %vm8866_vm13 = vcmp.eq.f32.partialorder %v5888_v21, %v6232_v31  ;;  %vm8867_vm8 = vcmp.eq.f32.partialorder %v5913_v24, %v6232_v31  ;;  %vm8868_vm4 = vcmp.eq.f32.partialorder %v5930_v27, %v6232_v31 }
 0x1ff   : > { %v1686_v25 = vsel %vm8866_vm13, %v5090_v14, 128  ;;  %v1694_v60 = vsel %vm8867_vm8, %v5093_v48, 128  ;;  %v6404_v63 = vsel %vm8868_vm4, %v5096_v45, 128  ;;  %vm1926_vm0 = vcmp.lt.s32.totalorder %v1925_v38, %v1684_v41 }
 0x200   : > { %v6410_v10 = vsel %vm1582_vm12, %v5106_v12, 128  ;;  %v6416_v21 = vsel %vm1590_vm9, %v5109_v53, 128  ;;  %vm1994_vm1 = vcmp.lt.s32.totalorder %v1638_v26, %v1646_v52  ;;  %v1927_v24 = vsel %vm1926_vm0, %v1925_v38, %v1684_v41 }
 0x201   : > { %v1995_v15 = vsel %vm1994_vm1, %v1638_v26, %v1646_v52  ;;  %v8869_v27 = vrot.slane %v6168_v28, 4  ;;  %v8870_v30 = vrot.slane %v6171_v46, 4  ;;  %vm1928_vm3 = vcmp.lt.s32.totalorder %v1927_v24, %v1692_v18 }
 0x202   : > { %vm1996_vm12 = vcmp.lt.s32.totalorder %v1995_v15, %v1654_v49  ;;  %v6426_v3 = vadd.f32 %v6244_v5, %v6238_v0  ;;  %v6429_v6 = vadd.f32 %v3542_v9, %v6250_v44  ;;  %v1929_v1 = vsel %vm1928_vm3, %v1927_v24, %v1692_v18  ;;  %v8873_v24 = vld [vmem:[#allocation83_spill] sm:$0xff] }
 0x203   : > { %v1440_v42 = vmin.f32 %v6168_v28, %v8869_v27  ;;  %v1482_v19 = vmin.f32 %v6171_v46, %v8870_v30  ;;  %v1997_v41 = vsel %vm1996_vm12, %v1995_v15, %v1654_v49  ;;  %vm1930_vm9 = vcmp.lt.s32.totalorder %v1929_v1, %v6292_v16  ;;  %v8874_v15 = vld [vmem:[#allocation87_spill] sm:$0xff] }
 0x204   : > { %vm1998_vm2 = vcmp.lt.s32.totalorder %v1997_v41, %v1662_v39  ;;  %vm2090_vm11 = vcmp.eq.s32.totalorder %v5072_v58, %v5818_v43  ;;  %vm2091_vm7 = vcmp.eq.s32.totalorder %v5072_v58, %v6107_v34  ;;  %v1931_v28 = vsel %vm1930_vm9, %v1929_v1, %v6292_v16  ;;  %v8879_v30 = vld [vmem:[#allocation55_spill] sm:$0xff] }
 0x205   : > { %v1441_v26 = vrot.slane %v1440_v42, 2  ;;  %v1483_v52 = vrot.slane %v1482_v19, 2  ;;  %v1999_v46 = vsel %vm1998_vm2, %v1997_v41, %v1662_v39  ;;  %vm1932_vm13 = vcmp.lt.s32.totalorder %v1931_v28, %v6298_v47  ;;  %v8881_v41 = vld [vmem:[#allocation19_spill] sm:$0xff] }
 0x206   : > { %vm2000_vm8 = vcmp.lt.s32.totalorder %v1999_v46, %v1670_v40  ;;  %vm2098_vm4 = vcmp.eq.s32.totalorder %v5075_v54, %v5818_v43  ;;  %vm2099_vm0 = vcmp.eq.s32.totalorder %v5075_v54, %v6107_v34  ;;  %v1933_v44 = vsel %vm1932_vm13, %v1931_v28, %v6298_v47  ;;  %v8884_v28 = vld [vmem:[#allocation94_spill] sm:$0xff] }
 0x207   : > { %v1442_v0 = vmin.f32 %v1440_v42, %v1441_v26  ;;  %v6437_v5 = vmin.f32 %v1482_v19, %v1483_v52  ;;  %v1726_v1 = vsel %vm1598_vm5, %v8857_v7, 128  ;;  %v2001_v9 = vsel %vm2000_vm8, %v1999_v46, %v1670_v40  ;;  %vm3853_vm1 = vmpackc.low %vm2099_vm0, %vm2091_vm7  ;;  %v8878_v42 = vld [vmem:[#allocation47_spill] sm:$0xff]  ;;  %v8882_v26 = vld [vmem:[#allocation88_spill] sm:$0xff] }
 0x208   : > { %vm1934_vm3 = vcmp.lt.s32.totalorder %v1933_v44, %v6304_v20  ;;  %v6460_v16 = vsel %vm1606_vm10, %v8858_v51, 128  ;;  %v6466_v8 = vsel %vm1614_vm6, %v8860_v61, 128  ;;  %vm2002_vm5 = vcmp.lt.s32.totalorder %v2001_v9, %v1678_v36  ;;  %vm3855_vm12 = vmpackc.low %vm2098_vm4, %vm2090_vm11  ;;  %v8883_v52 = vld [vmem:[#allocation91_spill] sm:$0xff] }
 0x209   : > { %v1443_v18 = vrot.slane %v1442_v0, 1  ;;  %v8871_v47 = vmov 1.0|1.0   ;;  %v1935_v57 = vsel %vm1934_vm3, %v1933_v44, %v6304_v20  ;;  %v6480_v49 = vsel %vm1622_vm14, %v8861_v33, 128  ;;  %v8885_v46 = vld [vmem:[#allocation95_spill] sm:$0xff] }
 0x20a   : > { %3854 = vmatprep.subr.msk.bf16.mxu1 %vm3853_vm1, %v8871_v47  ;;  %v2003_v50 = vsel %vm2002_vm5, %v2001_v9, %v1678_v36  ;;  %vm1936_vm10 = vcmp.lt.s32.totalorder %v1935_v57, %v6340_v37  ;;  %v6490_v40 = vsel %vm1630_vm15, %v8862_v35, 128  ;;  %v1485_v20 = vrot.slane %v6437_v5, 1  ;;  %v8872_v36 = vld [vmem:[#allocation79_spill] sm:$0xff] }
 0x20b   : > { %v6482_v39 = vmin.f32 %v1442_v0, %v1443_v18  ;;  %3856 = vmatpush1.bf16.msk.msra.mxu1 %vm3855_vm12, %v8871_v47  ;;  %vm2004_vm6 = vcmp.lt.s32.totalorder %v2003_v50, %v1686_v25  ;;  %v1937_v55 = vsel %vm1936_vm10, %v1935_v57, %v6340_v37  ;;  %v8876_v37 = vld [vmem:[#allocation31_spill] sm:$0xff]  ;;  %v8886_v0 = vld [vmem:[#allocation98_spill] sm:$0xff]  ;;  %v6544_v44 = vsel %vm2090_vm11, 1.0, %v8840_v56 }
 0x20c   : > { %v2005_v38 = vsel %vm2004_vm6, %v2003_v50, %v1686_v25  ;;  %vm1938_vm2 = vcmp.lt.s32.totalorder %v1937_v55, %v6346_v29  ;;  %v8877_v25 = vld [vmem:[#allocation39_spill] sm:$0xff]  ;;  %v6550_v9 = vsel %vm2091_vm7, 1.0, %v8840_v56  ;;  %v6553_v57 = vmin.f32 %v6437_v5, %v1485_v20 }
 0x20d   : > { %vm1509_vm14 = vcmp.eq.f32.partialorder %v8872_v36, %v6482_v39  ;;  %vm1517_vm9 = vcmp.eq.f32.partialorder %v8873_v24, %v6482_v39  ;;  %vm2006_vm13 = vcmp.lt.s32.totalorder %v2005_v38, %v1694_v60  ;;  %vm1525_vm8 = vcmp.eq.f32.partialorder %v8874_v15, %v6482_v39 }
 0x20e   : > { %vm1533_vm15 = vcmp.eq.f32.partialorder %v8875_v22, %v6482_v39  ;;  %v1939_v31 = vsel %vm1938_vm2, %v1937_v55, %v6346_v29  ;;  %v2007_v27 = vsel %vm2006_vm13, %v2005_v38, %v1694_v60  ;;  %v8880_v60 = vld [vmem:[#allocation67_spill] sm:$0xff]  ;;  %vm1621_vm10 = vcmp.eq.f32.partialorder %v8886_v0, %v6482_v39 }
 0x20f   : > { %vm1940_vm5 = vcmp.lt.s32.totalorder %v1939_v31, %v6354_v11  ;;  %vm2008_vm12 = vcmp.lt.s32.totalorder %v2007_v27, %v6404_v63  ;;  %vm1629_vm6 = vcmp.eq.f32.partialorder %v6150_v32, %v6482_v39  ;;  %v1637_v50 = vsel %vm1509_vm14, %v5044_v62, 128 }
 0x210   : > { %v1941_v19 = vsel %vm1940_vm5, %v1939_v31, %v6354_v11  ;;  %v2009_v29 = vsel %vm2008_vm12, %v2007_v27, %v6404_v63  ;;  %vm1605_vm5 = vcmp.eq.f32.partialorder %v8884_v28, %v6482_v39  ;;  %vm1613_vm12 = vcmp.eq.f32.partialorder %v8885_v46, %v6482_v39 }
 0x211   : > { %vm1942_vm3 = vcmp.lt.s32.totalorder %v1941_v19, %v6360_v4  ;;  %vm2010_vm1 = vcmp.lt.s32.totalorder %v2009_v29, %v6410_v10  ;;  %v1645_v55 = vsel %vm1517_vm9, %v5065_v23, 128  ;;  %v6573_v5 = vsel %vm2099_vm0, 1.0, %v8840_v56 }
 0x212   : > { %v1943_v11 = vsel %vm1942_vm3, %v1941_v19, %v6360_v4  ;;  %v2011_v63 = vsel %vm2010_vm1, %v2009_v29, %v6410_v10  ;;  %v1661_v20 = vsel %vm1533_vm15, %v5075_v54, 128  ;;  %vm8888_vm0 = vcmp.eq.f32.partialorder %v8877_v25, %v6482_v39 }
 0x213   : > { %vm1944_vm13 = vcmp.lt.s32.totalorder %v1943_v11, %v6366_v59  ;;  %vm2012_vm2 = vcmp.lt.s32.totalorder %v2011_v63, %v6416_v21  ;;  %v1677_v31 = vsel %vm8888_vm0, %v5083_v13, 128  ;;  %vm8889_vm9 = vcmp.eq.f32.partialorder %v8878_v42, %v6482_v39 }
 0x214   : > { %v1945_v4 = vsel %vm1944_vm13, %v1943_v11, %v6366_v59  ;;  %v2013_v10 = vsel %vm2012_vm2, %v2011_v63, %v6416_v21  ;;  %v6559_v59 = vsel %vm2098_vm4, 1.0, %v8840_v56  ;;  %vm8887_vm4 = vcmp.eq.f32.partialorder %v8876_v37, %v6482_v39 }
 0x215   : > { %v1946_v18 = vrot.slane %v1945_v4, 4  ;;  %vm2014_vm1 = vcmp.lt.s32.totalorder %v2013_v10, %v1726_v1  ;;  %v1669_v24 = vsel %vm8887_vm4, %v5080_v17, 128  ;;  %v1685_v22 = vsel %vm8889_vm9, %v5090_v14, 128 }
 0x216   : > { %v2015_v21 = vsel %vm2014_vm1, %v2013_v10, %v1726_v1  ;;  %v1653_v1 = vsel %vm1525_vm8, %v5072_v58, 128  ;;  %vm8890_vm8 = vcmp.eq.f32.partialorder %v8879_v30, %v6482_v39  ;;  %vm8891_vm15 = vcmp.eq.f32.partialorder %v8880_v60, %v6482_v39  ;;  %v8895_v60 = vld [vmem:[#allocation84_spill] sm:$0xff]  ;;  %v8898_v10 = vld [vmem:[#allocation35_spill] sm:$0xff] }
 0x217   : > { %vm1947_vm11 = vcmp.lt.s32.totalorder %v1945_v4, %v1946_v18  ;;  %vm2016_vm7 = vcmp.lt.s32.totalorder %v2015_v21, %v6460_v16  ;;  %v6607_v37 = vsel %vm8891_vm15, %v5096_v45, 128  ;;  %vm8892_vm3 = vcmp.eq.f32.partialorder %v8881_v41, %v6482_v39 }
 0x218   : > { %v1948_v38 = vsel %vm1947_vm11, %v1945_v4, %v1946_v18  ;;  %v2017_v36 = vsel %vm2016_vm7, %v2015_v21, %v6460_v16  ;;  %v1693_v16 = vsel %vm8890_vm8, %v5093_v48, 128  ;;  %v6613_v25 = vsel %vm8892_vm3, %v5106_v12, 128  ;;  %v8897_v4 = vld [vmem:[#allocation27_spill] sm:$0xff] }
 0x219   : > { %v1949_v15 = vrot.slane %v1948_v38, 2  ;;  %vm2018_vm14 = vcmp.lt.s32.totalorder %v2017_v36, %v6466_v8  ;;  %vm8893_vm2 = vcmp.eq.f32.partialorder %v8882_v26, %v6482_v39  ;;  %vm1955_vm11 = vcmp.lt.s32.totalorder %v1637_v50, %v1645_v55  ;;  %v8896_v26 = vld [vmem:[#allocation89_spill] sm:$0xff]  ;;  %v8900_v21 = vld [vmem:[#allocation43_spill] sm:$0xff] }
 0x21a   : > { %v2019_v27 = vsel %vm2018_vm14, %v2017_v36, %v6466_v8  ;;  %v6619_v42 = vsel %vm8893_vm2, %v5109_v53, 128  ;;  %v8894_v8 = vld [vmem:[#allocation80_spill] sm:$0xff]  ;;  %v1956_v29 = vsel %vm1955_vm11, %v1637_v50, %v1645_v55  ;;  %vm1519_vm4 = vcmp.eq.f32.partialorder %v8895_v60, %v6553_v57  ;;  %v8903_v55 = vld [vmem:[#allocation51_spill] sm:$0xff] }
 0x21b   : > { %vm1950_vm13 = vcmp.lt.s32.totalorder %v1948_v38, %v1949_v15  ;;  %vm2020_vm1 = vcmp.lt.s32.totalorder %v2019_v27, %v6480_v49  ;;  %vm1511_vm7 = vcmp.eq.f32.partialorder %v8894_v8, %v6553_v57  ;;  %vm1957_vm14 = vcmp.lt.s32.totalorder %v1956_v29, %v1653_v1 }
 0x21c   : > { %v1951_v30 = vsel %vm1950_vm13, %v1948_v38, %v1949_v15  ;;  %v2021_v19 = vsel %vm2020_vm1, %v2019_v27, %v6480_v49  ;;  %v1958_v63 = vsel %vm1957_vm14, %v1956_v29, %v1653_v1  ;;  %vm8899_vm3 = vcmp.eq.f32.partialorder %v8883_v52, %v6482_v39  ;;  %v8904_v1 = vld [vmem:[#allocation59_spill] sm:$0xff]  ;;  %v8905_v52 = vld [vmem:[#allocation70_spill] sm:$0xff]  ;;  %v8906_v38 = vld [vmem:[#allocation92_spill] sm:$0xff] }
 0x21d   : > { %v1952_v41 = vrot.slane %v1951_v30, 1  ;;  %vm2022_vm0 = vcmp.lt.s32.totalorder %v2021_v19, %v6490_v40  ;;  %v6639_v18 = vsel %vm8899_vm3, %v8857_v7, 128  ;;  %vm1959_vm2 = vcmp.lt.s32.totalorder %v1958_v63, %v1661_v20  ;;  %v8907_v27 = vld [vmem:[#allocation90_spill] sm:$0xff]  ;;  %v8909_v29 = vld [vmem:[#allocation21_spill] sm:$0xff] }
 0x21e   : > { %v2023_v11 = vsel %vm2022_vm0, %v2021_v19, %v6490_v40  ;;  %v1960_v50 = vsel %vm1959_vm2, %v1958_v63, %v1661_v20  ;;  %vm1575_vm3 = vcmp.eq.f32.partialorder %v8905_v52, %v6553_v57  ;;  %vm1583_vm8 = vcmp.eq.f32.partialorder %v8906_v38, %v6553_v57  ;;  %v8908_v20 = vld [vmem:[#allocation93_spill] sm:$0xff]  ;;  %v8910_v63 = vld [vmem:[#allocation96_spill] sm:$0xff] }
 0x21f   : > { %v2024_v49 = vrot.slane %v2023_v11, 4  ;;  %vm6643_vm1 = vcmp.lt.s32.totalorder %v1951_v30, %v1952_v41  ;;  %vm1961_vm15 = vcmp.lt.s32.totalorder %v1960_v50, %v1669_v24  ;;  %vm1591_vm13 = vcmp.eq.f32.partialorder %v8907_v27, %v6553_v57  ;;  %v8922_v27 = vld [vmem:[#allocation63_spill] sm:$0xff] }
 0x220   : > { %v1962_v15 = vsel %vm1961_vm15, %v1960_v50, %v1669_v24  ;;  %vm1607_vm0 = vcmp.eq.f32.partialorder %v8909_v29, %v6553_v57  ;;  %vm1615_vm9 = vcmp.eq.f32.partialorder %v8910_v63, %v6553_v57  ;;  %v6675_v50 = vsel %vm1613_vm12, %v8860_v61, 128 }
 0x221   : > { %vm2025_vm14 = vcmp.lt.s32.totalorder %v2023_v11, %v2024_v49  ;;  %vm1963_vm11 = vcmp.lt.s32.totalorder %v1962_v15, %v1677_v31  ;;  %v6681_v28 = vsel %vm1621_vm10, %v8861_v33, 128  ;;  %v1639_v0 = vsel %vm1511_vm7, %v5044_v62, 128 }
 0x222   : > { %v2026_v36 = vsel %vm2025_vm14, %v2023_v11, %v2024_v49  ;;  %v1733_v11 = vsel %vm1605_vm5, %v8858_v51, 128  ;;  %v1964_v24 = vsel %vm1963_vm11, %v1962_v15, %v1677_v31  ;;  %v8911_v49 = vld [vmem:[#allocation24_spill] sm:$0xff]  ;;  %vm1631_vm14 = vcmp.eq.f32.partialorder %v6154_v2, %v6553_v57 }
 0x223   : > { %v2027_v19 = vrot.slane %v2026_v36, 2  ;;  %vm1623_vm15 = vcmp.eq.f32.partialorder %v8911_v49, %v6553_v57  ;;  %vm1965_vm5 = vcmp.lt.s32.totalorder %v1964_v24, %v1685_v22  ;;  %v6685_v31 = vsel %vm6643_vm1, %v1951_v30, %v1952_v41 }
 0x224   : > { %v6691_v2 = vsel %vm1629_vm6, %v8862_v35, 128  ;;  %v1966_v46 = vsel %vm1965_vm5, %v1964_v24, %v1685_v22  ;;  %v1647_v30 = vsel %vm1519_vm4, %v5065_v23, 128  ;;  %vm8912_vm10 = vcmp.eq.f32.partialorder %v8896_v26, %v6553_v57 }
 0x225   : > { %vm2028_vm2 = vcmp.lt.s32.totalorder %v2026_v36, %v2027_v19  ;;  %vm1967_vm12 = vcmp.lt.s32.totalorder %v1966_v46, %v1693_v16  ;;  %v1655_v32 = vsel %vm8912_vm10, %v5072_v58, 128  ;;  %vm8913_vm6 = vcmp.eq.f32.partialorder %v8897_v4, %v6553_v57 }
 0x226   : > { %v2029_v15 = vsel %vm2028_vm2, %v2026_v36, %v2027_v19  ;;  %v1968_v41 = vsel %vm1967_vm12, %v1966_v46, %v1693_v16  ;;  %v1663_v39 = vsel %vm8913_vm6, %v5075_v54, 128  ;;  %vm8914_vm7 = vcmp.eq.f32.partialorder %v8898_v10, %v6553_v57  ;;  %v8921_v36 = vld [vmem:[#allocation20_spill] sm:$0xff] }
 0x227   : > { %v2030_v49 = vrot.slane %v2029_v15, 1  ;;  %v1671_v22 = vsel %vm8914_vm7, %v5080_v17, 128  ;;  %vm1969_vm1 = vcmp.lt.s32.totalorder %v1968_v41, %v6607_v37  ;;  %vm8915_vm4 = vcmp.eq.f32.partialorder %v8900_v21, %v6553_v57 }
 0x228   : > { %v1679_v16 = vsel %vm8915_vm4, %v5083_v13, 128  ;;  %vm8916_vm11 = vcmp.eq.f32.partialorder %v8903_v55, %v6553_v57  ;;  %vm8917_vm2 = vcmp.eq.f32.partialorder %v8904_v1, %v6553_v57  ;;  %v1970_v4 = vsel %vm1969_vm1, %v1968_v41, %v6607_v37 }
 0x229   : > { %v1687_v8 = vsel %vm8916_vm11, %v5090_v14, 128  ;;  %v6726_v60 = vsel %vm8917_vm2, %v5093_v48, 128  ;;  %vm6728_vm5 = vcmp.lt.s32.totalorder %v2029_v15, %v2030_v49  ;;  %v6737_v10 = vsel %vm1575_vm3, %v5096_v45, 128 }
 0x22a   : > { %v6743_v21 = vsel %vm1583_vm8, %v5106_v12, 128  ;;  %vm1971_vm12 = vcmp.lt.s32.totalorder %v1970_v4, %v6613_v25  ;;  %v6750_v40 = vsel %vm1591_vm13, %v5109_v53, 128  ;;  %vm8920_vm10 = vcmp.eq.f32.partialorder %v8908_v20, %v6553_v57 }
 0x22b   : > { %v6756_v37 = vsel %vm8920_vm10, %v8857_v7, 128  ;;  %vm2033_vm3 = vcmp.lt.s32.totalorder %v1639_v0, %v1647_v30  ;;  %v1972_v55 = vsel %vm1971_vm12, %v1970_v4, %v6613_v25  ;;  %v3017_v52 = vadd.f32 %v6544_v44, %v6426_v3 }
 0x22c   : > { %v2034_v1 = vsel %vm2033_vm3, %v1639_v0, %v1647_v30  ;;  %v3026_v38 = vadd.f32 %v6559_v59, %v6429_v6  ;;  %vm1973_vm8 = vcmp.lt.s32.totalorder %v1972_v55, %v6619_v42  ;;  %vm2104_vm6 = vcmp.eq.s32.totalorder %v5080_v17, %v8921_v36 }
 0x22d   : > { %vm2035_vm13 = vcmp.lt.s32.totalorder %v2034_v1, %v1655_v32  ;;  %vm2105_vm7 = vcmp.eq.s32.totalorder %v5080_v17, %v8922_v27  ;;  %v1974_v20 = vsel %vm1973_vm8, %v1972_v55, %v6619_v42  ;;  %v6770_v25 = vadd.f32 %v6550_v9, %v3017_v52 }
 0x22e   : > { %v2036_v19 = vsel %vm2035_vm13, %v2034_v1, %v1655_v32  ;;  %v6773_v3 = vadd.f32 %v6573_v5, %v3026_v38  ;;  %vm1975_vm1 = vcmp.lt.s32.totalorder %v1974_v20, %v6639_v18  ;;  %vm2112_vm11 = vcmp.eq.s32.totalorder %v5083_v13, %v8921_v36 }
 0x22f   : > { %vm2037_vm4 = vcmp.lt.s32.totalorder %v2036_v19, %v1663_v39  ;;  %vm2113_vm2 = vcmp.eq.s32.totalorder %v5083_v13, %v8922_v27  ;;  %v1976_v6 = vsel %vm1975_vm1, %v1974_v20, %v6639_v18  ;;  %v3549_v9 = vsel %vm2104_vm6, 1.0, %v8840_v56  ;;  %vm3827_vm8 = vmpackc.low %vm2112_vm11, %vm2104_vm6 }
 0x230   : > { %v2038_v44 = vsel %vm2037_vm4, %v2036_v19, %v1663_v39  ;;  %v3550_v59 = vsel %vm2105_vm7, 1.0, %v8840_v56  ;;  %vm3825_vm12 = vmpackc.low %vm2113_vm2, %vm2105_vm7  ;;  %v6791_v5 = vsel %vm6728_vm5, %v2029_v15, %v2030_v49  ;;  %vm1977_vm10 = vcmp.lt.s32.totalorder %v1976_v6, %v1733_v11 }
 0x231   : > { %v6797_v42 = vsel %vm1607_vm0, %v8858_v51, 128  ;;  %vm2039_vm3 = vcmp.lt.s32.totalorder %v2038_v44, %v1671_v22  ;;  %3826 = vmatprep.subr.msk.bf16.mxu0 %vm3825_vm12, %v8871_v47  ;;  %v1978_v18 = vsel %vm1977_vm10, %v1976_v6, %v1733_v11  ;;  %v6810_v24 = vsel %vm1615_vm9, %v8860_v61, 128 }
 0x232   : > { %v2040_v29 = vsel %vm2039_vm3, %v2038_v44, %v1671_v22  ;;  %v3034_v49 = vadd.f32 %v3550_v59, %v3549_v9  ;;  %3828 = vmatpush1.bf16.msk.msra.mxu0 %vm3827_vm8, %v8871_v47  ;;  %vm1979_vm0 = vcmp.lt.s32.totalorder %v1978_v18, %v6675_v50  ;;  %vm2106_vm13 = vcmp.eq.s32.totalorder %v5080_v17, %v5818_v43 }
 0x233   : > { %vm2041_vm5 = vcmp.lt.s32.totalorder %v2040_v29, %v1679_v16  ;;  %vm2107_vm6 = vcmp.eq.s32.totalorder %v5080_v17, %v6107_v34  ;;  %v1980_v11 = vsel %vm1979_vm0, %v1978_v18, %v6675_v50  ;;  %vm2114_vm9 = vcmp.eq.s32.totalorder %v5083_v13, %v5818_v43 }
 0x234   : > { %v2042_v15 = vsel %vm2041_vm5, %v2040_v29, %v1679_v16  ;;  %vm2115_vm7 = vcmp.eq.s32.totalorder %v5083_v13, %v6107_v34  ;;  %vm1981_vm1 = vcmp.lt.s32.totalorder %v1980_v11, %v6681_v28  ;;  %v6828_v46 = vsel %vm1623_vm15, %v8861_v33, 128  ;;  %vm3859_vm15 = vmpackc.low %vm2114_vm9, %vm2106_vm13 }
 0x235   : > { %vm2043_vm4 = vcmp.lt.s32.totalorder %v2042_v15, %v1687_v8  ;;  %v3557_v50 = vsel %vm2112_vm11, 1.0, %v8840_v56  ;;  %vm3857_vm12 = vmpackc.low %vm2115_vm7, %vm2107_vm6  ;;  %v1982_v0 = vsel %vm1981_vm1, %v1980_v11, %v6681_v28  ;;  %v3558_v41 = vsel %vm2113_vm2, 1.0, %v8840_v56 }
 0x236   : > { %v2044_v30 = vsel %vm2043_vm4, %v2042_v15, %v1687_v8  ;;  %v3551_v32 = vsel %vm2106_vm13, 1.0, %v8840_v56  ;;  %3858 = vmatprep.subr.msk.bf16.mxu1 %vm3857_vm12, %v8871_v47  ;;  %vm1983_vm11 = vcmp.lt.s32.totalorder %v1982_v0, %v6691_v2  ;;  %v3552_v28 = vsel %vm2107_vm6, 1.0, %v8840_v56 }
 0x237   : > { %vm2045_vm10 = vcmp.lt.s32.totalorder %v2044_v30, %v6726_v60  ;;  %v3035_v39 = vadd.f32 %v3551_v32, %v3034_v49  ;;  %3860 = vmatpush1.bf16.msk.msra.mxu1 %vm3859_vm15, %v8871_v47  ;;  %v1984_v22 = vsel %vm1983_vm11, %v1982_v0, %v6691_v2  ;;  %vm2120_vm2 = vcmp.eq.s32.totalorder %v5090_v14, %v8921_v36 }
 0x238   : > { %v2046_v16 = vsel %vm2045_vm10, %v2044_v30, %v6726_v60  ;;  %vm2121_vm3 = vcmp.eq.s32.totalorder %v5090_v14, %v8922_v27  ;;  %v1985_v8 = vrot.slane %v1984_v22, 4  ;;  %v6873_v4 = vsel %vm1631_vm14, %v8862_v35, 128 }
 0x239   : > { %vm2047_vm8 = vcmp.lt.s32.totalorder %v2046_v16, %v6737_v10  ;;  %v6876_v55 = vadd.f32 %v3552_v28, %v3035_v39  ;;  %vm2128_vm0 = vcmp.eq.s32.totalorder %v5093_v48, %v8921_v36  ;;  %vm2129_vm5 = vcmp.eq.s32.totalorder %v5093_v48, %v8922_v27 }
 0x23a   : > { %v2048_v2 = vsel %vm2047_vm8, %v2046_v16, %v6737_v10  ;;  %v3565_v60 = vsel %vm2120_vm2, 1.0, %v8840_v56  ;;  %vm1986_vm13 = vcmp.lt.s32.totalorder %v1984_v22, %v1985_v8  ;;  %v3043_v57 = vadd.f32 %v3558_v41, %v3557_v50  ;;  %vm3829_vm6 = vmpackc.low %vm2129_vm5, %vm2121_vm3 }
 0x23b   : > { %vm2049_vm14 = vcmp.lt.s32.totalorder %v2048_v2, %v6743_v21  ;;  %v3566_v1 = vsel %vm2121_vm3, 1.0, %v8840_v56  ;;  %v1987_v10 = vsel %vm1986_vm13, %v1984_v22, %v1985_v8  ;;  %v3559_v38 = vsel %vm2114_vm9, 1.0, %v8840_v56  ;;  %3830 = vmatprep.subr.msk.bf16.mxu0 %vm3829_vm6, %v8871_v47  ;;  %vm3831_vm1 = vmpackc.low %vm2128_vm0, %vm2120_vm2 }
 0x23c   : > { %v2050_v52 = vsel %vm2049_vm14, %v2048_v2, %v6743_v21  ;;  %v3052_v20 = vadd.f32 %v3566_v1, %v3565_v60  ;;  %v1988_v19 = vrot.slane %v1987_v10, 2  ;;  %v3560_v21 = vsel %vm2115_vm7, 1.0, %v8840_v56  ;;  %3832 = vmatpush1.bf16.msk.msra.mxu0 %vm3831_vm1, %v8871_v47 }
 0x23d   : > { %vm2051_vm4 = vcmp.lt.s32.totalorder %v2050_v52, %v6750_v40  ;;  %vm2122_vm9 = vcmp.eq.s32.totalorder %v5090_v14, %v5818_v43  ;;  %vm2123_vm12 = vcmp.eq.s32.totalorder %v5090_v14, %v6107_v34  ;;  %vm2130_vm15 = vcmp.eq.s32.totalorder %v5093_v48, %v5818_v43 }
 0x23e   : > { %v2052_v6 = vsel %vm2051_vm4, %v2050_v52, %v6750_v40  ;;  %vm2131_vm11 = vcmp.eq.s32.totalorder %v5093_v48, %v6107_v34  ;;  %vm1989_vm10 = vcmp.lt.s32.totalorder %v1987_v10, %v1988_v19  ;;  %v3044_v44 = vadd.f32 %v3559_v38, %v3043_v57  ;;  %vm3863_vm3 = vmpackc.low %vm2130_vm15, %vm2122_vm9 }
 0x23f   : > { %vm2053_vm2 = vcmp.lt.s32.totalorder %v2052_v6, %v6756_v37  ;;  %v3573_v9 = vsel %vm2128_vm0, 1.0, %v8840_v56  ;;  %vm3861_vm7 = vmpackc.low %vm2131_vm11, %vm2123_vm12  ;;  %v1990_v40 = vsel %vm1989_vm10, %v1987_v10, %v1988_v19  ;;  %v3574_v18 = vsel %vm2129_vm5, 1.0, %v8840_v56 }
 0x240   : > { %v2054_v59 = vsel %vm2053_vm2, %v2052_v6, %v6756_v37  ;;  %v3567_v29 = vsel %vm2122_vm9, 1.0, %v8840_v56  ;;  %3862 = vmatprep.subr.msk.bf16.mxu1 %vm3861_vm7, %v8871_v47  ;;  %v1991_v37 = vrot.slane %v1990_v40, 1  ;;  %v3568_v49 = vsel %vm2123_vm12, 1.0, %v8840_v56  ;;  %v8925_v6 = vld [vmem:[#allocation76_spill] sm:$0xff] }
 0x241   : > { %vm2055_vm8 = vcmp.lt.s32.totalorder %v2054_v59, %v6797_v42  ;;  %v3053_v11 = vadd.f32 %v3567_v29, %v3052_v20  ;;  %3864 = vmatpush1.bf16.msk.msra.mxu1 %vm3863_vm3, %v8871_v47  ;;  %vm2136_vm0 = vcmp.eq.s32.totalorder %v5096_v45, %v8921_v36  ;;  %vm2137_vm5 = vcmp.eq.s32.totalorder %v5096_v45, %v8922_v27 }
 0x242   : > { %v2056_v15 = vsel %vm2055_vm8, %v2054_v59, %v6797_v42  ;;  %vm2144_vm13 = vcmp.eq.s32.totalorder %v5106_v12, %v8921_v36  ;;  %vm1992_vm14 = vcmp.lt.s32.totalorder %v1990_v40, %v1991_v37  ;;  %v3061_v63 = vadd.f32 %v3574_v18, %v3573_v9 }
 0x243   : > { %vm2057_vm6 = vcmp.lt.s32.totalorder %v2056_v15, %v6810_v24  ;;  %v6960_v50 = vadd.f32 %v3568_v49, %v3053_v11  ;;  %v6962_v0 = vsel %vm1992_vm14, %v1990_v40, %v1991_v37  ;;  %vm2145_vm1 = vcmp.eq.s32.totalorder %v5106_v12, %v8922_v27  ;;  %vm3835_vm10 = vmpackc.low %vm2144_vm13, %vm2136_vm0 }
 0x244   : > { %v2058_v30 = vsel %vm2057_vm6, %v2056_v15, %v6810_v24  ;;  %v3581_v42 = vsel %vm2136_vm0, 1.0, %v8840_v56  ;;  %v2846_v41 = vcombine.low %v6685_v31, %v6962_v0  ;;  %v3582_v32 = vsel %vm2137_vm5, 1.0, %v8840_v56  ;;  %vm3833_vm9 = vmpackc.low %vm2145_vm1, %vm2137_vm5 }
 0x245   : > { %vm2059_vm4 = vcmp.lt.s32.totalorder %v2058_v30, %v6828_v46  ;;  %v3589_v24 = vsel %vm2144_vm13, 1.0, %v8840_v56  ;;  %v3590_v39 = vsel %vm2145_vm1, 1.0, %v8840_v56  ;;  %3834 = vmatprep.subr.msk.bf16.mxu0 %vm3833_vm9, %v8871_v47  ;;  %v3070_v22 = vadd.f32 %v3582_v32, %v3581_v42 }
 0x246   : > { %v2060_v28 = vsel %vm2059_vm4, %v2058_v30, %v6828_v46  ;;  %vm2138_vm12 = vcmp.eq.s32.totalorder %v5096_v45, %v5818_v43  ;;  %v6991_v16 = vadd.f32 %v3560_v21, %v3044_v44  ;;  %v3575_v46 = vsel %vm2130_vm15, 1.0, %v8840_v56  ;;  %3836 = vmatpush1.bf16.msk.msra.mxu0 %vm3835_vm10, %v8871_v47 }
 0x247   : > { %vm2061_vm2 = vcmp.lt.s32.totalorder %v2060_v28, %v6873_v4  ;;  %vm2139_vm7 = vcmp.eq.s32.totalorder %v5096_v45, %v6107_v34  ;;  %v3062_v26 = vadd.f32 %v3575_v46, %v3061_v63  ;;  %vm2146_vm3 = vcmp.eq.s32.totalorder %v5106_v12, %v5818_v43 }
 0x248   : > { %v2062_v8 = vsel %vm2061_vm2, %v2060_v28, %v6873_v4  ;;  %vm2147_vm8 = vcmp.eq.s32.totalorder %v5106_v12, %v6107_v34  ;;  %v3576_v60 = vsel %vm2131_vm11, 1.0, %v8840_v56  ;;  %v3079_v57 = vadd.f32 %v3590_v39, %v3589_v24  ;;  %vm3867_vm11 = vmpackc.low %vm2146_vm3, %vm2138_vm12 }
 0x249   : > { %v2063_v2 = vrot.slane %v2062_v8, 4  ;;  %v3583_v1 = vsel %vm2138_vm12, 1.0, %v8840_v56  ;;  %vm3865_vm15 = vmpackc.low %vm2147_vm8, %vm2139_vm7  ;;  %v3584_v4 = vsel %vm2139_vm7, 1.0, %v8840_v56  ;;  %vm2152_vm0 = vcmp.eq.s32.totalorder %v5109_v53, %v8921_v36 }
 0x24a   : > { %3866 = vmatprep.subr.msk.bf16.mxu1 %vm3865_vm15, %v8871_v47  ;;  %v3071_v10 = vadd.f32 %v3583_v1, %v3070_v22  ;;  %vm2153_vm5 = vcmp.eq.s32.totalorder %v5109_v53, %v8922_v27  ;;  %vm2160_vm14 = vcmp.eq.s32.totalorder %v8857_v7, %v8921_v36  ;;  %vm2161_vm6 = vcmp.eq.s32.totalorder %v8857_v7, %v8922_v27 }
 0x24b   : > { %vm2064_vm13 = vcmp.lt.s32.totalorder %v2062_v8, %v2063_v2  ;;  %3868 = vmatpush1.bf16.msk.msra.mxu1 %vm3867_vm11, %v8871_v47  ;;  %v3597_v52 = vsel %vm2152_vm0, 1.0, %v8840_v56  ;;  %v7037_v20 = vadd.f32 %v3576_v60, %v3062_v26  ;;  %v3598_v21 = vsel %vm2153_vm5, 1.0, %v8840_v56  ;;  %vm3837_vm1 = vmpackc.low %vm2161_vm6, %vm2153_vm5 }
 0x24c   : > { %v2065_v38 = vsel %vm2064_vm13, %v2062_v8, %v2063_v2  ;;  %v7039_v19 = vadd.f32 %v3584_v4, %v3071_v10  ;;  %v7046_v44 = vrot.slane %v2846_v41, %v8925_v6  ;;  %v3591_v40 = vsel %vm2146_vm3, 1.0, %v8840_v56  ;;  %3838 = vmatprep.subr.msk.bf16.mxu0 %vm3837_vm1, %v8871_v47  ;;  %vm3839_vm4 = vmpackc.low %vm2160_vm14, %vm2152_vm0 }
 0x24d   : > { %v2066_v9 = vrot.slane %v2065_v38, 2  ;;  %v3088_v59 = vadd.f32 %v3598_v21, %v3597_v52  ;;  %v3592_v18 = vsel %vm2147_vm8, 1.0, %v8840_v56  ;;  %vm2154_vm9 = vcmp.eq.s32.totalorder %v5109_v53, %v5818_v43  ;;  %3840 = vmatpush1.bf16.msk.msra.mxu0 %vm3839_vm4, %v8871_v47 }
 0x24e   : > { %vm2155_vm12 = vcmp.eq.s32.totalorder %v5109_v53, %v6107_v34  ;;  %vm2162_vm10 = vcmp.eq.s32.totalorder %v8857_v7, %v5818_v43  ;;  %v3080_v29 = vadd.f32 %v3591_v40, %v3079_v57  ;;  %vm2163_vm7 = vcmp.eq.s32.totalorder %v8857_v7, %v6107_v34 }
 0x24f   : > { %vm2067_vm2 = vcmp.lt.s32.totalorder %v2065_v38, %v2066_v9  ;;  %v3599_v37 = vsel %vm2154_vm9, 1.0, %v8840_v56  ;;  %v3605_v11 = vsel %vm2160_vm14, 1.0, %v8840_v56  ;;  %v3606_v15 = vsel %vm2161_vm6, 1.0, %v8840_v56  ;;  %vm3869_vm3 = vmpackc.low %vm2163_vm7, %vm2155_vm12 }
 0x250   : > { %v2068_v49 = vsel %vm2067_vm2, %v2065_v38, %v2066_v9  ;;  %v3089_v63 = vadd.f32 %v3599_v37, %v3088_v59  ;;  %v3600_v42 = vsel %vm2155_vm12, 1.0, %v8840_v56  ;;  %3870 = vmatprep.subr.msk.bf16.mxu1 %vm3869_vm3, %v8871_v47  ;;  %vm3871_vm8 = vmpackc.low %vm2162_vm10, %vm2154_vm9  ;;  %vm2168_vm15 = vcmp.eq.s32.totalorder %v8858_v51, %v8921_v36 }
 0x251   : > { %v2069_v30 = vrot.slane %v2068_v49, 1  ;;  %vm2169_vm11 = vcmp.eq.s32.totalorder %v8858_v51, %v8922_v27  ;;  %3872 = vmatpush1.bf16.msk.msra.mxu1 %vm3871_vm8, %v8871_v47  ;;  %vm2176_vm0 = vcmp.eq.s32.totalorder %v8860_v61, %v8921_v36  ;;  %vm2177_vm5 = vcmp.eq.s32.totalorder %v8860_v61, %v8922_v27 }
 0x252   : > { %v7099_v41 = vadd.f32 %v3600_v42, %v3089_v63  ;;  %v3613_v32 = vsel %vm2168_vm15, 1.0, %v8840_v56  ;;  %v7110_v24 = vadd.f32 %v3592_v18, %v3080_v29  ;;  %v3097_v28 = vadd.f32 %v3606_v15, %v3605_v11  ;;  %vm3841_vm14 = vmpackc.low %vm2177_vm5, %vm2169_vm11  ;;  %v8927_v15 = vld [vmem:[#allocation28_spill] sm:$0xff] }
 0x253   : > { %vm2070_vm13 = vcmp.lt.s32.totalorder %v2068_v49, %v2069_v30  ;;  %v3614_v39 = vsel %vm2169_vm11, 1.0, %v8840_v56  ;;  %v3607_v46 = vsel %vm2162_vm10, 1.0, %v8840_v56  ;;  %3842 = vmatprep.subr.msk.bf16.mxu0 %vm3841_vm14, %v8871_v47  ;;  %vm2170_vm6 = vcmp.eq.s32.totalorder %v8858_v51, %v5818_v43  ;;  %vm3843_vm1 = vmpackc.low %vm2176_vm0, %vm2168_vm15 }
 0x254   : > { %v7116_v22 = vsel %vm2070_vm13, %v2068_v49, %v2069_v30  ;;  %v3106_v8 = vadd.f32 %v3614_v39, %v3613_v32  ;;  %v3608_v2 = vsel %vm2163_vm7, 1.0, %v8840_v56  ;;  %vm2171_vm4 = vcmp.eq.s32.totalorder %v8858_v51, %v6107_v34  ;;  %3844 = vmatpush1.bf16.msk.msra.mxu0 %vm3843_vm1, %v8871_v47 }
 0x255   : > { %v2847_v26 = vcombine.low %v6791_v5, %v7116_v22  ;;  %vm2178_vm9 = vcmp.eq.s32.totalorder %v8860_v61, %v5818_v43  ;;  %v3621_v60 = vsel %vm2176_vm0, 1.0, %v8840_v56  ;;  %v3622_v57 = vsel %vm2177_vm5, 1.0, %v8840_v56 }
 0x256   : > { %vm2179_vm12 = vcmp.eq.s32.totalorder %v8860_v61, %v6107_v34  ;;  %v3615_v1 = vsel %vm2170_vm6, 1.0, %v8840_v56  ;;  %v3098_v10 = vadd.f32 %v3607_v46, %v3097_v28  ;;  %v3616_v52 = vsel %vm2171_vm4, 1.0, %v8840_v56  ;;  %vm3875_vm2 = vmpackc.low %vm2178_vm9, %vm2170_vm6 }
 0x257   : > { %v2875_v4 = vrot.slane %v2847_v26, %v8925_v6  ;;  %vm3873_vm10 = vmpackc.low %vm2179_vm12, %vm2171_vm4  ;;  %v3107_v38 = vadd.f32 %v3615_v1, %v3106_v8  ;;  %vm2184_vm7 = vcmp.eq.s32.totalorder %v8861_v33, %v8921_v36  ;;  %vm2185_vm3 = vcmp.eq.s32.totalorder %v8861_v33, %v8922_v27 }
 0x258   : > { %3874 = vmatprep.subr.msk.bf16.mxu1 %vm3873_vm10, %v8871_v47  ;;  %vm2192_vm8 = vcmp.eq.s32.totalorder %v8862_v35, %v8921_v36  ;;  %vm2193_vm15 = vcmp.eq.s32.totalorder %v8862_v35, %v8922_v27  ;;  %v3115_v9 = vadd.f32 %v3622_v57, %v3621_v60  ;;  %v3629_v59 = vsel %vm2184_vm7, 1.0, %v8840_v56 }
 0x259   : > { %v2877_v21 = vcombine.low %v7046_v44, %v2875_v4  ;;  %v7178_v40 = vadd.f32 %v3616_v52, %v3107_v38  ;;  %3876 = vmatpush1.bf16.msk.msra.mxu1 %vm3875_vm2, %v8871_v47  ;;  %vm3845_vm11 = vmpackc.low %vm2193_vm15, %vm2185_vm3  ;;  %v3630_v18 = vsel %vm2185_vm3, 1.0, %v8840_v56  ;;  %v3637_v29 = vsel %vm2192_vm8, 1.0, %v8840_v56 }
 0x25a   : > { %v3638_v27 = vsel %vm2193_vm15, 1.0, %v8840_v56  ;;  %3846 = vmatprep.subr.msk.bf16.mxu0 %vm3845_vm11, %v8871_v47  ;;  %vm2186_vm0 = vcmp.eq.s32.totalorder %v8861_v33, %v5818_v43  ;;  %vm3847_vm5 = vmpackc.low %vm2192_vm8, %vm2184_vm7  ;;  %v3623_v37 = vsel %vm2178_vm9, 1.0, %v8840_v56  ;;  %v3124_v49 = vadd.f32 %v3630_v18, %v3629_v59 }
 0x25b   : > { %v2891_v44 = vrot.slane %v2877_v21, %v8925_v6  ;;  %vm2187_vm13 = vcmp.eq.s32.totalorder %v8861_v33, %v6107_v34  ;;  %3848 = vmatpush1.bf16.msk.msra.mxu0 %vm3847_vm5, %v8871_v47  ;;  %v3133_v11 = vadd.f32 %v3638_v27, %v3637_v29  ;;  %vm2194_vm14 = vcmp.eq.s32.totalorder %v8862_v35, %v5818_v43  ;;  %v7213_v6 = vld [vmem:[%s8926_s2] sm:$0xff]  ;;  %v7276_v43 = vld [vmem:[%s8926_s2 + $0x8] sm:$0xff] }
 0x25c   : > { %vm2195_vm6 = vcmp.eq.s32.totalorder %v8862_v35, %v6107_v34  ;;  %v3631_v36 = vsel %vm2186_vm0, 1.0, %v8840_v56  ;;  %v7216_v30 = vadd.f32 %v3608_v2, %v3098_v10  ;;  %v3116_v42 = vadd.f32 %v3623_v37, %v3115_v9  ;;  %vm3879_vm4 = vmpackc.low %vm2194_vm14, %vm2186_vm0  ;;  %v7369_v10 = vld [vmem:[%s8926_s2 + $0x10] sm:$0xff]  ;;  %v8928_v9 = vld [vmem:[#allocation25_spill] sm:$0xff] }
 0x25d   : > { %v2892_v63 = vcombine.low %v8927_v15, %v2891_v44  ;;  %vm3877_vm1 = vmpackc.low %vm2195_vm6, %vm2187_vm13  ;;  %v3125_v32 = vadd.f32 %v3631_v36, %v3124_v49  ;;  %v3632_v28 = vsel %vm2187_vm13, 1.0, %v8840_v56  ;;  %vm2077_vm9 = vcmp.eq.s32.totalorder %v5044_v62, %v6962_v0  ;;  %v7452_v37 = vld [vmem:[%s8926_s2 + $0x18] sm:$0xff] }
 0x25e   : > { %3878 = vmatprep.subr.msk.bf16.mxu1 %vm3877_vm1, %v8871_v47  ;;  %vm2085_vm10 = vcmp.eq.s32.totalorder %v5065_v23, %v6962_v0  ;;  %vm2079_vm2 = vcmp.eq.s32.totalorder %v5044_v62, %v7116_v22  ;;  %v3624_v39 = vsel %vm2179_vm12, 1.0, %v8840_v56  ;;  %v3639_v46 = vsel %vm2194_vm14, 1.0, %v8840_v56  ;;  %2521 = vmatmul.mubr.f32.vlgmr.msra.gmra.mrb[64].mxu0 %v7213_v6 }
 0x25f   : > { %2893 = vst [vmem:[%s7237_s16] sm:$0xff] %v2892_v63  ;;  %v7248_v8 = vadd.f32 %v3632_v28, %v3125_v32  ;;  %3880 = vmatpush1.bf16.msk.msra.mxu1 %vm3879_vm4, %v8871_v47  ;;  %vm3881_vm7 = vmpackc.low %vm2085_vm10, %vm2077_vm9  ;;  %vm8551_vm3 = vcmp.eq.s32.totalorder %v5065_v23, %v7116_v22  ;;  %v3134_v26 = vadd.f32 %v3639_v46, %v3133_v11  ;;  %v3640_v60 = vsel %vm2195_vm6, 1.0, %v8840_v56 }
 0x260   : > { %3882 = vmatprep.subr.msk.bf16.mxu0 %vm3881_vm7, %v8871_v47  ;;  %vm3913_vm12 = vmpackc.low %vm8551_vm3, %vm2079_vm2  ;;  %vm2076_vm8 = vcmp.eq.s32.totalorder %v5044_v62, %v6685_v31  ;;  %vm2084_vm15 = vcmp.eq.s32.totalorder %v5065_v23, %v6685_v31  ;;  %vm2078_vm11 = vcmp.eq.s32.totalorder %v5044_v62, %v6791_v5  ;;  %v7278_v2 = vadd.f32 %v3624_v39, %v3116_v42 }
 0x261   : > { %3914 = vmatprep.subr.msk.bf16.mxu1 %vm3913_vm12, %v8871_v47  ;;  %vm3883_vm0 = vmpackc.low %vm2084_vm15, %vm2076_vm8  ;;  %vm8552_vm5 = vcmp.eq.s32.totalorder %v5065_v23, %v6791_v5  ;;  %vm2093_vm13 = vcmp.eq.s32.totalorder %v5072_v58, %v6962_v0  ;;  %2526 = vmatprep.mubr.f32.mxu0 %v8840_v56  ;;  %vm2101_vm1 = vcmp.eq.s32.totalorder %v5075_v54, %v6962_v0  ;;  %v3521_v34 = vsel %vm2076_vm8, 1.0, %v8840_v56 }
 0x262   : > { %2610 = vmatmul.mubr.f32.vlgmr.msra.gmra.mrb[64].mxu1 %v7213_v6  ;;  %3884 = vmatpush1.bf16.msk.msra.mxu0 %vm3883_vm0, %v8871_v47  ;;  %vm3915_vm14 = vmpackc.low %vm8552_vm5, %vm2078_vm11  ;;  %vm8553_vm4 = vcmp.eq.s32.totalorder %v5072_v58, %v7116_v22  ;;  %vm8554_vm6 = vcmp.eq.s32.totalorder %v5075_v54, %v7116_v22  ;;  %vm2092_vm12 = vcmp.eq.s32.totalorder %v5072_v58, %v6685_v31  ;;  %v3522_v1 = vsel %vm2077_vm9, 1.0, %v8840_v56 }
 0x263   : > { %3916 = vmatpush1.bf16.msk.msra.mxu1 %vm3915_vm14, %v8871_v47  ;;  %vm3885_vm7 = vmpackc.low %vm2101_vm1, %vm2093_vm13  ;;  %vm2100_vm0 = vcmp.eq.s32.totalorder %v5075_v54, %v6685_v31  ;;  %vm8555_vm3 = vcmp.eq.s32.totalorder %v5072_v58, %v6791_v5  ;;  %2527 = vmatmul.mubr.f32.gmra.mrb[66].mxu0 %v7276_v43  ;;  %v7328_v57 = vadd.f32 %v3640_v60, %v3134_v26  ;;  %v7350_v4 = vsel %vm2085_vm10, 1.0, %v8840_v56 }
 0x264   : > { %3886 = vmatprep.subr.msk.bf16.mxu0 %vm3885_vm7, %v8871_v47  ;;  %vm3917_vm8 = vmpackc.low %vm8554_vm6, %vm8553_vm4  ;;  %vm2102_vm14 = vcmp.eq.s32.totalorder %v5075_v54, %v6791_v5  ;;  %vm2109_vm5 = vcmp.eq.s32.totalorder %v5080_v17, %v6962_v0  ;;  %2532 = vmatprep.mubr.f32.mxu0 %v8840_v56  ;;  %vm2117_vm7 = vcmp.eq.s32.totalorder %v5083_v13, %v6962_v0  ;;  %v7375_v52 = vsel %vm2084_vm15, 1.0, %v8840_v56 }
 0x265   : > { %3918 = vmatprep.subr.msk.bf16.mxu1 %vm3917_vm8, %v8871_v47  ;;  %vm3887_vm9 = vmpackc.low %vm2100_vm0, %vm2092_vm12  ;;  %vm8556_vm4 = vcmp.eq.s32.totalorder %v5080_v17, %v7116_v22  ;;  %vm2119_vm6 = vcmp.eq.s32.totalorder %v5083_v13, %v7116_v22  ;;  %2615 = vmatprep.mubr.f32.mxu1 %v8840_v56  ;;  %v7381_v38 = vsel %vm2093_vm13, 1.0, %v8840_v56  ;;  %v3546_v21 = vsel %vm2101_vm1, 1.0, %v8840_v56 }
 0x266   : > { %3888 = vmatpush1.bf16.msk.msra.mxu0 %vm3887_vm9, %v8871_v47  ;;  %vm3919_vm10 = vmpackc.low %vm2102_vm14, %vm8555_vm3  ;;  %v3001_v59 = vadd.f32 %v3521_v34, %v8928_v9  ;;  %2616 = vmatmul.mubr.f32.gmra.mrb[66].mxu1 %v7276_v43  ;;  %vm2108_vm13 = vcmp.eq.s32.totalorder %v5080_v17, %v6685_v31  ;;  %vm2116_vm1 = vcmp.eq.s32.totalorder %v5083_v13, %v6685_v31  ;;  %v7415_v18 = vsel %vm2092_vm12, 1.0, %v8840_v56 }
 0x267   : > { %3920 = vmatpush1.bf16.msk.msra.mxu1 %vm3919_vm10, %v8871_v47  ;;  %vm3889_vm15 = vmpackc.low %vm2117_vm7, %vm2109_vm5  ;;  %vm8559_vm8 = vcmp.eq.s32.totalorder %v5080_v17, %v6791_v5  ;;  %vm2118_vm9 = vcmp.eq.s32.totalorder %v5083_v13, %v6791_v5  ;;  %v3545_v29 = vsel %vm2100_vm0, 1.0, %v8840_v56  ;;  %vm2125_vm3 = vcmp.eq.s32.totalorder %v5090_v14, %v6962_v0  ;;  %2533 = vmatmul.mubr.f32.gmra.mrb[68].mxu0 %v7369_v10 }
 0x268   : > { %3890 = vmatprep.subr.msk.bf16.mxu0 %vm3889_vm15, %v8871_v47  ;;  %vm3921_vm10 = vmpackc.low %vm2119_vm6, %vm8556_vm4  ;;  %v3002_v27 = vadd.f32 %v3522_v1, %v3001_v59  ;;  %v3523_v44 = vsel %vm2078_vm11, 1.0, %v8840_v56  ;;  %vm2133_vm0 = vcmp.eq.s32.totalorder %v5093_v48, %v6962_v0  ;;  %vm8557_vm15 = vcmp.eq.s32.totalorder %v5090_v14, %v7116_v22  ;;  %2538 = vmatprep.mubr.f32.mxu0 %v8840_v56 }
 0x269   : > { %3922 = vmatprep.subr.msk.bf16.mxu1 %vm3921_vm10, %v8871_v47  ;;  %vm3891_vm12 = vmpackc.low %vm2116_vm1, %vm2108_vm13  ;;  %vm2135_vm10 = vcmp.eq.s32.totalorder %v5093_v48, %v7116_v22  ;;  %v7458_v49 = vsel %vm2109_vm5, 1.0, %v8840_v56  ;;  %v3562_v11 = vsel %vm2117_vm7, 1.0, %v8840_v56  ;;  %v3524_v36 = vsel %vm2079_vm2, 1.0, %v8840_v56  ;;  %2621 = vmatprep.mubr.f32.mxu1 %v8840_v56 }
 0x26a   : > { %v3003_v15 = vadd.f32 %v3523_v44, %v3002_v27  ;;  %3892 = vmatpush1.bf16.msk.msra.mxu0 %vm3891_vm12, %v8871_v47  ;;  %vm3923_vm11 = vmpackc.low %vm2118_vm9, %vm8559_vm8  ;;  %v3028_v62 = vadd.f32 %v3545_v29, %v6773_v3  ;;  %vm2124_vm5 = vcmp.eq.s32.totalorder %v5090_v14, %v6685_v31  ;;  %vm2132_vm7 = vcmp.eq.s32.totalorder %v5093_v48, %v6685_v31 }
 0x26b   : > { %3924 = vmatpush1.bf16.msk.msra.mxu1 %vm3923_vm11, %v8871_v47  ;;  %vm3893_vm2 = vmpackc.low %vm2133_vm0, %vm2125_vm3  ;;  %vm8558_vm12 = vcmp.eq.s32.totalorder %v5090_v14, %v6791_v5  ;;  %v7494_v42 = vsel %vm2108_vm13, 1.0, %v8840_v56  ;;  %v3561_v3 = vsel %vm2116_vm1, 1.0, %v8840_v56  ;;  %vm2134_vm4 = vcmp.eq.s32.totalorder %v5093_v48, %v6791_v5  ;;  %2539 = vmatmul.mubr.f32.gmra.mrb[70].mxu0 %v7452_v37 }
 0x26c   : > { %v3004_v63 = vadd.f32 %v3524_v36, %v3003_v15  ;;  %3894 = vmatprep.subr.msk.bf16.mxu0 %vm3893_vm2, %v8871_v47  ;;  %vm3925_vm11 = vmpackc.low %vm2135_vm10, %vm8557_vm15  ;;  %v3029_v32 = vadd.f32 %v3546_v21, %v3028_v62  ;;  %vm2141_vm1 = vcmp.eq.s32.totalorder %v5096_v45, %v6962_v0  ;;  %vm2149_vm2 = vcmp.eq.s32.totalorder %v5106_v12, %v6962_v0 }
 0x26d   : > { %3926 = vmatprep.subr.msk.bf16.mxu1 %vm3925_vm11, %v8871_v47  ;;  %vm3895_vm13 = vmpackc.low %vm2132_vm7, %vm2124_vm5  ;;  %vm8560_vm15 = vcmp.eq.s32.totalorder %v5096_v45, %v7116_v22  ;;  %v7527_v28 = vsel %vm2125_vm3, 1.0, %v8840_v56  ;;  %v3578_v39 = vsel %vm2133_vm0, 1.0, %v8840_v56  ;;  %v3547_v46 = vsel %vm2102_vm14, 1.0, %v8840_v56  ;;  %2698 = vmatprep.mubr.f32.mxu0 %v8840_v56 }
 0x26e   : > { %3005 = vadd.xlane.f32.xlu1 %v3004_v63  ;;  %3896 = vmatpush1.bf16.msk.msra.mxu0 %vm3895_vm13, %v8871_v47  ;;  %vm3927_vm3 = vmpackc.low %vm2134_vm4, %vm8558_vm12  ;;  %vm8561_vm11 = vcmp.eq.s32.totalorder %v5106_v12, %v7116_v22  ;;  %vm8929_vm0 = vcmp.eq.s32.totalorder %v5075_v54, %v7116_v22  ;;  %v3030_v60 = vadd.f32 %v3547_v46, %v3029_v32  ;;  %v7565_v54 = vsel %vm2124_vm5, 1.0, %v8840_v56 }
 0x26f   : > { %v3548_v26 = vsel %vm8929_vm0, 1.0, %v8840_v56  ;;  %3928 = vmatpush1.bf16.msk.msra.mxu1 %vm3927_vm3, %v8871_v47  ;;  %vm3897_vm14 = vmpackc.low %vm2149_vm2, %vm2141_vm1  ;;  %v3046_v34 = vadd.f32 %v3561_v3, %v6991_v16  ;;  %vm2140_vm13 = vcmp.eq.s32.totalorder %v5096_v45, %v6685_v31  ;;  %vm2148_vm0 = vcmp.eq.s32.totalorder %v5106_v12, %v6685_v31 }
 0x270   : > { %3898 = vmatprep.subr.msk.bf16.mxu0 %vm3897_vm14, %v8871_v47  ;;  %vm3929_vm3 = vmpackc.low %vm8561_vm11, %vm8560_vm15  ;;  %vm8565_vm12 = vcmp.eq.s32.totalorder %v5096_v45, %v6791_v5  ;;  %vm2150_vm8 = vcmp.eq.s32.totalorder %v5106_v12, %v6791_v5  ;;  %2622 = vmatmul.mubr.f32.gmra.mrb[68].mxu1 %v7369_v10  ;;  %v3031_v16 = vadd.f32 %v3548_v26, %v3030_v60  ;;  %v3577_v1 = vsel %vm2132_vm7, 1.0, %v8840_v56 }
 0x271   : > { %3930 = vmatprep.subr.msk.bf16.mxu1 %vm3929_vm3, %v8871_v47  ;;  %v3047_v21 = vadd.f32 %v3562_v11, %v3046_v34  ;;  %vm3899_vm5 = vmpackc.low %vm2148_vm0, %vm2140_vm13  ;;  %vm2157_vm14 = vcmp.eq.s32.totalorder %v5109_v53, %v6962_v0  ;;  %2627 = vmatprep.mubr.f32.mxu1 %v8840_v56  ;;  %v3563_v9 = vsel %vm2118_vm9, 1.0, %v8840_v56  ;;  %vm2165_vm3 = vcmp.eq.s32.totalorder %v8857_v7, %v6962_v0 }
 0x272   : > { %3900 = vmatpush1.bf16.msk.msra.mxu0 %vm3899_vm5, %v8871_v47  ;;  %vm3931_vm7 = vmpackc.low %vm2150_vm8, %vm8565_vm12  ;;  %vm8562_vm15 = vcmp.eq.s32.totalorder %v5109_v53, %v7116_v22  ;;  %vm2167_vm11 = vcmp.eq.s32.totalorder %v8857_v7, %v7116_v22  ;;  %3032 = vadd.xlane.f32.xlu1 %v3031_v16  ;;  %v7616_v59 = vsel %vm2141_vm1, 1.0, %v8840_v56  ;;  %v3594_v29 = vsel %vm2149_vm2, 1.0, %v8840_v56 }
 0x273   : > { %v3564_v27 = vsel %vm2119_vm6, 1.0, %v8840_v56  ;;  %v3048_v44 = vadd.f32 %v3563_v9, %v3047_v21  ;;  %3932 = vmatpush1.bf16.msk.msra.mxu1 %vm3931_vm7, %v8871_v47  ;;  %vm3901_vm9 = vmpackc.low %vm2165_vm3, %vm2157_vm14  ;;  %v3064_v13 = vadd.f32 %v3577_v1, %v7037_v20  ;;  %vm2156_vm6 = vcmp.eq.s32.totalorder %v5109_v53, %v6685_v31 }
 0x274   : > { %3902 = vmatprep.subr.msk.bf16.mxu0 %vm3901_vm9, %v8871_v47  ;;  %vm3933_vm1 = vmpackc.low %vm2167_vm11, %vm8562_vm15  ;;  %vm2164_vm2 = vcmp.eq.s32.totalorder %v8857_v7, %v6685_v31  ;;  %vm8564_vm5 = vcmp.eq.s32.totalorder %v5109_v53, %v6791_v5  ;;  %v7651_v36 = vsel %vm2140_vm13, 1.0, %v8840_v56  ;;  %v3593_v20 = vsel %vm2148_vm0, 1.0, %v8840_v56  ;;  %2628 = vmatmul.mubr.f32.gmra.mrb[70].mxu1 %v7452_v37 }
 0x275   : > { %v3049_v11 = vadd.f32 %v3564_v27, %v3048_v44  ;;  %3934 = vmatprep.subr.msk.bf16.mxu1 %vm3933_vm1, %v8871_v47  ;;  %vm3903_vm7 = vmpackc.low %vm2164_vm2, %vm2156_vm6  ;;  %vm2166_vm9 = vcmp.eq.s32.totalorder %v8857_v7, %v6791_v5  ;;  %v3065_v15 = vadd.f32 %v3578_v39, %v3064_v13  ;;  %vm2173_vm0 = vcmp.eq.s32.totalorder %v8858_v51, %v6962_v0 }
 0x276   : > { %3904 = vmatpush1.bf16.msk.msra.mxu0 %vm3903_vm7, %v8871_v47  ;;  %vm3935_vm13 = vmpackc.low %vm2166_vm9, %vm8564_vm5  ;;  %vm2181_vm1 = vcmp.eq.s32.totalorder %v8860_v61, %v6962_v0  ;;  %vm8563_vm15 = vcmp.eq.s32.totalorder %v8858_v51, %v7116_v22  ;;  %v7684_v62 = vsel %vm2157_vm14, 1.0, %v8840_v56  ;;  %v3610_v63 = vsel %vm2165_vm3, 1.0, %v8840_v56  ;;  %2787 = vmatprep.mubr.f32.mxu1 %v8840_v56 }
 0x277   : > { %3050 = vadd.xlane.f32.xlu1 %v3049_v11  ;;  %v3579_v3 = vsel %vm2134_vm4, 1.0, %v8840_v56  ;;  %3936 = vmatpush1.bf16.msk.msra.mxu1 %vm3935_vm13, %v8871_v47  ;;  %vm3905_vm14 = vmpackc.low %vm2181_vm1, %vm2173_vm0  ;;  %vm2183_vm7 = vcmp.eq.s32.totalorder %v8860_v61, %v7116_v22  ;;  %v3580_v32 = vsel %vm2135_vm10, 1.0, %v8840_v56  ;;  %v3082_v46 = vadd.f32 %v3593_v20, %v7110_v24 }
 0x278   : > { %v3066_v39 = vadd.f32 %v3579_v3, %v3065_v15  ;;  %3906 = vmatprep.subr.msk.bf16.mxu0 %vm3905_vm14, %v8871_v47  ;;  %vm3937_vm4 = vmpackc.low %vm2183_vm7, %vm8563_vm15  ;;  %vm2172_vm3 = vcmp.eq.s32.totalorder %v8858_v51, %v6685_v31  ;;  %v7722_v48 = vsel %vm2156_vm6, 1.0, %v8840_v56  ;;  %vm2180_vm10 = vcmp.eq.s32.totalorder %v8860_v61, %v6685_v31 }
 0x279   : > { %3938 = vmatprep.subr.msk.bf16.mxu1 %vm3937_vm4, %v8871_v47  ;;  %vm2174_vm13 = vcmp.eq.s32.totalorder %v8858_v51, %v6791_v5  ;;  %vm2182_vm14 = vcmp.eq.s32.totalorder %v8860_v61, %v6791_v5  ;;  %v3609_v26 = vsel %vm2164_vm2, 1.0, %v8840_v56  ;;  %v3083_v60 = vadd.f32 %v3594_v29, %v3082_v46  ;;  %vm3907_vm6 = vmpackc.low %vm2180_vm10, %vm2172_vm3  ;;  %v8931_v46 = vld [vmem:[#allocation29_spill] sm:$0xff] }
 0x27a   : > { %v3067_v24 = vadd.f32 %v3580_v32, %v3066_v39  ;;  %vm2189_vm4 = vcmp.eq.s32.totalorder %v8861_v33, %v6962_v0  ;;  %v3595_v34 = vsel %vm2150_vm8, 1.0, %v8840_v56  ;;  %3908 = vmatpush1.bf16.msk.msra.mxu0 %vm3907_vm6, %v8871_v47  ;;  %vm3939_vm2 = vmpackc.low %vm2182_vm14, %vm2174_vm13  ;;  %vm2197_vm15 = vcmp.eq.s32.totalorder %v8862_v35, %v6962_v0 }
 0x27b   : > { %vm8566_vm5 = vcmp.eq.s32.totalorder %v8861_v33, %v7116_v22  ;;  %vm2199_vm12 = vcmp.eq.s32.totalorder %v8862_v35, %v7116_v22  ;;  %v7764_v16 = vsel %vm2173_vm0, 1.0, %v8840_v56  ;;  %vm8930_vm8 = vcmp.eq.s32.totalorder %v5106_v12, %v7116_v22  ;;  %3940 = vmatpush1.bf16.msk.msra.mxu1 %vm3939_vm2, %v8871_v47  ;;  %vm3909_vm0 = vmpackc.low %vm2197_vm15, %vm2189_vm4 }
 0x27c   : > { %3068 = vadd.xlane.f32.xlu1 %v3067_v24  ;;  %v3596_v1 = vsel %vm8930_vm8, 1.0, %v8840_v56  ;;  %v3084_v21 = vadd.f32 %v3595_v34, %v3083_v60  ;;  %v3625_v9 = vsel %vm2180_vm10, 1.0, %v8840_v56  ;;  %3910 = vmatprep.subr.msk.bf16.mxu0 %vm3909_vm0, %v8871_v47  ;;  %vm3941_vm6 = vmpackc.low %vm2199_vm12, %vm8566_vm5  ;;  %v3100_v12 = vadd.f32 %v3609_v26, %v7216_v30 }
 0x27d   : > { %vm2188_vm10 = vcmp.eq.s32.totalorder %v8861_v33, %v6685_v31  ;;  %vm2196_vm2 = vcmp.eq.s32.totalorder %v8862_v35, %v6685_v31  ;;  %vm2190_vm8 = vcmp.eq.s32.totalorder %v8861_v33, %v6791_v5  ;;  %v3626_v29 = vsel %vm2181_vm1, 1.0, %v8840_v56  ;;  %3942 = vmatprep.subr.msk.bf16.mxu1 %vm3941_vm6, %v8871_v47 }
 0x27e   : > { %v3085_v27 = vadd.f32 %v3596_v1, %v3084_v21  ;;  %v3641_v44 = vsel %vm2196_vm2, 1.0, %v8840_v56  ;;  %vm3911_vm0 = vmpackc.low %vm2196_vm2, %vm2188_vm10  ;;  %vm2198_vm5 = vcmp.eq.s32.totalorder %v8862_v35, %v6791_v5  ;;  %v3617_v30 = vsel %vm2172_vm3, 1.0, %v8840_v56 }
 0x27f   : > { %v3642_v13 = vsel %vm2197_vm15, 1.0, %v8840_v56  ;;  %v3101_v11 = vadd.f32 %v3610_v63, %v3100_v12  ;;  %3912 = vmatpush1.bf16.msk.msra.mxu0 %vm3911_vm0, %v8871_v47  ;;  %vm3943_vm1 = vmpackc.low %vm2198_vm5, %vm2190_vm8  ;;  %v3118_v20 = vadd.f32 %v3625_v9, %v7278_v2  ;;  %v7826_v15 = vsel %vm2189_vm4, 1.0, %v8840_v56 }
 0x280   : > { %3086 = vadd.xlane.f32.xlu1 %v3085_v27  ;;  %v3611_v63 = vsel %vm2166_vm9, 1.0, %v8840_v56  ;;  %v3612_v3 = vsel %vm2167_vm11, 1.0, %v8840_v56  ;;  %3944 = vmatpush1.bf16.msk.msra.mxu1 %vm3943_vm1, %v8871_v47  ;;  %v3136_v2 = vadd.f32 %v3641_v44, %v7328_v57  ;;  %v3627_v0 = vsel %vm2182_vm14, 1.0, %v8840_v56 }
 0x281   : > { %v3102_v32 = vadd.f32 %v3611_v63, %v3101_v11  ;;  %v3119_v39 = vadd.f32 %v3626_v29, %v3118_v20  ;;  %v3010_v24 = vadd.f32 %v7375_v52, %v8931_v46  ;;  %v3628_v7 = vsel %vm2183_vm7, 1.0, %v8840_v56 }
 0x282   : > { %2699 = vmatmul.mubr.f32.vlgmr.msra.gmra.mrb[72].mxu0 %v7213_v6  ;;  %v3643_v47 = vsel %vm2198_vm5, 1.0, %v8840_v56  ;;  %v3137_v57 = vadd.f32 %v3642_v13, %v3136_v2  ;;  %v3019_v26 = vadd.f32 %v7415_v18, %v6770_v25  ;;  %v3644_v52 = vsel %vm2199_vm12, 1.0, %v8840_v56 }
 0x283   : > { %v3103_v60 = vadd.f32 %v3612_v3, %v3102_v32  ;;  %v3120_v34 = vadd.f32 %v3627_v0, %v3119_v39  ;;  %2788 = vmatmul.mubr.f32.vlgmr.msra.gmra.mrb[72].mxu1 %v7213_v6  ;;  %2704 = vmatprep.mubr.f32.mxu0 %v8840_v56  ;;  %v3011_v61 = vadd.f32 %v7350_v4, %v3010_v24  ;;  %v3635_v0 = vsel %vm2190_vm8, 1.0, %v8840_v56 }
 0x284   : > { %v3138_v1 = vadd.f32 %v3643_v47, %v3137_v57  ;;  %2793 = vmatprep.mubr.f32.mxu1 %v8840_v56  ;;  %vm8932_vm15 = vcmp.eq.s32.totalorder %v5065_v23, %v6791_v5  ;;  %v3020_v18 = vadd.f32 %v7381_v38, %v3019_v26  ;;  %v3037_v35 = vadd.f32 %v7494_v42, %v6876_v55 }
 0x285   : > { %v3531_v25 = vsel %vm8932_vm15, 1.0, %v8840_v56  ;;  %3104 = vadd.xlane.f32.xlu1 %v3103_v60  ;;  %v3121_v21 = vadd.f32 %v3628_v7, %v3120_v34  ;;  %vm8933_vm12 = vcmp.eq.s32.totalorder %v5065_v23, %v7116_v22  ;;  %vm8934_vm11 = vcmp.eq.s32.totalorder %v5072_v58, %v6791_v5  ;;  %v4044_v34 = vld [vmem:[%s4425_s18 + $0x8] sm:$0xff] }
 0x286   : > { %v3532_v6 = vsel %vm8933_vm12, 1.0, %v8840_v56  ;;  %v3012_v4 = vadd.f32 %v3531_v25, %v3011_v61  ;;  %v3539_v9 = vsel %vm8934_vm11, 1.0, %v8840_v56  ;;  %v3139_v12 = vadd.f32 %v3644_v52, %v3138_v1  ;;  %2705 = vmatmul.mubr.f32.gmra.mrb[74].mxu0 %v7276_v43 }
 0x287   : > { %v3021_v38 = vadd.f32 %v3539_v9, %v3020_v18  ;;  %v3038_v29 = vadd.f32 %v7458_v49, %v3037_v35  ;;  %v3055_v55 = vadd.f32 %v7565_v54, %v6960_v50  ;;  %2794 = vmatmul.mubr.f32.gmra.mrb[74].mxu1 %v7276_v43  ;;  %2710 = vmatprep.mubr.f32.mxu0 %v8840_v56  ;;  %v3633_v50 = vsel %vm2188_vm10, 1.0, %v8840_v56  ;;  %v4045_v18 = vld [vmem:[%s4425_s18 + $0x10] sm:$0xff] }
 0x288   : > { %v7884_v23 = vadd.f32 %v3532_v6, %v3012_v4  ;;  %vm8935_vm5 = vcmp.eq.s32.totalorder %v5072_v58, %v7116_v22  ;;  %vm8936_vm9 = vcmp.eq.s32.totalorder %v5080_v17, %v6791_v5  ;;  %v3073_v49 = vadd.f32 %v7651_v36, %v7039_v19  ;;  %2799 = vmatprep.mubr.f32.mxu1 %v8840_v56  ;;  %v4046_v4 = vld [vmem:[%s4425_s18 + $0x18] sm:$0xff] }
 0x289   : > { %v3540_v42 = vsel %vm8935_vm5, 1.0, %v8840_v56  ;;  %v3555_v27 = vsel %vm8936_vm9, 1.0, %v8840_v56  ;;  %v3056_v58 = vadd.f32 %v7527_v28, %v3055_v55  ;;  %3122 = vadd.xlane.f32.xlu1 %v3121_v21  ;;  %vm8937_vm7 = vcmp.eq.s32.totalorder %v5080_v17, %v7116_v22 }
 0x28a   : > { %v7901_v43 = vadd.f32 %v3540_v42, %v3021_v38  ;;  %v3039_v54 = vadd.f32 %v3555_v27, %v3038_v29  ;;  %v3556_v44 = vsel %vm8937_vm7, 1.0, %v8840_v56  ;;  %vm8938_vm3 = vcmp.eq.s32.totalorder %v5090_v14, %v6791_v5  ;;  %2711 = vmatmul.mubr.f32.gmra.mrb[76].mxu0 %v7369_v10 }
 0x28b   : > { %v3571_v19 = vsel %vm8938_vm3, 1.0, %v8840_v56  ;;  %v3074_v31 = vadd.f32 %v7616_v59, %v3073_v49  ;;  %v3091_v36 = vadd.f32 %v7722_v48, %v7099_v41  ;;  %vm8939_vm14 = vcmp.eq.s32.totalorder %v5096_v45, %v6791_v5  ;;  %2800 = vmatmul.mubr.f32.gmra.mrb[76].mxu1 %v7369_v10  ;;  %2716 = vmatprep.mubr.f32.mxu0 %v8840_v56 }
 0x28c   : > { %v7916_v13 = vadd.f32 %v3556_v44, %v3039_v54  ;;  %v3057_v28 = vadd.f32 %v3571_v19, %v3056_v58  ;;  %v3587_v17 = vsel %vm8939_vm14, 1.0, %v8840_v56  ;;  %v3109_v11 = vadd.f32 %v3617_v30, %v7178_v40  ;;  %2805 = vmatprep.mubr.f32.mxu1 %v8840_v56 }
 0x28d   : > { %vm8940_vm4 = vcmp.eq.s32.totalorder %v5090_v14, %v7116_v22  ;;  %vm8941_vm6 = vcmp.eq.s32.totalorder %v5096_v45, %v7116_v22  ;;  %v3075_v48 = vadd.f32 %v3587_v17, %v3074_v31  ;;  %v3092_v20 = vadd.f32 %v7684_v62, %v3091_v36  ;;  %3140 = vadd.xlane.f32.xlu1 %v3139_v12 }
 0x28e   : > { %v3572_v41 = vsel %vm8940_vm4, 1.0, %v8840_v56  ;;  %v3588_v59 = vsel %vm8941_vm6, 1.0, %v8840_v56  ;;  %vm8942_vm10 = vcmp.eq.s32.totalorder %v5109_v53, %v6791_v5  ;;  %v3110_v14 = vadd.f32 %v7764_v16, %v3109_v11  ;;  %2717 = vmatmul.mubr.f32.gmra.mrb[78].mxu0 %v7452_v37 }
 0x28f   : > { %v7935_v40 = vadd.f32 %v3572_v41, %v3057_v28  ;;  %v3603_v10 = vsel %vm8942_vm10, 1.0, %v8840_v56  ;;  %v3127_v30 = vadd.f32 %v3633_v50, %v7248_v8  ;;  %v7943_v63 = vadd.f32 %v3588_v59, %v3075_v48  ;;  %2806 = vmatmul.mubr.f32.gmra.mrb[78].mxu1 %v7452_v37  ;;  %v4047_v41 = vld [vmem:[%s4425_s18 + $0x20] sm:$0xff] }
 0x290   : > { %v3093_v45 = vadd.f32 %v3603_v10, %v3092_v20  ;;  %v3619_v62 = vsel %vm2174_vm13, 1.0, %v8840_v56  ;;  %vm8943_vm2 = vcmp.eq.s32.totalorder %v5109_v53, %v7116_v22  ;;  %vm8944_vm0 = vcmp.eq.s32.totalorder %v8858_v51, %v7116_v22  ;;  %v4048_v10 = vld [vmem:[%s4425_s18 + $0x28] sm:$0xff] }
 0x291   : > { %v3604_v3 = vsel %vm8943_vm2, 1.0, %v8840_v56  ;;  %v3111_v2 = vadd.f32 %v3619_v62, %v3110_v14  ;;  %v3128_v16 = vadd.f32 %v7826_v15, %v3127_v30  ;;  %v3620_v32 = vsel %vm8944_vm0, 1.0, %v8840_v56  ;;  %v4049_v30 = vld [vmem:[%s4425_s18 + $0x30] sm:$0xff] }
 0x292   : > { %v7956_v8 = vadd.f32 %v3604_v3, %v3093_v45  ;;  %vm8945_vm13 = vcmp.eq.s32.totalorder %v8861_v33, %v7116_v22  ;;  %v4043_v22 = vld [vmem:[%s4425_s18] sm:$0xff]  ;;  %vm3146_vm8 = vcmask (!%p3773_p8), 7168   ;;  %vm3163_vm1 = vcmask (!%p3773_p8), 0  }
 0x293   : > { %v7966_v53 = vadd.f32 %v3620_v32, %v3111_v2  ;;  %v3129_v39 = vadd.f32 %v3635_v0, %v3128_v16  ;;  %v3636_v37 = vsel %vm8945_vm13, 1.0, %v8840_v56 }
 0x295   : > { %v7972_v15 = vadd.f32 %v3636_v37, %v3129_v39  ;;  %v4050_v39 = vld [vmem:[%s4425_s18 + $0x38] sm:$0xff] }
 0x2fb   : > { %v7974_v51 = vpop.xlane.xlu1 %3005 }
 0x2ff   : > { %v7976_v46 = vpop.xlane.xlu1 %3032 }
 0x304   : > { %v7978_v24 = vpop.xlane.xlu1 %3050 }
 0x309   : > { %v7980_v5 = vpop.xlane.xlu1 %3068 }
 0x30d   : > { %v7982_v7 = vpop.xlane.xlu1 %3086 }
 0x312   : > { %v7984_v47 = vpop.xlane.xlu1 %3104 }
 0x316   : > { %v7986_v57 = vpop.xlane.xlu1 %3122 }
 0x31a   : > { %v7988_v33 = vpop.xlane.xlu1 %3140 }
 0x331   : > { %v2522_v56 = vpop.f32.mrb[64].mxu0 }
 0x332   : > { %2812 = vst [vmem:[%s7992_s21] sm:$0xff] %v2522_v56  ;;  %v2894_v26 = vsub.f32 %v2522_v56, %v4043_v22  ;;  %v2524_v60 = vpop.f32.mrb[65].mxu0 }
 0x333   : > { %2813 = vst [vmem:[%s7992_s21 + $0x8] sm:$0xff] %v2524_v60  ;;  %v2895_v52 = vsub.f32 %v2524_v60, %v4044_v34  ;;  %v4051_v60 = vld [vmem:[%s4425_s18 + $0x40] sm:$0xff] }
 0x334   : > { %v2926_v61 = vmul.f32 %v2894_v26, %v2894_v26 }
 0x335   : > { %v2611_v1 = vpop.f32.mrb[64].mxu1  ;;  %v2927_v25 = vmul.f32 %v2895_v52, %v2895_v52 }
 0x336   : > { %2814 = vst [vmem:[%s7992_s21 + $0x10] sm:$0xff] %v2611_v1  ;;  %v2896_v35 = vsub.f32 %v2611_v1, %v4045_v18  ;;  %v2613_v21 = vpop.f32.mrb[65].mxu1  ;;  %v2528_v6 = vpop.f32.mrb[66].mxu0  ;;  %v4052_v1 = vld [vmem:[%s4425_s18 + $0x48] sm:$0xff] }
 0x337   : > { %2815 = vst [vmem:[%s7992_s21 + $0x18] sm:$0xff] %v2613_v21  ;;  %v2897_v9 = vsub.f32 %v2613_v21, %v4046_v4  ;;  %2820 = vst [vmem:[%s7992_s21 + $0x40] sm:$0xff] %v2528_v6  ;;  %v2530_v12 = vpop.f32.mrb[67].mxu0  ;;  %v2958_v38 = vadd.f32 %v2927_v25, %v2926_v61  ;;  %v2902_v34 = vsub.f32 %v2528_v6, %v4051_v60 }
 0x338   : > { %v2928_v29 = vmul.f32 %v2896_v35, %v2896_v35  ;;  %2821 = vst [vmem:[%s7992_s21 + $0x48] sm:$0xff] %v2530_v12  ;;  %v2903_v25 = vsub.f32 %v2530_v12, %v4052_v1  ;;  %v4059_v1 = vld [vmem:[%s4425_s18 + $0x80] sm:$0xff] }
 0x339   : > { %v2929_v55 = vmul.f32 %v2897_v9, %v2897_v9  ;;  %v8004_v42 = vpop.f32.mrb[66].mxu1  ;;  %v2934_v6 = vmul.f32 %v2902_v34, %v2902_v34  ;;  %v4058_v34 = vld [vmem:[%s4425_s18 + $0x78] sm:$0xff] }
 0x33a   : > { %v2959_v27 = vadd.f32 %v2958_v38, %v2928_v29  ;;  %2822 = vst [vmem:[%s7992_s21 + $0x50] sm:$0xff] %v8004_v42  ;;  %v8008_v49 = vpop.f32.mrb[67].mxu1  ;;  %v8010_v50 = vpop.f32.mrb[68].mxu0  ;;  %v4053_v38 = vld [vmem:[%s4425_s18 + $0x50] sm:$0xff] }
 0x33b   : > { %2823 = vst [vmem:[%s7992_s21 + $0x58] sm:$0xff] %v8008_v49  ;;  %2828 = vst [vmem:[%s7992_s21 + $0x80] sm:$0xff] %v8010_v50  ;;  %v8016_v58 = vpop.f32.mrb[69].mxu0  ;;  %v2904_v29 = vsub.f32 %v8004_v42, %v4053_v38 }
 0x33c   : > { %v2960_v54 = vadd.f32 %v2959_v27, %v2929_v55  ;;  %2829 = vst [vmem:[%s7992_s21 + $0x88] sm:$0xff] %v8016_v58  ;;  %v4054_v55 = vld [vmem:[%s4425_s18 + $0x58] sm:$0xff] }
 0x33d   : > { %v2905_v27 = vsub.f32 %v8008_v49, %v4054_v55 }
 0x33e   : > { %v8020_v44 = vpop.f32.mrb[70].mxu0 }
 0x33f   : > { %2836 = vst [vmem:[%s7992_s21 + $0xc0] sm:$0xff] %v8020_v44  ;;  %v8024_v19 = vpop.f32.mrb[71].mxu0 }
 0x340   : > { %2837 = vst [vmem:[%s7992_s21 + $0xc8] sm:$0xff] %v8024_v19 }
 0x343   : > { %v8028_v31 = vpop.f32.mrb[68].mxu1 }
 0x344   : > { %2830 = vst [vmem:[%s7992_s21 + $0x90] sm:$0xff] %v8028_v31  ;;  %v8032_v36 = vpop.f32.mrb[69].mxu1 }
 0x345   : > { %2831 = vst [vmem:[%s7992_s21 + $0x98] sm:$0xff] %v8032_v36 }
 0x347   : > { %v8036_v28 = vpop.f32.mrb[70].mxu1 }
 0x348   : > { %2838 = vst [vmem:[%s7992_s21 + $0xd0] sm:$0xff] %v8036_v28  ;;  %v8040_v17 = vpop.f32.mrb[71].mxu1 }
 0x349   : > { %2839 = vst [vmem:[%s7992_s21 + $0xd8] sm:$0xff] %v8040_v17 }
 0x355   : > { %v2700_v11 = vpop.f32.mrb[72].mxu0 }
 0x356   : > { %2816 = vst [vmem:[%s7992_s21 + $0x20] sm:$0xff] %v2700_v11  ;;  %v2898_v59 = vsub.f32 %v2700_v11, %v4047_v41  ;;  %v2702_v48 = vpop.f32.mrb[73].mxu0  ;;  %v2789_v20 = vpop.f32.mrb[72].mxu1  ;;  %v2935_v11 = vmul.f32 %v2903_v25, %v2903_v25  ;;  %v2910_v25 = vsub.f32 %v8010_v50, %v4059_v1  ;;  %v4063_v50 = vld [vmem:[%s4425_s18 + $0xa0] sm:$0xff] }
 0x357   : > { %2817 = vst [vmem:[%s7992_s21 + $0x28] sm:$0xff] %v2702_v48  ;;  %v2899_v14 = vsub.f32 %v2702_v48, %v4048_v10  ;;  %2818 = vst [vmem:[%s7992_s21 + $0x30] sm:$0xff] %v2789_v20  ;;  %v2900_v45 = vsub.f32 %v2789_v20, %v4049_v30  ;;  %v2791_v62 = vpop.f32.mrb[73].mxu1  ;;  %v2936_v10 = vmul.f32 %v2904_v29, %v2904_v29 }
 0x358   : > { %v2930_v3 = vmul.f32 %v2898_v59, %v2898_v59  ;;  %2819 = vst [vmem:[%s7992_s21 + $0x38] sm:$0xff] %v2791_v62  ;;  %v2901_v37 = vsub.f32 %v2791_v62, %v4050_v39  ;;  %v4055_v59 = vld [vmem:[%s4425_s18 + $0x60] sm:$0xff]  ;;  %v2937_v30 = vmul.f32 %v2905_v27, %v2905_v27  ;;  %v2942_v29 = vmul.f32 %v2910_v25, %v2910_v25  ;;  %v4062_v27 = vld [vmem:[%s4425_s18 + $0x98] sm:$0xff]  ;;  %v4069_v25 = vld [vmem:[%s4425_s18 + $0xd0] sm:$0xff] }
 0x359   : > { %v2931_v2 = vmul.f32 %v2899_v14, %v2899_v14  ;;  %v2706_v16 = vpop.f32.mrb[74].mxu0  ;;  %v2932_v0 = vmul.f32 %v2900_v45, %v2900_v45 }
 0x35a   : > { %v2961_v32 = vadd.f32 %v2960_v54, %v2930_v3  ;;  %2824 = vst [vmem:[%s7992_s21 + $0x60] sm:$0xff] %v2706_v16  ;;  %v2708_v56 = vpop.f32.mrb[75].mxu0  ;;  %v2795_v22 = vpop.f32.mrb[74].mxu1  ;;  %v2933_v35 = vmul.f32 %v2901_v37, %v2901_v37  ;;  %v2906_v48 = vsub.f32 %v2706_v16, %v4055_v59  ;;  %v4056_v3 = vld [vmem:[%s4425_s18 + $0x68] sm:$0xff]  ;;  %v4057_v16 = vld [vmem:[%s4425_s18 + $0x70] sm:$0xff] }
 0x35b   : > { %2825 = vst [vmem:[%s7992_s21 + $0x68] sm:$0xff] %v2708_v56  ;;  %2826 = vst [vmem:[%s7992_s21 + $0x70] sm:$0xff] %v2795_v22  ;;  %v2797_v26 = vpop.f32.mrb[75].mxu1 }
 0x35c   : > { %v2962_v52 = vadd.f32 %v2961_v32, %v2931_v2  ;;  %2827 = vst [vmem:[%s7992_s21 + $0x78] sm:$0xff] %v2797_v26  ;;  %v2938_v45 = vmul.f32 %v2906_v48, %v2906_v48  ;;  %v2907_v2 = vsub.f32 %v2708_v56, %v4056_v3  ;;  %v2908_v32 = vsub.f32 %v2795_v22, %v4057_v16  ;;  %v4061_v22 = vld [vmem:[%s4425_s18 + $0x90] sm:$0xff] }
 0x35d   : > { %v2712_v61 = vpop.f32.mrb[76].mxu0  ;;  %v4065_v3 = vld [vmem:[%s4425_s18 + $0xb0] sm:$0xff] }
 0x35e   : > { %v2963_v18 = vadd.f32 %v2962_v52, %v2932_v0  ;;  %2832 = vst [vmem:[%s7992_s21 + $0xa0] sm:$0xff] %v2712_v61  ;;  %v2714_v21 = vpop.f32.mrb[77].mxu0  ;;  %v8059_v4 = vpop.f32.mrb[76].mxu1  ;;  %v2939_v37 = vmul.f32 %v2907_v2, %v2907_v2  ;;  %v2940_v60 = vmul.f32 %v2908_v32, %v2908_v32  ;;  %v2909_v52 = vsub.f32 %v2797_v26, %v4058_v34  ;;  %v4068_v34 = vld [vmem:[%s4425_s18 + $0xc8] sm:$0xff] }
 0x35f   : > { %2833 = vst [vmem:[%s7992_s21 + $0xa8] sm:$0xff] %v2714_v21  ;;  %2834 = vst [vmem:[%s7992_s21 + $0xb0] sm:$0xff] %v8059_v4  ;;  %v8064_v9 = vpop.f32.mrb[77].mxu1  ;;  %v2913_v26 = vsub.f32 %v8032_v36, %v4062_v27  ;;  %v2914_v59 = vsub.f32 %v2712_v61, %v4063_v50 }
 0x360   : > { %v2964_v12 = vadd.f32 %v2963_v18, %v2933_v35  ;;  %2835 = vst [vmem:[%s7992_s21 + $0xb8] sm:$0xff] %v8064_v9  ;;  %v4060_v35 = vld [vmem:[%s4425_s18 + $0x88] sm:$0xff]  ;;  %v2941_v56 = vmul.f32 %v2909_v52, %v2909_v52 }
 0x361   : > { %v8072_v54 = vpop.f32.mrb[78].mxu0 }
 0x362   : > { %v2965_v41 = vadd.f32 %v2964_v12, %v2934_v6  ;;  %2840 = vst [vmem:[%s7992_s21 + $0xe0] sm:$0xff] %v8072_v54  ;;  %v8077_v20 = vpop.f32.mrb[79].mxu0  ;;  %v8079_v42 = vpop.f32.mrb[78].mxu1  ;;  %v2911_v6 = vsub.f32 %v8016_v58, %v4060_v35  ;;  %v2912_v12 = vsub.f32 %v8028_v31, %v4061_v22  ;;  %v2916_v31 = vsub.f32 %v8059_v4, %v4065_v3 }
 0x363   : > { %2841 = vst [vmem:[%s7992_s21 + $0xe8] sm:$0xff] %v8077_v20  ;;  %2842 = vst [vmem:[%s7992_s21 + $0xf0] sm:$0xff] %v8079_v42  ;;  %v8085_v49 = vpop.f32.mrb[79].mxu1 }
 0x364   : > { %v2966_v14 = vadd.f32 %v2965_v41, %v2935_v11  ;;  %2843 = vst [vmem:[%s7992_s21 + $0xf8] sm:$0xff] %v8085_v49  ;;  %v2943_v11 = vmul.f32 %v2911_v6, %v2911_v6  ;;  %v2944_v48 = vmul.f32 %v2912_v12, %v2912_v12  ;;  %v2948_v32 = vmul.f32 %v2916_v31, %v2916_v31  ;;  %v4070_v6 = vld [vmem:[%s4425_s18 + $0xd8] sm:$0xff] }
 0x366   : > { %v2967_v62 = vadd.f32 %v2966_v14, %v2936_v10  ;;  %v2945_v10 = vmul.f32 %v2913_v26, %v2913_v26  ;;  %v2946_v14 = vmul.f32 %v2914_v59, %v2914_v59  ;;  %v4072_v26 = vld [vmem:[%s4425_s18 + $0xe8] sm:$0xff] }
 0x368   : > { %v2968_v0 = vadd.f32 %v2967_v62, %v2937_v30 }
 0x36a   : > { %v2969_v39 = vadd.f32 %v2968_v0, %v2938_v45  ;;  %v4064_v45 = vld [vmem:[%s4425_s18 + $0xa8] sm:$0xff]  ;;  %v4066_v0 = vld [vmem:[%s4425_s18 + $0xb8] sm:$0xff] }
 0x36b   : > { %v2915_v62 = vsub.f32 %v2714_v21, %v4064_v45  ;;  %v2917_v61 = vsub.f32 %v8064_v9, %v4066_v0  ;;  %v2919_v21 = vsub.f32 %v8024_v19, %v4068_v34  ;;  %v2921_v9 = vsub.f32 %v8040_v17, %v4070_v6 }
 0x36c   : > { %v2970_v18 = vadd.f32 %v2969_v39, %v2939_v37  ;;  %v4067_v39 = vld [vmem:[%s4425_s18 + $0xc0] sm:$0xff] }
 0x36d   : > { %v2947_v16 = vmul.f32 %v2915_v62, %v2915_v62  ;;  %v2918_v37 = vsub.f32 %v8020_v44, %v4067_v39  ;;  %v2949_v1 = vmul.f32 %v2917_v61, %v2917_v61  ;;  %v4071_v44 = vld [vmem:[%s4425_s18 + $0xe0] sm:$0xff]  ;;  %v2953_v12 = vmul.f32 %v2921_v9, %v2921_v9 }
 0x36e   : > { %v2971_v38 = vadd.f32 %v2970_v18, %v2940_v60  ;;  %v2920_v18 = vsub.f32 %v8036_v28, %v4069_v25 }
 0x36f   : > { %v2950_v4 = vmul.f32 %v2918_v37, %v2918_v37 }
 0x370   : > { %v2972_v55 = vadd.f32 %v2971_v38, %v2941_v56  ;;  %v2951_v38 = vmul.f32 %v2919_v21, %v2919_v21  ;;  %v2952_v22 = vmul.f32 %v2920_v18, %v2920_v18 }
 0x372   : > { %v2973_v41 = vadd.f32 %v2972_v55, %v2942_v29  ;;  %v2922_v29 = vsub.f32 %v8072_v54, %v4071_v44 }
 0x374   : > { %v2974_v58 = vadd.f32 %v2973_v41, %v2943_v11  ;;  %v2954_v55 = vmul.f32 %v2922_v29, %v2922_v29  ;;  %v2923_v11 = vsub.f32 %v8077_v20, %v4072_v26  ;;  %v4073_v41 = vld [vmem:[%s4425_s18 + $0xf0] sm:$0xff] }
 0x375   : > { %v2924_v28 = vsub.f32 %v8079_v42, %v4073_v41 }
 0x376   : > { %v2975_v30 = vadd.f32 %v2974_v58, %v2944_v48  ;;  %v2955_v17 = vmul.f32 %v2923_v11, %v2923_v11  ;;  %v4074_v58 = vld [vmem:[%s4425_s18 + $0xf8] sm:$0xff] }
 0x377   : > { %v2956_v48 = vmul.f32 %v2924_v28, %v2924_v28 }
 0x378   : > { %v2976_v2 = vadd.f32 %v2975_v30, %v2945_v10  ;;  %v2925_v10 = vsub.f32 %v8085_v49, %v4074_v58 }
 0x37a   : > { %v2977_v36 = vadd.f32 %v2976_v2, %v2946_v14  ;;  %v2957_v54 = vmul.f32 %v2925_v10, %v2925_v10 }
 0x37c   : > { %v2978_v60 = vadd.f32 %v2977_v36, %v2947_v16 }
 0x37e   : > { %v2979_v52 = vadd.f32 %v2978_v60, %v2948_v32 }
 0x380   : > { %v2980_v35 = vadd.f32 %v2979_v52, %v2949_v1 }
 0x382   : > { %v2981_v56 = vadd.f32 %v2980_v35, %v2950_v4 }
 0x384   : > { %v2982_v19 = vadd.f32 %v2981_v56, %v2951_v38 }
 0x386   : > { %v2983_v27 = vadd.f32 %v2982_v19, %v2952_v22 }
 0x388   : > { %v2984_v50 = vadd.f32 %v2983_v27, %v2953_v12 }
 0x38a   : > { %v2985_v59 = vadd.f32 %v2984_v50, %v2954_v55 }
 0x38c   : > { %v2986_v14 = vadd.f32 %v2985_v59, %v2955_v17 }
 0x38e   : > { %v2987_v30 = vadd.f32 %v2986_v14, %v2956_v48 }
 0x390   : > { %v2988_v45 = vadd.f32 %v2987_v30, %v2957_v54 }
 0x392   : > { %2989 = vadd.xlane.f32.xlu0 %v2988_v45 }
 0x396   : > { %3014 = vadd.xlane.f32.xlu0 %v7884_v23 }
 0x39a   : > { %3023 = vadd.xlane.f32.xlu0 %v7901_v43 }
 0x39e   : > { %3041 = vadd.xlane.f32.xlu0 %v7916_v13 }
 0x3a2   : > { %3059 = vadd.xlane.f32.xlu0 %v7935_v40 }
 0x3a6   : > { %3077 = vadd.xlane.f32.xlu0 %v7943_v63 }
 0x3aa   : > { %3095 = vadd.xlane.f32.xlu0 %v7956_v8 }
 0x3ae   : > { %3113 = vadd.xlane.f32.xlu0 %v7966_v53 }
 0x3b2   : > { %3131 = vadd.xlane.f32.xlu0 %v7972_v15  ;;  %v4245_v15 = vmov (!%p3773_p8), 0.0  }
 0x3b3   : > { %3147 = vst.msk [vmem:[%s4443_s11] sm:$0xff] (!%p3773_p8), %vm3146_vm8, %v4245_v15  ;;  %3148 = vst.msk [vmem:[%s4443_s11 + $0x8] sm:$0xff] (!%p3773_p8), %vm3146_vm8, %v4245_v15 }
 0x3b4   : > { %3149 = vst.msk [vmem:[%s4443_s11 + $0x10] sm:$0xff] (!%p3773_p8), %vm3146_vm8, %v4245_v15  ;;  %3150 = vst.msk [vmem:[%s4443_s11 + $0x18] sm:$0xff] (!%p3773_p8), %vm3146_vm8, %v4245_v15 }
 0x3b5   : > { %3151 = vst.msk [vmem:[%s4443_s11 + $0x20] sm:$0xff] (!%p3773_p8), %vm3146_vm8, %v4245_v15  ;;  %3152 = vst.msk [vmem:[%s4443_s11 + $0x28] sm:$0xff] (!%p3773_p8), %vm3146_vm8, %v4245_v15 }
 0x3b6   : > { %3153 = vst.msk [vmem:[%s4443_s11 + $0x30] sm:$0xff] (!%p3773_p8), %vm3146_vm8, %v4245_v15  ;;  %3154 = vst.msk [vmem:[%s4443_s11 + $0x38] sm:$0xff] (!%p3773_p8), %vm3146_vm8, %v4245_v15 }
 0x3b7   : > { %3155 = vst.msk [vmem:[%s4443_s11 + $0x40] sm:$0xff] (!%p3773_p8), %vm3146_vm8, %v4245_v15  ;;  %3156 = vst.msk [vmem:[%s4443_s11 + $0x48] sm:$0xff] (!%p3773_p8), %vm3146_vm8, %v4245_v15 }
 0x3b8   : > { %3157 = vst.msk [vmem:[%s4443_s11 + $0x50] sm:$0xff] (!%p3773_p8), %vm3146_vm8, %v4245_v15  ;;  %3158 = vst.msk [vmem:[%s4443_s11 + $0x58] sm:$0xff] (!%p3773_p8), %vm3146_vm8, %v4245_v15 }
 0x3b9   : > { %3159 = vst.msk [vmem:[%s4443_s11 + $0x60] sm:$0xff] (!%p3773_p8), %vm3146_vm8, %v4245_v15  ;;  %3160 = vst.msk [vmem:[%s4443_s11 + $0x68] sm:$0xff] (!%p3773_p8), %vm3146_vm8, %v4245_v15 }
 0x3ba   : > { %3161 = vst.msk [vmem:[%s4443_s11 + $0x70] sm:$0xff] (!%p3773_p8), %vm3146_vm8, %v4245_v15  ;;  %3162 = vst.msk [vmem:[%s4443_s11 + $0x78] sm:$0xff] (!%p3773_p8), %vm3146_vm8, %v4245_v15 }
 0x3bb   : > { %3164 = vst.msk [vmem:[%s4438_s24] sm:$0x1] (!%p3773_p8), %vm3163_vm1, %v4245_v15 }
 0x41f   : > { %v2990_v20 = vpop.xlane.xlu0 %2989 }
 0x420   : > { %v2991_v42 = vrot.slane %v2990_v20, 4 }
 0x422   : > { %v2992_v49 = vadd.f32 %v2991_v42, %v2990_v20 }
 0x423   : > { %v3015_v62 = vpop.xlane.xlu0 %3014 }
 0x424   : > { %v2993_v3 = vrot.slane %v2992_v49, 2 }
 0x426   : > { %v2994_v23 = vadd.f32 %v2993_v3, %v2992_v49 }
 0x427   : > { %v3024_v31 = vpop.xlane.xlu0 %3023 }
 0x428   : > { %v2995_v43 = vrot.slane %v2994_v23, 1 }
 0x42a   : > { %v2996_v2 = vadd.f32 %v2995_v43, %v2994_v23 }
 0x42b   : > { %v3042_v13 = vpop.xlane.xlu0 %3041 }
 0x42c   : > { %3945 = vpush %v2996_v2 }
 0x42f   : > { %v3060_v40 = vpop.xlane.xlu0 %3059 }
 0x433   : > { %v3078_v36 = vpop.xlane.xlu0 %3077 }
 0x437   : > { %v8130_v63 = vpop.xlane.xlu0 %3095 }
 0x43b   : > { %v8132_v8 = vpop.xlane.xlu0 %3113 }
 0x43f   : > { %v8134_v53 = vpop.xlane.xlu0 %3131 }
 0x457   : > { %3145 = sbr.rel (%p3773_p8) target bundleno = 1118 (0x45e), region = 44 }
 0x45d   : > { %s8136_s10 = spop %3945 }
 0x45e PF: > { %v3165_v16 = vld [vmem:[%s4443_s11] sm:$0xff]  ;;  %vm3197_vm15 = vcmask 7168   ;;  %v3166_v32 = vld [vmem:[%s4443_s11 + $0x8] sm:$0xff]  ;;  %v3167_v0 = vld [vmem:[%s4443_s11 + $0x10] sm:$0xff]  ;;  %s8567_s18 = sshll.u32 %s4219_s27, 3  ;;  %s3777_s5 = sshll.u32 %s4223_s28, 6  ;;  %v3215_v56 = vstv %s8136_s10 }
 0x45f   : > { %v3181_v61 = vadd.f32 %v3165_v16, %v7974_v51  ;;  %v3182_v39 = vadd.f32 %v3166_v32, %v3015_v62  ;;  %v3183_v37 = vadd.f32 %v3167_v0, %v3024_v31  ;;  %v3168_v60 = vld [vmem:[%s4443_s11 + $0x18] sm:$0xff]  ;;  %v3169_v34 = vld [vmem:[%s4443_s11 + $0x20] sm:$0xff]  ;;  %v3170_v21 = vld [vmem:[%s4443_s11 + $0x28] sm:$0xff]  ;;  %s3245_s14 = sadd.s32 %s3777_s5, %s8567_s18  ;;  %s3248_s13 = sshll.u32 %s7992_s21, 4  ;;  %vm3217_vm12 = vcmask 0   ;;  %s8201_s13 = int_to_ptr.vmem [resolvable:$true] %s3248_s13 }
 0x460   : > { %v3184_v52 = vadd.f32 %v3168_v60, %v7976_v46  ;;  %v3185_v1 = vadd.f32 %v3169_v34, %v3042_v13  ;;  %v3186_v4 = vadd.f32 %v3170_v21, %v7978_v24  ;;  %v3171_v51 = vld [vmem:[%s4443_s11 + $0x30] sm:$0xff]  ;;  %v3172_v25 = vld [vmem:[%s4443_s11 + $0x38] sm:$0xff]  ;;  %v3173_v18 = vld [vmem:[%s4443_s11 + $0x40] sm:$0xff]  ;;  %s3778_s19 = sshll.u32 %s3245_s14, 7  ;;  %s8946_s21 = sld [smem:[#allocation13_spill]] }
 0x461   : > { %3198 = vst.msk [vmem:[%s4443_s11] sm:$0xff] %vm3197_vm15, %v3181_v61  ;;  %3199 = vst.msk [vmem:[%s4443_s11 + $0x8] sm:$0xff] %vm3197_vm15, %v3182_v39  ;;  %v3187_v46 = vadd.f32 %v3171_v51, %v3060_v40  ;;  %v3188_v24 = vadd.f32 %v3172_v25, %v7980_v5  ;;  %v3189_v35 = vadd.f32 %v3173_v18, %v3078_v36  ;;  %v3174_v6 = vld [vmem:[%s4443_s11 + $0x48] sm:$0xff]  ;;  %v3175_v9 = vld [vmem:[%s4443_s11 + $0x50] sm:$0xff]  ;;  %s8218_s23 = scalar_lea.hbm %s8330_s4, %s3778_s19  ;;  %s4105_s5 = scalar_lea.vmem %s8201_s13, 4096 }
 0x462   : > { %3200 = vst.msk [vmem:[%s4443_s11 + $0x10] sm:$0xff] %vm3197_vm15, %v3183_v37  ;;  %v3176_v38 = vld [vmem:[%s4443_s11 + $0x58] sm:$0xff]  ;;  %3201 = vst.msk [vmem:[%s4443_s11 + $0x18] sm:$0xff] %vm3197_vm15, %v3184_v52  ;;  %v3190_v5 = vadd.f32 %v3174_v6, %v7982_v7  ;;  %v3191_v44 = vadd.f32 %v3175_v9, %v8130_v63  ;;  %v3177_v22 = vld [vmem:[%s4443_s11 + $0x60] sm:$0xff]  ;;  %p4106_p12 = scmp.ne.s32.totalorder %s8201_s13, %s4105_s5  ;;  %s4246_s14 = smov [#allocation5]  }
 0x463   : > { %3202 = vst.msk [vmem:[%s4443_s11 + $0x20] sm:$0xff] %vm3197_vm15, %v3185_v1  ;;  %3203 = vst.msk [vmem:[%s4443_s11 + $0x28] sm:$0xff] %vm3197_vm15, %v3186_v4  ;;  %v3192_v29 = vadd.f32 %v3176_v38, %v7984_v47  ;;  %v3178_v19 = vld [vmem:[%s4443_s11 + $0x68] sm:$0xff]  ;;  %v3179_v12 = vld [vmem:[%s4443_s11 + $0x70] sm:$0xff]  ;;  %v3193_v7 = vadd.f32 %v3177_v22, %v8132_v8  ;;  %s4109_s19 = sshll.u32 %s4246_s14, 4  ;;  %s4110_s19 = int_to_ptr.vmem [resolvable:$false] %s4109_s19 }
 0x464   : > { %3204 = vst.msk [vmem:[%s4443_s11 + $0x30] sm:$0xff] %vm3197_vm15, %v3187_v46  ;;  %3205 = vst.msk [vmem:[%s4443_s11 + $0x38] sm:$0xff] %vm3197_vm15, %v3188_v24  ;;  %v3194_v47 = vadd.f32 %v3178_v19, %v7986_v57  ;;  %v3195_v55 = vadd.f32 %v3179_v12, %v8134_v53  ;;  %v3180_v27 = vld [vmem:[%s4443_s11 + $0x78] sm:$0xff]  ;;  %v3214_v26 = vld [vmem:[%s4438_s24] sm:$0x1]  ;;  %s4111_s15 = scalar_lea.vmem %s4110_s19, 8192  ;;  %p4112_p2 = scmp.lt.s32.totalorder %s8201_s13, %s4110_s19 }
 0x465   : > { %3206 = vst.msk [vmem:[%s4443_s11 + $0x40] sm:$0xff] %vm3197_vm15, %v3189_v35  ;;  %3207 = vst.msk [vmem:[%s4443_s11 + $0x48] sm:$0xff] %vm3197_vm15, %v3190_v5  ;;  %v3196_v11 = vadd.f32 %v3180_v27, %v7988_v33  ;;  %v3216_v41 = vadd.f32 %v3215_v56, %v3214_v26  ;;  %p4113_p4 = scmp.lt.s32.totalorder %s4111_s15, %s4105_s5 }
 0x466   : > { %3208 = vst.msk [vmem:[%s4443_s11 + $0x50] sm:$0xff] %vm3197_vm15, %v3191_v44  ;;  %3209 = vst.msk [vmem:[%s4443_s11 + $0x58] sm:$0xff] %vm3197_vm15, %v3192_v29  ;;  %p8947_p0 = scmp.ne.s32.totalorder %s8946_s21, 0 }
 0x467   : > { %p4114_p6 = por %p4113_p4, %p4112_p2 }
 0x468   : > { %p4107_p11 = pnand %p4106_p12, %p8947_p0 }
 0x46a   : > { %p4108_p13 = pneg %p4107_p11 }
 0x46c   : > { %p4115_p7 = pnand %p4114_p6, %p4108_p13 }
 0x46e   : > { %4118 = shalt.err (!%p4115_p7)
}
 0x46f   : > { %s4119_s17 = scalar_lea.hbm %s8218_s23, 4096  ;;  %s4123_s14 = scalar_lea.hbm %s8330_s4, 16384 }
 0x470   : > { %p4120_p10 = scmp.ne.s32.totalorder %s8218_s23, %s4119_s17  ;;  %p4124_p5 = scmp.lt.u32.totalorder %s8218_s23, %s8330_s4 }
 0x471   : > { %p4125_p9 = scmp.lt.u32.totalorder %s4123_s14, %s4119_s17  ;;  %p4127_p12 = scmp.lt.u32.totalorder %s4119_s17, %s8218_s23 }
 0x472   : > { %p4121_p1 = pnand %p4120_p10, %p8947_p0 }
 0x473   : > { %p4126_p8 = por %p4125_p9, %p4124_p5 }
 0x474   : > { %p4122_p3 = pneg %p4121_p1 }
 0x475   : > { %p4128_p11 = por %p4127_p12, %p4126_p8 }
 0x477   : > { %p4129_p13 = pnand %p4128_p11, %p4122_p3 }
 0x479   : > { %4132 = shalt.err (!%p4129_p13)
}
 0x47a   : > { %s4247_s5 = smov 1024   ;;  %s4248_s0 = smov 2048   ;;  %3210 = vst.msk [vmem:[%s4443_s11 + $0x60] sm:$0xff] %vm3197_vm15, %v3193_v7  ;;  %3211 = vst.msk [vmem:[%s4443_s11 + $0x68] sm:$0xff] %vm3197_vm15, %v3194_v47 }
 0x47b   : > { %s4249_s18 = smov 64   ;;  %s8948_s10 = scalar_lea.sflag [#allocation4], %s4419_s9  ;;  %3212 = vst.msk [vmem:[%s4443_s11 + $0x70] sm:$0xff] %vm3197_vm15, %v3195_v55  ;;  %3213 = vst.msk [vmem:[%s4443_s11 + $0x78] sm:$0xff] %vm3197_vm15, %v3196_v11 }
 0x47c   : > { %3949 = dma.vmem_to_hbm [thread:$0]  (%p8947_p0), %s8201_s13, 4096, %s8218_s23, %s8948_s10, %s4247_s5, %s4248_s0, %s4249_s18  }
 0x47d   : > { %s3780_s15 = sshll.u32 %s4223_s28, 4  ;;  %3218 = vst.msk [vmem:[%s4438_s24] sm:$0x1] %vm3217_vm12, %v3216_v41  ;;  %s8949_s17 = sshll.u32 %s4219_s27, 3 }
 0x47e   : > { %s3263_s14 = sadd.s32 %s3780_s15, %s8949_s17  ;;  %s3267_s19 = sshll.u32 %s7237_s16, 4  ;;  %s8276_s19 = int_to_ptr.vmem [resolvable:$true] %s3267_s19 }
 0x47f   : > { %s3781_s1 = sshll.u32 %s3263_s14, 4  ;;  %s8950_s13 = sld [smem:[#allocation105_spill]] }
 0x480   : > { %s3225_s5 = scalar_lea.sflag [#allocation7], %s4419_s9  ;;  %s4133_s0 = scalar_lea.vmem %s8276_s19, 128 }
 0x481   : > { %p4134_p2 = scmp.ne.s32.totalorder %s8276_s19, %s4133_s0  ;;  %s4250_s28 = smov [#allocation6]  }
 0x482   : > { %s4137_s27 = sshll.u32 %s4250_s28, 4  ;;  %s4138_s27 = int_to_ptr.vmem [resolvable:$false] %s4137_s27 }
 0x483   : > { %p4135_p4 = pnand %p4134_p2, %p8947_p0  ;;  %s4139_s24 = scalar_lea.vmem %s4138_s27, 256 }
 0x484   : > { %p4140_p7 = scmp.lt.s32.totalorder %s8276_s19, %s4138_s27  ;;  %p4141_p10 = scmp.lt.s32.totalorder %s4139_s24, %s4133_s0 }
 0x485   : > { %s3265_s23 = scalar_lea.hbm %s8950_s13, %s3781_s1  ;;  %p4136_p6 = pneg %p4135_p4 }
 0x486   : > { %p4142_p1 = por %p4141_p10, %p4140_p7 }
 0x488   : > { %p4143_p3 = pnand %p4142_p1, %p4136_p6 }
 0x48a   : > { %4146 = shalt.err (!%p4143_p3)
}
 0x48b   : > { %s4147_s2 = scalar_lea.hbm %s3265_s23, 128  ;;  %s4151_s9 = scalar_lea.hbm %s8950_s13, 512 }
 0x48c   : > { %p4148_p5 = scmp.ne.s32.totalorder %s3265_s23, %s4147_s2  ;;  %p4152_p12 = scmp.lt.u32.totalorder %s3265_s23, %s8950_s13 }
 0x48d   : > { %p4153_p11 = scmp.lt.u32.totalorder %s4151_s9, %s4147_s2  ;;  %p4155_p2 = scmp.lt.u32.totalorder %s4147_s2, %s3265_s23 }
 0x48e   : > { %p4149_p9 = pnand %p4148_p5, %p8947_p0 }
 0x48f   : > { %p4154_p13 = por %p4153_p11, %p4152_p12 }
 0x490   : > { %p4150_p8 = pneg %p4149_p9 }
 0x491   : > { %p4156_p4 = por %p4155_p2, %p4154_p13 }
 0x493   : > { %p4157_p6 = pnand %p4156_p4, %p4150_p8 }
 0x495   : > { %4160 = shalt.err (!%p4157_p6)
}
 0x496   : > { %3950 = dma.vmem_to_hbm [thread:$0]  (%p8947_p0), %s8276_s19, 128, %s3265_s23, %s3225_s5  }
 0x497 PF: > { %s8951_s18 = sld [smem:[#allocation11_spill]]  ;;  %p3965_p7 = scmp.ge.s32.totalorder %s4235_s8, 2 }
 0x498   : > { %p8952_p10 = scmp.ne.s32.totalorder %s8579_s20, 0 }
 0x49a   : > { %p3958_p1 = pnand %p3965_p7, %p8952_p10 }
 0x49d   : > { %s3285_s10 = sand.u32 1, %s8951_s18  }
 0x49e   : > { %s3286_s15 = scalar_lea.sflag [#allocation4], %s3285_s10 }
 0x49f   : > { %4198 = dma.done.wait (!%p3958_p1), %s3286_s15, 4096  }
 0x4a0   : > { %4200 = vsyncadd (!%p3958_p1), %s3286_s15, 4294963200  ;;  %s3295_s17 = scalar_lea.sflag [#allocation7], %s3285_s10 }
 0x4a1   : > { %4202 = dma.done.wait (!%p3958_p1), %s3295_s17, 128  }
 0x4a2   : > { %4204 = vsyncadd (!%p3958_p1), %s3295_s17, 4294967168  ;;  %s27_s8 = sadd.s32 1, %s4235_s8   ;;  %s8953_s21 = sld [smem:[#allocation12_spill]] }
 0x4a3   : > { %p24_p3 = scmp.ge.s32.totalorder %s27_s8, 6   ;;  %s8954_s24 = smov %s4211_s25 }
 0x4a4   : > { %s8955_s25 = smov %s4215_s26  ;;  %s8956_s26 = smov %s4369_s22 }
 0x4a5   : > { %s8957_s27 = smov %s4227_s29  ;;  %s8958_s28 = smov %s4231_s30 }
 0x4a6   : > { %s8960_s30 = smov %s8966_s12  ;;  %26 = sbr.rel (!%p24_p3) target bundleno = 15 (0xf), region = 126 }
 0x4a8   : > { %s8959_s29 = smov %s8953_s21 }
 0x4ad   :  { %3314 = vsyncpa [#allocation3], 1 }
 0x4ae   :  { %3316 = vsyncpa [#allocation3 + $0x1], 1 }
 0x4af   :  { %3317 = vsyncpa [#allocation4], 1 }
 0x4b0   :  { %3319 = vsyncpa [#allocation4 + $0x1], 1 }
 0x4b1   :  { %3320 = vsyncpa [#allocation7], 1 }
 0x4b2   :  { %3322 = vsyncpa [#allocation7 + $0x1], 1 }

</bundles_post_ra>
